<compile_context>
chip_gen: v7x
topology: tpu7x:2x2x1
jax: 0.10.0
libtpu: 0.0.40
codegen_flags: <defaults>
</compile_context>

<pallas_src>
import jax
import jax.numpy as jnp
from jax.experimental import pallas as pl
from jax.experimental.pallas import tpu as pltpu


def resblock_kernel(xpad_ref, w1id_ref, w2_ref, t1_ref, t2_ref, bid_ref,
                    o_ref, h1pad_ref):
    """One batch element per grid step.

    xpad_ref:  (H+2, W+2, Cin)    spatially pre-padded input
    w1id_ref:  (9*Cin, 2*Cout)    [BN1-scaled conv1 | identity-conv] im2col weights
    w2_ref:    (9*Cout, Cout)     BN2-scaled conv2 im2col weights
    t1/t2:     (1, Cout)          folded BN shifts
    bid_ref:   (1, Cout)          identity-conv bias
    o_ref:     (H, W, Cout)
    h1pad_ref: (H+2, W+2, Cout)   VMEM scratch holding the zero-padded h1
    """
    H, W, Cout = o_ref.shape
    Cin = xpad_ref.shape[-1]

    def im2col(get_slice, c):
        # Build the (H*W, 9*c) patch matrix: 9 shifted slices concatenated
        # along the lane (channel) dim -> a single MXU matmul per conv.
        cols = []
        for dy in range(3):
            for dx in range(3):
                cols.append(get_slice(dy, dx).reshape(H * W, c))
        return jnp.concatenate(cols, axis=-1)

    # ---- conv1 (BN1-scaled) and identity conv fused into one matmul --------
    xpad = xpad_ref[...]                                   # (H+2, W+2, Cin)
    patches_x = im2col(
        lambda dy, dx: jax.lax.slice(xpad, (dy, dx, 0), (dy + H, dx + W, Cin)),
        Cin)                                               # (H*W, 9*Cin)
    h = jnp.dot(patches_x, w1id_ref[...],
                preferred_element_type=jnp.float32)        # (H*W, 2*Cout)
    h1 = jnp.maximum(h[:, :Cout] + t1_ref[...], 0.0)       # BN1 shift + ReLU
    res = h[:, Cout:] + bid_ref[...]                       # identity branch

    # ---- zero-padded h1 staged in VMEM scratch (no concat-based padding) ----
    h1pad_ref[...] = jnp.zeros_like(h1pad_ref)
    h1pad_ref[pl.ds(1, H), pl.ds(1, W), :] = h1.reshape(H, W, Cout)

    # ---- conv2 (BN2-scaled) -> shift -> ReLU --------------------------------
    patches_h = im2col(
        lambda dy, dx: h1pad_ref[pl.ds(dy, H), pl.ds(dx, W), :],
        Cout)                                              # (H*W, 9*Cout)
    h2 = jnp.dot(patches_h, w2_ref[...],
                 preferred_element_type=jnp.float32)       # (H*W, Cout)
    h2 = jnp.maximum(h2 + t2_ref[...], 0.0)

    out = jnp.maximum(h2 + res, 0.0)
    o_ref[...] = out.reshape(H, W, Cout)


def resblock2d_pallas(x_nchw, p, eps=1e-5):
    x = jnp.transpose(x_nchw, (0, 2, 3, 1)).astype(jnp.float32)  # NCHW -> NHWC
    N, H, W, Cin = x.shape
    Cout = p["w1"].shape[-1]

    xpad = jnp.pad(x, ((0, 0), (1, 1), (1, 1), (0, 0)))

    # Fold BN (eval mode) into a per-output-channel scale folded into the conv
    # weights and an additive shift applied in the kernel.
    s1 = p["gamma1"] / jnp.sqrt(p["var1"] + eps)
    t1 = (p["beta1"] - p["mean1"] * s1).reshape(1, Cout)
    s2 = p["gamma2"] / jnp.sqrt(p["var2"] + eps)
    t2 = (p["beta2"] - p["mean2"] * s2).reshape(1, Cout)

    # im2col weight layout (ky, kx, cin) flattened row-major -> (9*C, Cout);
    # conv1 (scaled) and identity conv fused along the output-channel axis.
    w1s = (p["w1"] * s1).reshape(9 * Cin, Cout)
    wid = p["wid"].reshape(9 * Cin, Cout)
    w1id = jnp.concatenate([w1s, wid], axis=-1)            # (9*Cin, 2*Cout)
    w2s = (p["w2"] * s2).reshape(9 * Cout, Cout)           # (9*Cout, Cout)
    bid = p["bid"].reshape(1, Cout)

    # Scoped-VMEM budget sized from the actual blocks (double-buffered I/O,
    # weights, scratch, im2col temporaries) with 2x headroom.
    itemsize = 4
    est = itemsize * (
        2 * (H + 2) * (W + 2) * Cin                     # input block x2 buffers
        + 2 * H * W * Cout                              # output block x2 buffers
        + 2 * (9 * Cin * 2 * Cout + 9 * Cout * Cout + 3 * Cout)  # weights/shifts
        + (H + 2) * (W + 2) * Cout                      # padded-h1 scratch
        + H * W * 9 * (Cin + Cout)                      # im2col patch matrices
        + H * W * 5 * Cout                              # h / h1 / h2 / res temps
    )
    vmem_limit = int(min(64 * 2**20, max(32 * 2**20, 2 * est)))

    full = lambda shape: pl.BlockSpec(shape, lambda b: (0,) * len(shape))

    out = pl.pallas_call(
        resblock_kernel,
        out_shape=jax.ShapeDtypeStruct((N, H, W, Cout), jnp.float32),
        grid_spec=pltpu.PrefetchScalarGridSpec(
            num_scalar_prefetch=0,
            grid=(N,),
            in_specs=[
                pl.BlockSpec((pl.Squeezed(), H + 2, W + 2, Cin),
                             lambda b: (b, 0, 0, 0)),
                full((9 * Cin, 2 * Cout)),   # fused conv1+identity weights
                full((9 * Cout, Cout)),      # conv2 weights (BN2-scaled)
                full((1, Cout)),             # t1
                full((1, Cout)),             # t2
                full((1, Cout)),             # bid
            ],
            out_specs=pl.BlockSpec((pl.Squeezed(), H, W, Cout),
                                   lambda b: (b, 0, 0, 0)),
            scratch_shapes=[pltpu.VMEM((H + 2, W + 2, Cout), jnp.float32)],
        ),
        compiler_params=pltpu.CompilerParams(
            dimension_semantics=("parallel",),
            vmem_limit_bytes=vmem_limit),
    )(xpad, w1id, w2s, t1, t2, bid)

    return jnp.transpose(out, (0, 3, 1, 2))  # NHWC -> NCHW


def resblock2d_ref(x_nchw, p, eps=1e-5):
    """Pure-JAX reference (XLA convs) for correctness checking."""
    x = jnp.transpose(x_nchw, (0, 2, 3, 1))
    dn = ("NHWC", "HWIO", "NHWC")

    def conv(inp, w):
        return jax.lax.conv_general_dilated(inp, w, (1, 1), "SAME",
                                            dimension_numbers=dn)

    def bn(y, g, b, m, v):
        return (y - m) / jnp.sqrt(v + eps) * g + b

    h = jax.nn.relu(bn(conv(x, p["w1"]), p["gamma1"], p["beta1"],
                       p["mean1"], p["var1"]))
    h = jax.nn.relu(bn(conv(h, p["w2"]), p["gamma2"], p["beta2"],
                       p["mean2"], p["var2"]))
    res = conv(x, p["wid"]) + p["bid"]
    out = jax.nn.relu(h + res)
    return jnp.transpose(out, (0, 3, 1, 2))


def init_params(key, cin, cout):
    ks = jax.random.split(key, 12)
    f32 = jnp.float32
    return {
        "w1":     0.1 * jax.random.normal(ks[0], (3, 3, cin, cout), f32),
        "gamma1": jax.random.uniform(ks[1], (cout,), f32, 0.5, 1.5),
        "beta1":  0.1 * jax.random.normal(ks[2], (cout,), f32),
        "mean1":  0.1 * jax.random.normal(ks[3], (cout,), f32),
        "var1":   jax.random.uniform(ks[4], (cout,), f32, 0.5, 1.5),
        "w2":     0.1 * jax.random.normal(ks[5], (3, 3, cout, cout), f32),
        "gamma2": jax.random.uniform(ks[6], (cout,), f32, 0.5, 1.5),
        "beta2":  0.1 * jax.random.normal(ks[7], (cout,), f32),
        "mean2":  0.1 * jax.random.normal(ks[8], (cout,), f32),
        "var2":   jax.random.uniform(ks[9], (cout,), f32, 0.5, 1.5),
        "wid":    0.1 * jax.random.normal(ks[10], (3, 3, cin, cout), f32),
        "bid":    0.1 * jax.random.normal(ks[11], (cout,), f32),
    }


if __name__ == "__main__":
    N, CIN, COUT, H, W = 2, 4, 8, 16, 16

    key = jax.random.PRNGKey(0)
    kx, kp = jax.random.split(key)
    x = jax.random.normal(kx, (N, CIN, H, W), jnp.float32)  # NCHW like PyTorch
    params = init_params(kp, CIN, COUT)

    out = jax.block_until_ready(resblock2d_pallas(x, params))
    ref = jax.block_until_ready(resblock2d_ref(x, params))

    assert out.shape == (N, COUT, H, W), out.shape
    max_err = jnp.max(jnp.abs(out - ref))
    assert jnp.allclose(out, ref, atol=1e-3, rtol=1e-3), \
        f"max abs err {max_err}"
    print("KERNEL_OK")
</pallas_src>

<mosaic_0001>
module attributes {stable_mosaic.version = 11 : i64} {
  func.func @resblock_kernel(%arg0: i32, %arg1: memref<1x18x18x4xf32, #tpu.memory_space<vmem>>, %arg2: memref<36x16xf32, #tpu.memory_space<vmem>>, %arg3: memref<72x8xf32, #tpu.memory_space<vmem>>, %arg4: memref<1x8xf32, #tpu.memory_space<vmem>>, %arg5: memref<1x8xf32, #tpu.memory_space<vmem>>, %arg6: memref<1x8xf32, #tpu.memory_space<vmem>>, %arg7: memref<1x16x16x8xf32, #tpu.memory_space<vmem>>, %arg8: memref<18x18x8xf32, #tpu.memory_space<vmem>>) attributes {dimension_semantics = [#tpu.dimension_semantics<parallel>], iteration_bounds = array<i64: 2>, scalar_prefetch = 0 : i64, scratch_operands = 1 : i64, tpu.core_type = #tpu.core_type<tc>, window_params = [{transform_indices = @transform_0, window_bounds = array<i64: 1, 18, 18, 4>}, {pipeline_mode = #tpu.pipeline_mode<synchronous>, transform_indices = @transform_1, window_bounds = array<i64: 36, 16>}, {pipeline_mode = #tpu.pipeline_mode<synchronous>, transform_indices = @transform_2, window_bounds = array<i64: 72, 8>}, {pipeline_mode = #tpu.pipeline_mode<synchronous>, transform_indices = @transform_3, window_bounds = array<i64: 1, 8>}, {pipeline_mode = #tpu.pipeline_mode<synchronous>, transform_indices = @transform_4, window_bounds = array<i64: 1, 8>}, {pipeline_mode = #tpu.pipeline_mode<synchronous>, transform_indices = @transform_5, window_bounds = array<i64: 1, 8>}, {transform_indices = @transform_6, window_bounds = array<i64: 1, 16, 16, 8>}]} {
    %c0 = arith.constant 0 : index
    %c0_0 = arith.constant 0 : index
    %c0_1 = arith.constant 0 : index
    %c0_2 = arith.constant 0 : index
    %0 = vector.load %arg1[%c0, %c0_0, %c0_1, %c0_2] : memref<1x18x18x4xf32, #tpu.memory_space<vmem>>, vector<1x18x18x4xf32>
    %1 = vector.shape_cast %0 : vector<1x18x18x4xf32> to vector<18x18x4xf32>
    %2 = vector.extract_strided_slice %1 {offsets = [0, 0, 0], sizes = [16, 16, 4], strides = [1, 1, 1]} : vector<18x18x4xf32> to vector<16x16x4xf32>
    %3 = vector.shape_cast %2 : vector<16x16x4xf32> to vector<256x4xf32>
    %4 = vector.extract_strided_slice %1 {offsets = [0, 1, 0], sizes = [16, 16, 4], strides = [1, 1, 1]} : vector<18x18x4xf32> to vector<16x16x4xf32>
    %5 = vector.shape_cast %4 : vector<16x16x4xf32> to vector<256x4xf32>
    %6 = vector.extract_strided_slice %1 {offsets = [0, 2, 0], sizes = [16, 16, 4], strides = [1, 1, 1]} : vector<18x18x4xf32> to vector<16x16x4xf32>
    %7 = vector.shape_cast %6 : vector<16x16x4xf32> to vector<256x4xf32>
    %8 = vector.extract_strided_slice %1 {offsets = [1, 0, 0], sizes = [16, 16, 4], strides = [1, 1, 1]} : vector<18x18x4xf32> to vector<16x16x4xf32>
    %9 = vector.shape_cast %8 : vector<16x16x4xf32> to vector<256x4xf32>
    %10 = vector.extract_strided_slice %1 {offsets = [1, 1, 0], sizes = [16, 16, 4], strides = [1, 1, 1]} : vector<18x18x4xf32> to vector<16x16x4xf32>
    %11 = vector.shape_cast %10 : vector<16x16x4xf32> to vector<256x4xf32>
    %12 = vector.extract_strided_slice %1 {offsets = [1, 2, 0], sizes = [16, 16, 4], strides = [1, 1, 1]} : vector<18x18x4xf32> to vector<16x16x4xf32>
    %13 = vector.shape_cast %12 : vector<16x16x4xf32> to vector<256x4xf32>
    %14 = vector.extract_strided_slice %1 {offsets = [2, 0, 0], sizes = [16, 16, 4], strides = [1, 1, 1]} : vector<18x18x4xf32> to vector<16x16x4xf32>
    %15 = vector.shape_cast %14 : vector<16x16x4xf32> to vector<256x4xf32>
    %16 = vector.extract_strided_slice %1 {offsets = [2, 1, 0], sizes = [16, 16, 4], strides = [1, 1, 1]} : vector<18x18x4xf32> to vector<16x16x4xf32>
    %17 = vector.shape_cast %16 : vector<16x16x4xf32> to vector<256x4xf32>
    %18 = vector.extract_strided_slice %1 {offsets = [2, 2, 0], sizes = [16, 16, 4], strides = [1, 1, 1]} : vector<18x18x4xf32> to vector<16x16x4xf32>
    %19 = vector.shape_cast %18 : vector<16x16x4xf32> to vector<256x4xf32>
    %20 = tpu.concatenate %3, %5, %7, %9, %11, %13, %15, %17, %19 in 1 : vector<256x4xf32>, vector<256x4xf32>, vector<256x4xf32>, vector<256x4xf32>, vector<256x4xf32>, vector<256x4xf32>, vector<256x4xf32>, vector<256x4xf32>, vector<256x4xf32> -> vector<256x36xf32>
    %c0_3 = arith.constant 0 : index
    %c0_4 = arith.constant 0 : index
    %21 = vector.load %arg2[%c0_3, %c0_4] : memref<36x16xf32, #tpu.memory_space<vmem>>, vector<36x16xf32>
    %cst = arith.constant dense<0.000000e+00> : vector<256x16xf32>
    %22 = tpu.matmul %20, %21, %cst {dimension_numbers = #tpu.dot_dimension_numbers<[1], [0], [0], [1], [0, 0, 1, 1], [], []>} : vector<256x36xf32>, vector<36x16xf32>, vector<256x16xf32> -> vector<256x16xf32>
    %23 = vector.extract_strided_slice %22 {offsets = [0, 0], sizes = [256, 8], strides = [1, 1]} : vector<256x16xf32> to vector<256x8xf32>
    %c0_5 = arith.constant 0 : index
    %c0_6 = arith.constant 0 : index
    %24 = vector.load %arg4[%c0_5, %c0_6] : memref<1x8xf32, #tpu.memory_space<vmem>>, vector<1x8xf32>
    %25 = vector.broadcast %24 : vector<1x8xf32> to vector<256x8xf32>
    %26 = arith.addf %23, %25 : vector<256x8xf32>
    %cst_7 = arith.constant 0.000000e+00 : f32
    %27 = vector.broadcast %cst_7 : f32 to vector<256x8xf32>
    %28 = arith.maximumf %26, %27 : vector<256x8xf32>
    %29 = vector.extract_strided_slice %22 {offsets = [0, 8], sizes = [256, 8], strides = [1, 1]} : vector<256x16xf32> to vector<256x8xf32>
    %c0_8 = arith.constant 0 : index
    %c0_9 = arith.constant 0 : index
    %30 = vector.load %arg6[%c0_8, %c0_9] : memref<1x8xf32, #tpu.memory_space<vmem>>, vector<1x8xf32>
    %31 = vector.broadcast %30 : vector<1x8xf32> to vector<256x8xf32>
    %32 = arith.addf %29, %31 : vector<256x8xf32>
    %cst_10 = arith.constant 0.000000e+00 : f32
    %33 = vector.broadcast %cst_10 : f32 to vector<18x18x8xf32>
    %c0_11 = arith.constant 0 : index
    %c0_12 = arith.constant 0 : index
    %c0_13 = arith.constant 0 : index
    %34 = vector.load %arg8[%c0_11, %c0_12, %c0_13] : memref<18x18x8xf32, #tpu.memory_space<vmem>>, vector<18x18x8xf32>
    tpu.vector_store %arg8[%c0_11, %c0_12, %c0_13], %33 {strides = array<i32>} : memref<18x18x8xf32, #tpu.memory_space<vmem>>, vector<18x18x8xf32>,
    %35 = vector.shape_cast %28 : vector<256x8xf32> to vector<16x16x8xf32>
    %c1 = arith.constant 1 : index
    %c1_14 = arith.constant 1 : index
    %c0_15 = arith.constant 0 : index
    %36 = vector.load %arg8[%c1, %c1_14, %c0_15] : memref<18x18x8xf32, #tpu.memory_space<vmem>>, vector<16x16x8xf32>
    tpu.vector_store %arg8[%c1, %c1_14, %c0_15], %35 {strides = array<i32>} : memref<18x18x8xf32, #tpu.memory_space<vmem>>, vector<16x16x8xf32>,
    %c0_16 = arith.constant 0 : index
    %c0_17 = arith.constant 0 : index
    %c0_18 = arith.constant 0 : index
    %37 = vector.load %arg8[%c0_16, %c0_17, %c0_18] : memref<18x18x8xf32, #tpu.memory_space<vmem>>, vector<16x16x8xf32>
    %38 = vector.shape_cast %37 : vector<16x16x8xf32> to vector<256x8xf32>
    %c0_19 = arith.constant 0 : index
    %c1_20 = arith.constant 1 : index
    %c0_21 = arith.constant 0 : index
    %39 = vector.load %arg8[%c0_19, %c1_20, %c0_21] : memref<18x18x8xf32, #tpu.memory_space<vmem>>, vector<16x16x8xf32>
    %40 = vector.shape_cast %39 : vector<16x16x8xf32> to vector<256x8xf32>
    %c0_22 = arith.constant 0 : index
    %c2 = arith.constant 2 : index
    %c0_23 = arith.constant 0 : index
    %41 = vector.load %arg8[%c0_22, %c2, %c0_23] : memref<18x18x8xf32, #tpu.memory_space<vmem>>, vector<16x16x8xf32>
    %42 = vector.shape_cast %41 : vector<16x16x8xf32> to vector<256x8xf32>
    %c1_24 = arith.constant 1 : index
    %c0_25 = arith.constant 0 : index
    %c0_26 = arith.constant 0 : index
    %43 = vector.load %arg8[%c1_24, %c0_25, %c0_26] : memref<18x18x8xf32, #tpu.memory_space<vmem>>, vector<16x16x8xf32>
    %44 = vector.shape_cast %43 : vector<16x16x8xf32> to vector<256x8xf32>
    %c1_27 = arith.constant 1 : index
    %c1_28 = arith.constant 1 : index
    %c0_29 = arith.constant 0 : index
    %45 = vector.load %arg8[%c1_27, %c1_28, %c0_29] : memref<18x18x8xf32, #tpu.memory_space<vmem>>, vector<16x16x8xf32>
    %46 = vector.shape_cast %45 : vector<16x16x8xf32> to vector<256x8xf32>
    %c1_30 = arith.constant 1 : index
    %c2_31 = arith.constant 2 : index
    %c0_32 = arith.constant 0 : index
    %47 = vector.load %arg8[%c1_30, %c2_31, %c0_32] : memref<18x18x8xf32, #tpu.memory_space<vmem>>, vector<16x16x8xf32>
    %48 = vector.shape_cast %47 : vector<16x16x8xf32> to vector<256x8xf32>
    %c2_33 = arith.constant 2 : index
    %c0_34 = arith.constant 0 : index
    %c0_35 = arith.constant 0 : index
    %49 = vector.load %arg8[%c2_33, %c0_34, %c0_35] : memref<18x18x8xf32, #tpu.memory_space<vmem>>, vector<16x16x8xf32>
    %50 = vector.shape_cast %49 : vector<16x16x8xf32> to vector<256x8xf32>
    %c2_36 = arith.constant 2 : index
    %c1_37 = arith.constant 1 : index
    %c0_38 = arith.constant 0 : index
    %51 = vector.load %arg8[%c2_36, %c1_37, %c0_38] : memref<18x18x8xf32, #tpu.memory_space<vmem>>, vector<16x16x8xf32>
    %52 = vector.shape_cast %51 : vector<16x16x8xf32> to vector<256x8xf32>
    %c2_39 = arith.constant 2 : index
    %c2_40 = arith.constant 2 : index
    %c0_41 = arith.constant 0 : index
    %53 = vector.load %arg8[%c2_39, %c2_40, %c0_41] : memref<18x18x8xf32, #tpu.memory_space<vmem>>, vector<16x16x8xf32>
    %54 = vector.shape_cast %53 : vector<16x16x8xf32> to vector<256x8xf32>
    %55 = tpu.concatenate %38, %40, %42, %44, %46, %48, %50, %52, %54 in 1 : vector<256x8xf32>, vector<256x8xf32>, vector<256x8xf32>, vector<256x8xf32>, vector<256x8xf32>, vector<256x8xf32>, vector<256x8xf32>, vector<256x8xf32>, vector<256x8xf32> -> vector<256x72xf32>
    %c0_42 = arith.constant 0 : index
    %c0_43 = arith.constant 0 : index
    %56 = vector.load %arg3[%c0_42, %c0_43] : memref<72x8xf32, #tpu.memory_space<vmem>>, vector<72x8xf32>
    %cst_44 = arith.constant dense<0.000000e+00> : vector<256x8xf32>
    %57 = tpu.matmul %55, %56, %cst_44 {dimension_numbers = #tpu.dot_dimension_numbers<[1], [0], [0], [1], [0, 0, 1, 1], [], []>} : vector<256x72xf32>, vector<72x8xf32>, vector<256x8xf32> -> vector<256x8xf32>
    %c0_45 = arith.constant 0 : index
    %c0_46 = arith.constant 0 : index
    %58 = vector.load %arg5[%c0_45, %c0_46] : memref<1x8xf32, #tpu.memory_space<vmem>>, vector<1x8xf32>
    %59 = vector.broadcast %58 : vector<1x8xf32> to vector<256x8xf32>
    %60 = arith.addf %57, %59 : vector<256x8xf32>
    %cst_47 = arith.constant 0.000000e+00 : f32
    %61 = vector.broadcast %cst_47 : f32 to vector<256x8xf32>
    %62 = arith.maximumf %60, %61 : vector<256x8xf32>
    %63 = arith.addf %62, %32 : vector<256x8xf32>
    %cst_48 = arith.constant 0.000000e+00 : f32
    %64 = vector.broadcast %cst_48 : f32 to vector<256x8xf32>
    %65 = arith.maximumf %63, %64 : vector<256x8xf32>
    %66 = vector.shape_cast %65 : vector<256x8xf32> to vector<16x16x8xf32>
    %c0_49 = arith.constant 0 : index
    %c0_50 = arith.constant 0 : index
    %c0_51 = arith.constant 0 : index
    %c0_52 = arith.constant 0 : index
    %67 = vector.load %arg7[%c0_49, %c0_50, %c0_51, %c0_52] : memref<1x16x16x8xf32, #tpu.memory_space<vmem>>, vector<1x16x16x8xf32>
    %68 = vector.shape_cast %67 : vector<1x16x16x8xf32> to vector<16x16x8xf32>
    %69 = vector.shape_cast %66 : vector<16x16x8xf32> to vector<1x16x16x8xf32>
    tpu.vector_store %arg7[%c0_49, %c0_50, %c0_51, %c0_52], %69 {strides = array<i32>} : memref<1x16x16x8xf32, #tpu.memory_space<vmem>>, vector<1x16x16x8xf32>,
    return
  }
  func.func @transform_0(%arg0: i32) -> (i32, i32, i32, i32) {
    %c0_i32 = arith.constant 0 : i32
    %c0_i32_0 = arith.constant 0 : i32
    %c0_i32_1 = arith.constant 0 : i32
    %c0_i32_2 = arith.constant 0 : i32
    return %arg0, %c0_i32, %c0_i32_0, %c0_i32_1 : i32, i32, i32, i32
  }
  func.func @transform_1(%arg0: i32) -> (i32, i32) {
    %c0_i32 = arith.constant 0 : i32
    %c0_i32_0 = arith.constant 0 : i32
    %c0_i32_1 = arith.constant 0 : i32
    return %c0_i32, %c0_i32_0 : i32, i32
  }
  func.func @transform_2(%arg0: i32) -> (i32, i32) {
    %c0_i32 = arith.constant 0 : i32
    %c0_i32_0 = arith.constant 0 : i32
    %c0_i32_1 = arith.constant 0 : i32
    return %c0_i32, %c0_i32_0 : i32, i32
  }
  func.func @transform_3(%arg0: i32) -> (i32, i32) {
    %c0_i32 = arith.constant 0 : i32
    %c0_i32_0 = arith.constant 0 : i32
    %c0_i32_1 = arith.constant 0 : i32
    return %c0_i32, %c0_i32_0 : i32, i32
  }
  func.func @transform_4(%arg0: i32) -> (i32, i32) {
    %c0_i32 = arith.constant 0 : i32
    %c0_i32_0 = arith.constant 0 : i32
    %c0_i32_1 = arith.constant 0 : i32
    return %c0_i32, %c0_i32_0 : i32, i32
  }
  func.func @transform_5(%arg0: i32) -> (i32, i32) {
    %c0_i32 = arith.constant 0 : i32
    %c0_i32_0 = arith.constant 0 : i32
    %c0_i32_1 = arith.constant 0 : i32
    return %c0_i32, %c0_i32_0 : i32, i32
  }
  func.func @transform_6(%arg0: i32) -> (i32, i32, i32, i32) {
    %c0_i32 = arith.constant 0 : i32
    %c0_i32_0 = arith.constant 0 : i32
    %c0_i32_1 = arith.constant 0 : i32
    %c0_i32_2 = arith.constant 0 : i32
    return %arg0, %c0_i32, %c0_i32_0, %c0_i32_1 : i32, i32, i32, i32
  }
}

</mosaic_0001>

<bundles_post_ra>
// kernel: tpu_custom_call.1
= control target key start
LH: loop header
LB: loop body
LE: loop exit
PB: predicated region body
PF: predicated region fallthrough
CT: control target
= control target key end

     0   :  { %s4772_s21 = smov 0   ;;  %s8416_s0 = inlined_call_operand.vmem [shape: f32[2,18,18,4], index: 0, kind: input, shape index: {}]   ;;  %s8417_s1 = inlined_call_operand.vmem [shape: f32[36,16], index: 1, kind: input, shape index: {}]   ;;  %s8418_s2 = inlined_call_operand.vmem [shape: f32[72,8], index: 2, kind: input, shape index: {}]   ;;  %s8419_s3 = inlined_call_operand.vmem [shape: f32[1,8], index: 3, kind: input, shape index: {}]   ;;  %s8420_s4 = inlined_call_operand.vmem [shape: f32[1,8], index: 4, kind: input, shape index: {}]   ;;  %s8421_s5 = inlined_call_operand.vmem [shape: f32[1,8], index: 5, kind: input, shape index: {}]   ;;  %s8422_s6 = inlined_call_operand.vmem [shape: f32[2,16,16,8], index: 6, kind: output, shape index: {}]  }
   0x1 LB: > { %s4327_s22 = sadd.s32 4294967295, %s4721_s21   ;;  %p4331_p0 = scmp.ge.s32.totalorder %s4721_s21, 1  ;;  %s4721_s21 = sphi %s4772_s21, %s16_s21  }
   0x2   : > { %p212_p1 = scmp.lt.s32.totalorder %s4721_s21, 3 }
   0x4   : > { %p213_p2 = pnand %p4331_p0, %p212_p1 }
   0x6   : > { %216 = sbr.rel (%p213_p2) target bundleno = 1660 (0x67c), region = 44 }
   0xd   : > { %p242_p3 = scmp.lt.s32.totalorder %s4327_s22, 1  ;;  %vm354_vm0 = vcmask 1046528   ;;  %s4723_s27 = smov 4   ;;  %vm435_vm1 = vcmask 1045504   ;;  %vm1676_vm2 = vcmask 1043456   ;;  %vm1310_vm3 = vcmask 31744  }
   0xe   : > { %s4724_s28 = smov 8   ;;  %s4725_s29 = smov 12   ;;  %vm1343_vm4 = vcmask 64512   ;;  %vm1376_vm5 = vcmask 97280   ;;  %vm1409_vm6 = vcmask 130048   ;;  %vm1442_vm7 = vcmask 162816  }
   0xf   : > { %s9230_s22 = smov (!%p242_p3, %s4327_s22), 1  ;;  %s4726_s30 = smov 16   ;;  %vm1475_vm8 = vcmask 195584   ;;  %vm1508_vm9 = vcmask 228352   ;;  %vm1541_vm10 = vcmask 261120   ;;  %vm1579_vm11 = vcmask 293888  }
  0x10   : > { %s4642_s23 = smul.u32 432, %s9230_s22  ;;  %s4727_s7 = smov 20   ;;  %vm2019_vm12 = vcmask 58368   ;;  %vm3546_vm13 = vcmask 326656   ;;  %vm3579_vm14 = vcmask 392192   ;;  %vm3612_vm15 = vcmask 457728  }
  0x11   : > { %s4728_s8 = smov 24   ;;  %s4729_s9 = smov 28  }
  0x12   : > { %s4786_s26 = scalar_lea.vmem %s8416_s0, %s4642_s23  ;;  %s4730_s20 = smov 32  }
  0x13   : > { %v4789_v0 = vld [vmem:[%s4786_s26 + $0x18] sm:$0xff]  ;;  %v4792_v1 = vld [vmem:[%s4786_s26 + $0x20] sm:$0xff]  ;;  %v4800_v5 = vld [vmem:[%s4786_s26 + $0x8] sm:$0xff]  ;;  %s4732_s19 = smov 40   ;;  %s4733_s25 = smov 48  }
  0x14   : > { %v4795_v2 = vld [vmem:[%s4786_s26] sm:$0xff]  ;;  %v360_v3 = vrot.slane %v4789_v0, 1  ;;  %v361_v4 = vrot.slane %v4792_v1, 1  ;;  %v4804_v7 = vld [vmem:[%s4786_s26 + $0x28] sm:$0x3]  ;;  %v356_v8 = vrot.slane %v4800_v5, 1 }
  0x15   : > { %v355_v6 = vrot.slane %v4795_v2, 1  ;;  %v363_v9 = vrot.slane %v4804_v7, 1  ;;  %v4809_v10 = vld [vmem:[%s4786_s26 + $0x10] sm:$0x3]  ;;  %v4812_v11 = vld [vmem:[%s4786_s26 + $0x38] sm:$0xff]  ;;  %v4842_v24 = vld [vmem:[%s4786_s26 + $0x48] sm:$0xff] }
  0x16   : > { %v4815_v12 = vsel %vm354_vm0, %v360_v3, %v361_v4  ;;  %v358_v13 = vrot.slane %v4809_v10, 1  ;;  %v4819_v14 = vld [vmem:[%s4786_s26 + $0x40] sm:$0x3]  ;;  %v4822_v15 = vld [vmem:[%s4786_s26 + $0x30] sm:$0xff]  ;;  %v366_v18 = vrot.slane %v4812_v11, 1  ;;  %v370_v29 = vrot.slane %v4842_v24, 1 }
  0x17   : > { %546 = vrot.lane.b32.xlu1 %v4815_v12, %s4723_s27  ;;  %v357_v16 = vsel %vm354_vm0, %v355_v6, %v356_v8  ;;  %v4829_v17 = vsel %vm354_vm0, %v361_v4, %v363_v9  ;;  %v368_v19 = vrot.slane %v4819_v14, 1  ;;  %v365_v21 = vrot.slane %v4822_v15, 1  ;;  %v4836_v22 = vld [vmem:[%s4786_s26 + $0x50] sm:$0xff]  ;;  %v4839_v23 = vld [vmem:[%s4786_s26 + $0x58] sm:$0x3]  ;;  %v4857_v30 = vld [vmem:[%s4786_s26 + $0x68] sm:$0xff] }
  0x18   : > { %542 = vrot.lane.b32.xlu0 %v357_v16, %s4723_s27  ;;  %v359_v20 = vsel %vm354_vm0, %v356_v8, %v358_v13  ;;  %v371_v26 = vrot.slane %v4836_v22, 1  ;;  %v373_v27 = vrot.slane %v4839_v23, 1  ;;  %v4860_v31 = vld [vmem:[%s4786_s26 + $0x70] sm:$0x3]  ;;  %v4863_v32 = vld [vmem:[%s4786_s26 + $0x60] sm:$0xff]  ;;  %v376_v34 = vrot.slane %v4857_v30, 1 }
  0x19   : > { %v4848_v25 = vsel %vm354_vm0, %v366_v18, %v368_v19  ;;  %v4853_v28 = vsel %vm354_vm0, %v365_v21, %v366_v18  ;;  %v378_v35 = vrot.slane %v4860_v31, 1  ;;  %v375_v37 = vrot.slane %v4863_v32, 1  ;;  %v4879_v38 = vld [vmem:[%s4786_s26 + $0x80] sm:$0xff]  ;;  %v4882_v39 = vld [vmem:[%s4786_s26 + $0x88] sm:$0x3]  ;;  %v4885_v40 = vld [vmem:[%s4786_s26 + $0x78] sm:$0xff] }
  0x1a   : > { %v4870_v33 = vsel %vm354_vm0, %v371_v26, %v373_v27  ;;  %v4875_v36 = vsel %vm354_vm0, %v370_v29, %v371_v26  ;;  %v381_v42 = vrot.slane %v4879_v38, 1  ;;  %v383_v43 = vrot.slane %v4882_v39, 1  ;;  %v4901_v46 = vld [vmem:[%s4786_s26 + $0x98] sm:$0xff]  ;;  %v4904_v47 = vld [vmem:[%s4786_s26 + $0xa0] sm:$0x3]  ;;  %v4907_v48 = vld [vmem:[%s4786_s26 + $0x90] sm:$0xff] }
  0x1b   : > { %548 = vrot.lane.b32.xlu1 %v4829_v17, %s4723_s27  ;;  %8537 = vst [vmem:[#allocation3_spill] sm:$0xff] %v4875_v36  ;;  %v4892_v41 = vsel %vm354_vm0, %v376_v34, %v378_v35  ;;  %v4897_v44 = vsel %vm354_vm0, %v375_v37, %v376_v34  ;;  %v380_v45 = vrot.slane %v4885_v40, 1  ;;  %v386_v50 = vrot.slane %v4901_v46, 1  ;;  %v4923_v54 = vld [vmem:[%s4786_s26 + $0xb0] sm:$0xff]  ;;  %v4926_v55 = vld [vmem:[%s4786_s26 + $0xb8] sm:$0x3] }
  0x1c   : > { %544 = vrot.lane.b32.xlu0 %v359_v20, %s4723_s27  ;;  %8538 = vst [vmem:[#allocation4_spill] sm:$0xff] %v4892_v41  ;;  %8539 = vst [vmem:[#allocation5_spill] sm:$0xff] %v4897_v44  ;;  %v4914_v49 = vsel %vm354_vm0, %v381_v42, %v383_v43  ;;  %v388_v51 = vrot.slane %v4904_v47, 1  ;;  %v385_v53 = vrot.slane %v4907_v48, 1  ;;  %v4929_v56 = vld [vmem:[%s4786_s26 + $0xa8] sm:$0xff]  ;;  %v391_v58 = vrot.slane %v4923_v54, 1 }
  0x1d   : > { %8540 = vst [vmem:[#allocation6_spill] sm:$0xff] %v4914_v49  ;;  %v4919_v52 = vsel %vm354_vm0, %v380_v45, %v381_v42  ;;  %v393_v59 = vrot.slane %v4926_v55, 1  ;;  %v390_v61 = vrot.slane %v4929_v56, 1  ;;  %v4945_v62 = vld [vmem:[%s4786_s26 + $0xc8] sm:$0xff]  ;;  %v4948_v63 = vld [vmem:[%s4786_s26 + $0xd0] sm:$0x3] }
  0x1e   : > { %8541 = vst [vmem:[#allocation7_spill] sm:$0xff] %v4919_v52  ;;  %v4936_v57 = vsel %vm354_vm0, %v386_v50, %v388_v51  ;;  %v4941_v60 = vsel %vm354_vm0, %v385_v53, %v386_v50  ;;  %v4951_v3 = vld [vmem:[%s4786_s26 + $0xc0] sm:$0xff]  ;;  %v396_v6 = vrot.slane %v4945_v62, 1  ;;  %v398_v8 = vrot.slane %v4948_v63, 1  ;;  %v4970_v18 = vld [vmem:[%s4786_s26 + $0xe8] sm:$0x3] }
  0x1f   : > { %552 = vrot.lane.b32.xlu1 %v4848_v25, %s4723_s27  ;;  %8542 = vst [vmem:[#allocation8_spill] sm:$0xff] %v4936_v57  ;;  %8543 = vst [vmem:[#allocation9_spill] sm:$0xff] %v4941_v60  ;;  %v4958_v4 = vsel %vm354_vm0, %v391_v58, %v393_v59  ;;  %v4963_v9 = vsel %vm354_vm0, %v390_v61, %v391_v58  ;;  %v395_v13 = vrot.slane %v4951_v3, 1  ;;  %v4967_v16 = vld [vmem:[%s4786_s26 + $0xe0] sm:$0xff]  ;;  %v4973_v19 = vld [vmem:[%s4786_s26 + $0xd8] sm:$0xff]  ;;  %v403_v26 = vrot.slane %v4970_v18, 1 }
  0x20   : > { %550 = vrot.lane.b32.xlu0 %v4853_v28, %s4723_s27  ;;  %8544 = vst [vmem:[#allocation10_spill] sm:$0xff] %v4958_v4  ;;  %8545 = vst [vmem:[#allocation11_spill] sm:$0xff] %v4963_v9  ;;  %v4980_v20 = vsel %vm354_vm0, %v396_v6, %v398_v8  ;;  %v401_v21 = vrot.slane %v4967_v16, 1  ;;  %v400_v29 = vrot.slane %v4973_v19, 1  ;;  %v4989_v34 = vld [vmem:[%s4786_s26 + $0xf8] sm:$0xff]  ;;  %v4995_v37 = vld [vmem:[%s4786_s26 + $0xf0] sm:$0xff] }
  0x21   : > { %8546 = vst [vmem:[#allocation12_spill] sm:$0xff] %v4980_v20  ;;  %v4985_v27 = vsel %vm354_vm0, %v395_v13, %v396_v6  ;;  %v4992_v35 = vld [vmem:[%s4786_s26 + $0x100] sm:$0x3]  ;;  %v406_v43 = vrot.slane %v4989_v34, 1  ;;  %v405_v51 = vrot.slane %v4995_v37, 1  ;;  %v5011_v53 = vld [vmem:[%s4786_s26 + $0x110] sm:$0xff] }
  0x22   : > { %8547 = vst [vmem:[#allocation13_spill] sm:$0xff] %v4985_v27  ;;  %v5002_v42 = vsel %vm354_vm0, %v401_v21, %v403_v26  ;;  %v408_v45 = vrot.slane %v4992_v35, 1  ;;  %v5007_v50 = vsel %vm354_vm0, %v400_v29, %v401_v21  ;;  %v5014_v58 = vld [vmem:[%s4786_s26 + $0x118] sm:$0x3]  ;;  %v5017_v59 = vld [vmem:[%s4786_s26 + $0x108] sm:$0xff]  ;;  %v411_v6 = vrot.slane %v5011_v53, 1 }
  0x23   : > { %556 = vrot.lane.b32.xlu1 %v4870_v33, %s4723_s27  ;;  %8548 = vst [vmem:[#allocation14_spill] sm:$0xff] %v5002_v42  ;;  %8549 = vst [vmem:[#allocation15_spill] sm:$0xff] %v5007_v50  ;;  %v413_v8 = vrot.slane %v5014_v58, 1  ;;  %v5029_v13 = vsel %vm354_vm0, %v405_v51, %v406_v43  ;;  %v410_v21 = vrot.slane %v5017_v59, 1  ;;  %v5033_v26 = vld [vmem:[%s4786_s26 + $0x128] sm:$0xff] }
  0x24   : > { %554 = vrot.lane.b32.xlu0 %v4875_v36, %s4723_s27  ;;  %v5024_v61 = vsel %vm354_vm0, %v406_v43, %v408_v45  ;;  %8551 = vst [vmem:[#allocation17_spill] sm:$0xff] %v5029_v13  ;;  %v5036_v29 = vld [vmem:[%s4786_s26 + $0x130] sm:$0x3]  ;;  %v416_v43 = vrot.slane %v5033_v26, 1 }
  0x25   : > { %8550 = vst [vmem:[#allocation16_spill] sm:$0xff] %v5024_v61  ;;  %v5046_v45 = vsel %vm354_vm0, %v411_v6, %v413_v8  ;;  %v418_v51 = vrot.slane %v5036_v29, 1 }
  0x26   : > { %8552 = vst [vmem:[#allocation18_spill] sm:$0xff] %v5046_v45 }
  0x27   : > { %560 = vrot.lane.b32.xlu1 %v4892_v41, %s4723_s27  ;;  %v5068_v8 = vsel %vm354_vm0, %v416_v43, %v418_v51 }
  0x28   : > { %558 = vrot.lane.b32.xlu0 %v4897_v44, %s4723_s27  ;;  %8554 = vst [vmem:[#allocation20_spill] sm:$0xff] %v5068_v8  ;;  %v5102_v44 = vld [vmem:[%s4786_s26 + $0x178] sm:$0x3] }
  0x2b   : > { %564 = vrot.lane.b32.xlu1 %v4914_v49, %s4723_s27  ;;  %v5099_v49 = vld [vmem:[%s4786_s26 + $0x170] sm:$0xff] }
  0x2c   : > { %562 = vrot.lane.b32.xlu0 %v4919_v52, %s4723_s27 }
  0x2f   : > { %568 = vrot.lane.b32.xlu1 %v4936_v57, %s4723_s27 }
  0x30   : > { %566 = vrot.lane.b32.xlu0 %v4941_v60, %s4723_s27  ;;  %v5077_v60 = vld [vmem:[%s4786_s26 + $0x158] sm:$0xff] }
  0x33   : > { %572 = vrot.lane.b32.xlu1 %v4958_v4, %s4723_s27 }
  0x34   : > { %570 = vrot.lane.b32.xlu0 %v4963_v9, %s4723_s27 }
  0x37   : > { %576 = vrot.lane.b32.xlu1 %v4980_v20, %s4723_s27  ;;  %v5055_v20 = vld [vmem:[%s4786_s26 + $0x140] sm:$0xff] }
  0x38   : > { %574 = vrot.lane.b32.xlu0 %v4985_v27, %s4723_s27 }
  0x3b   : > { %580 = vrot.lane.b32.xlu1 %v5002_v42, %s4723_s27  ;;  %v5051_v42 = vsel %vm354_vm0, %v410_v21, %v411_v6  ;;  %v421_v6 = vrot.slane %v5055_v20, 1 }
  0x3c   : > { %578 = vrot.lane.b32.xlu0 %v5007_v50, %s4723_s27  ;;  %v5039_v50 = vld [vmem:[%s4786_s26 + $0x120] sm:$0xff]  ;;  %8553 = vst [vmem:[#allocation19_spill] sm:$0xff] %v5051_v42 }
  0x3d   : > { %v415_v27 = vrot.slane %v5039_v50, 1 }
  0x3f   : > { %584 = vrot.lane.b32.xlu1 %v5024_v61, %s4723_s27  ;;  %v5058_v61 = vld [vmem:[%s4786_s26 + $0x148] sm:$0x3]  ;;  %v5073_v9 = vsel %vm354_vm0, %v415_v27, %v416_v43  ;;  %v426_v27 = vrot.slane %v5077_v60, 1 }
  0x40   : > { %582 = vrot.lane.b32.xlu0 %v5029_v13, %s4723_s27  ;;  %v5061_v13 = vld [vmem:[%s4786_s26 + $0x138] sm:$0xff]  ;;  %v423_v21 = vrot.slane %v5058_v61, 1  ;;  %8555 = vst [vmem:[#allocation21_spill] sm:$0xff] %v5073_v9 }
  0x41   : > { %v420_v4 = vrot.slane %v5061_v13, 1 }
  0x42   : > { %v5090_v51 = vsel %vm354_vm0, %v421_v6, %v423_v21 }
  0x43   : > { %588 = vrot.lane.b32.xlu1 %v5046_v45, %s4723_s27  ;;  %v5080_v45 = vld [vmem:[%s4786_s26 + $0x160] sm:$0x3]  ;;  %8556 = vst [vmem:[#allocation22_spill] sm:$0xff] %v5090_v51  ;;  %v5095_v57 = vsel %vm354_vm0, %v420_v4, %v421_v6  ;;  %v431_v4 = vrot.slane %v5099_v49, 1  ;;  %v433_v6 = vrot.slane %v5102_v44, 1 }
  0x44   : > { %586 = vrot.lane.b32.xlu0 %v5051_v42, %s4723_s27  ;;  %v5083_v42 = vld [vmem:[%s4786_s26 + $0x150] sm:$0xff]  ;;  %v428_v43 = vrot.slane %v5080_v45, 1  ;;  %8557 = vst [vmem:[#allocation23_spill] sm:$0xff] %v5095_v57 }
  0x45   : > { %v425_v52 = vrot.slane %v5083_v42, 1 }
  0x46   : > { %v5112_v21 = vsel %vm354_vm0, %v426_v27, %v428_v43  ;;  %v437_v43 = vrot.slane %v4800_v5, 2  ;;  %v444_v5 = vrot.slane %v4804_v7, 2  ;;  %v446_v7 = vrot.slane %v4822_v15, 2 }
  0x47   : > { %592 = vrot.lane.b32.xlu1 %v5068_v8, %s4723_s27  ;;  %v5105_v8 = vld [vmem:[%s4786_s26 + $0x168] sm:$0xff]  ;;  %8558 = vst [vmem:[#allocation24_spill] sm:$0xff] %v5112_v21 }
  0x48   : > { %590 = vrot.lane.b32.xlu0 %v5073_v9, %s4723_s27  ;;  %v5117_v9 = vsel %vm354_vm0, %v425_v52, %v426_v27  ;;  %v430_v41 = vrot.slane %v5105_v8, 1  ;;  %v436_v52 = vrot.slane %v4795_v2, 2 }
  0x49   : > { %8559 = vst [vmem:[#allocation25_spill] sm:$0xff] %v5117_v9 }
  0x4a   : > { %v5130_v36 = vsel %vm354_vm0, %v430_v41, %v431_v4  ;;  %v441_v41 = vrot.slane %v4789_v0, 2 }
  0x4b   : > { %596 = vrot.lane.b32.xlu1 %v5090_v51, %s4723_s27  ;;  %v439_v51 = vrot.slane %v4809_v10, 2  ;;  %8560 = vst [vmem:[#allocation26_spill] sm:$0xff] %v5130_v36  ;;  %v438_v10 = vsel %vm435_vm1, %v436_v52, %v437_v43  ;;  %v452_v52 = vrot.slane %v4836_v22, 2 }
  0x4c   : > { %594 = vrot.lane.b32.xlu0 %v5095_v57, %s4723_s27  ;;  %v5125_v57 = vsel %vm354_vm0, %v431_v4, %v433_v6  ;;  %v442_v6 = vrot.slane %v4792_v1, 2  ;;  %v447_v4 = vrot.slane %v4812_v11, 2 }
  0x4d   : > { %v440_v27 = vsel %vm435_vm1, %v437_v43, %v439_v51  ;;  %v449_v51 = vrot.slane %v4819_v14, 2 }
  0x4e   : > { %v5145_v2 = vsel %vm435_vm1, %v442_v6, %v444_v5  ;;  %v5163_v14 = vsel %vm435_vm1, %v446_v7, %v447_v4  ;;  %v462_v7 = vrot.slane %v4879_v38, 2 }
  0x4f   : > { %600 = vrot.lane.b32.xlu1 %v5112_v21, %s4723_s27  ;;  %v5158_v43 = vsel %vm435_vm1, %v447_v4, %v449_v51  ;;  %v456_v4 = vrot.slane %v4863_v32, 2 }
  0x50   : > { %598 = vrot.lane.b32.xlu0 %v5117_v9, %s4723_s27 }
  0x53   : > { %604 = vrot.lane.b32.xlu1 %v5125_v57, %s4723_s27 }
  0x54   : > { %602 = vrot.lane.b32.xlu0 %v5130_v36, %s4723_s27  ;;  %v5150_v36 = vsel %vm435_vm1, %v441_v41, %v442_v6  ;;  %v451_v6 = vrot.slane %v4842_v24, 2  ;;  %v459_v41 = vrot.slane %v4860_v31, 2  ;;  %s4735_s27 = smov 64  }
  0x57   : > { %640 = vrot.lane.b32.xlu1 %v440_v27, %s4724_s28  ;;  %v454_v27 = vrot.slane %v4839_v23, 2  ;;  %v5176_v23 = vsel %vm435_vm1, %v451_v6, %v452_v52 }
  0x58   : > { %638 = vrot.lane.b32.xlu0 %v438_v10, %s4724_s28  ;;  %v457_v10 = vrot.slane %v4857_v30, 2  ;;  %8561 = vst [vmem:[#allocation27_spill] sm:$0xff] %v5176_v23 }
  0x59   : > { %v5171_v5 = vsel %vm435_vm1, %v452_v52, %v454_v27  ;;  %v464_v27 = vrot.slane %v4882_v39, 2  ;;  %v461_v52 = vrot.slane %v4885_v40, 2 }
  0x5a   : > { %v5184_v51 = vsel %vm435_vm1, %v457_v10, %v459_v41  ;;  %v5189_v31 = vsel %vm435_vm1, %v456_v4, %v457_v10  ;;  %v467_v41 = vrot.slane %v4901_v46, 2  ;;  %v466_v10 = vrot.slane %v4907_v48, 2 }
  0x5b   : > { %644 = vrot.lane.b32.xlu1 %v5145_v2, %s4724_s28  ;;  %8562 = vst [vmem:[#allocation28_spill] sm:$0xff] %v5189_v31  ;;  %v5197_v6 = vsel %vm435_vm1, %v462_v7, %v464_v27  ;;  %v5202_v39 = vsel %vm435_vm1, %v461_v52, %v462_v7  ;;  %v472_v27 = vrot.slane %v4923_v54, 2  ;;  %v471_v7 = vrot.slane %v4929_v56, 2 }
  0x5c   : > { %642 = vrot.lane.b32.xlu0 %v5150_v36, %s4724_s28  ;;  %8563 = vst [vmem:[#allocation29_spill] sm:$0xff] %v5202_v39 }
  0x5f   : > { %648 = vrot.lane.b32.xlu1 %v5158_v43, %s4724_s28 }
  0x60   : > { %646 = vrot.lane.b32.xlu0 %v5163_v14, %s4724_s28 }
  0x63   : > { %652 = vrot.lane.b32.xlu1 %v5171_v5, %s4724_s28 }
  0x64   : > { %650 = vrot.lane.b32.xlu0 %v5176_v23, %s4724_s28  ;;  %v469_v23 = vrot.slane %v4904_v47, 2  ;;  %v5215_v47 = vsel %vm435_vm1, %v466_v10, %v467_v41 }
  0x65   : > { %8564 = vst [vmem:[#allocation30_spill] sm:$0xff] %v5215_v47 }
  0x66   : > { %v5210_v4 = vsel %vm435_vm1, %v467_v41, %v469_v23  ;;  %v477_v23 = vrot.slane %v4945_v62, 2  ;;  %v476_v41 = vrot.slane %v4951_v3, 2 }
  0x67   : > { %656 = vrot.lane.b32.xlu1 %v5184_v51, %s4724_s28 }
  0x68   : > { %654 = vrot.lane.b32.xlu0 %v5189_v31, %s4724_s28  ;;  %v474_v31 = vrot.slane %v4926_v55, 2  ;;  %v5228_v55 = vsel %vm435_vm1, %v471_v7, %v472_v27 }
  0x69   : > { %8565 = vst [vmem:[#allocation31_spill] sm:$0xff] %v5228_v55 }
  0x6a   : > { %v5223_v52 = vsel %vm435_vm1, %v472_v27, %v474_v31  ;;  %v482_v31 = vrot.slane %v4967_v16, 2  ;;  %v481_v27 = vrot.slane %v4973_v19, 2 }
  0x6b   : > { %660 = vrot.lane.b32.xlu1 %v5197_v6, %s4724_s28 }
  0x6c   : > { %658 = vrot.lane.b32.xlu0 %v5202_v39, %s4724_s28  ;;  %v479_v39 = vrot.slane %v4948_v63, 2  ;;  %v5241_v63 = vsel %vm435_vm1, %v476_v41, %v477_v23 }
  0x6d   : > { %8566 = vst [vmem:[#allocation32_spill] sm:$0xff] %v5241_v63 }
  0x6e   : > { %v5236_v10 = vsel %vm435_vm1, %v477_v23, %v479_v39  ;;  %v487_v39 = vrot.slane %v4989_v34, 2  ;;  %v486_v23 = vrot.slane %v4995_v37, 2 }
  0x6f   : > { %664 = vrot.lane.b32.xlu1 %v5210_v4, %s4724_s28 }
  0x70   : > { %662 = vrot.lane.b32.xlu0 %v5215_v47, %s4724_s28  ;;  %v484_v47 = vrot.slane %v4970_v18, 2  ;;  %v5254_v18 = vsel %vm435_vm1, %v481_v27, %v482_v31 }
  0x71   : > { %8568 = vst [vmem:[#allocation34_spill] sm:$0xff] %v5254_v18 }
  0x72   : > { %v5249_v7 = vsel %vm435_vm1, %v482_v31, %v484_v47  ;;  %v492_v47 = vrot.slane %v5011_v53, 2  ;;  %v491_v31 = vrot.slane %v5017_v59, 2 }
  0x73   : > { %668 = vrot.lane.b32.xlu1 %v5223_v52, %s4724_s28  ;;  %8567 = vst [vmem:[#allocation33_spill] sm:$0xff] %v5249_v7 }
  0x74   : > { %666 = vrot.lane.b32.xlu0 %v5228_v55, %s4724_s28  ;;  %v489_v55 = vrot.slane %v4992_v35, 2  ;;  %v5267_v35 = vsel %vm435_vm1, %v486_v23, %v487_v39 }
  0x75   : > { %8569 = vst [vmem:[#allocation35_spill] sm:$0xff] %v5267_v35 }
  0x76   : > { %v5262_v41 = vsel %vm435_vm1, %v487_v39, %v489_v55  ;;  %v497_v55 = vrot.slane %v5033_v26, 2  ;;  %v496_v39 = vrot.slane %v5039_v50, 2 }
  0x77   : > { %672 = vrot.lane.b32.xlu1 %v5236_v10, %s4724_s28 }
  0x78   : > { %670 = vrot.lane.b32.xlu0 %v5241_v63, %s4724_s28  ;;  %v494_v63 = vrot.slane %v5014_v58, 2  ;;  %v5280_v58 = vsel %vm435_vm1, %v491_v31, %v492_v47 }
  0x79   : > { %8571 = vst [vmem:[#allocation37_spill] sm:$0xff] %v5280_v58 }
  0x7a   : > { %v5275_v27 = vsel %vm435_vm1, %v492_v47, %v494_v63  ;;  %v502_v63 = vrot.slane %v5055_v20, 2  ;;  %v501_v47 = vrot.slane %v5061_v13, 2 }
  0x7b   : > { %676 = vrot.lane.b32.xlu1 %v5249_v7, %s4724_s28  ;;  %8570 = vst [vmem:[#allocation36_spill] sm:$0xff] %v5275_v27 }
  0x7c   : > { %674 = vrot.lane.b32.xlu0 %v5254_v18, %s4724_s28  ;;  %v499_v18 = vrot.slane %v5036_v29, 2  ;;  %v5293_v29 = vsel %vm435_vm1, %v496_v39, %v497_v55 }
  0x7d   : > { %8572 = vst [vmem:[#allocation38_spill] sm:$0xff] %v5293_v29 }
  0x7e   : > { %v5288_v23 = vsel %vm435_vm1, %v497_v55, %v499_v18  ;;  %v507_v18 = vrot.slane %v5077_v60, 2  ;;  %v506_v55 = vrot.slane %v5083_v42, 2 }
  0x7f   : > { %680 = vrot.lane.b32.xlu1 %v5262_v41, %s4724_s28 }
  0x80   : > { %678 = vrot.lane.b32.xlu0 %v5267_v35, %s4724_s28  ;;  %v504_v35 = vrot.slane %v5058_v61, 2  ;;  %v5308_v61 = vsel %vm435_vm1, %v501_v47, %v502_v63  ;;  %v511_v47 = vrot.slane %v5105_v8, 2 }
  0x81   : > { %8575 = vst [vmem:[#allocation41_spill] sm:$0xff] %v5308_v61 }
  0x82   : > { %v5301_v31 = vsel %vm435_vm1, %v502_v63, %v504_v35  ;;  %v5325_v63 = vsel %vm435_vm1, %v506_v55, %v507_v18 }
  0x83   : > { %684 = vrot.lane.b32.xlu1 %v5275_v27, %s4724_s28  ;;  %8573 = vst [vmem:[#allocation39_spill] sm:$0xff] %v5301_v31  ;;  %8578 = vst [vmem:[#allocation44_spill] sm:$0xff] %v5325_v63 }
  0x84   : > { %682 = vrot.lane.b32.xlu0 %v5280_v58, %s4724_s28  ;;  %v509_v58 = vrot.slane %v5080_v45, 2  ;;  %v512_v45 = vrot.slane %v5099_v49, 2 }
  0x86   : > { %v5318_v35 = vsel %vm435_vm1, %v507_v18, %v509_v58 }
  0x87   : > { %688 = vrot.lane.b32.xlu1 %v5288_v23, %s4724_s28 }
  0x88   : > { %686 = vrot.lane.b32.xlu0 %v5293_v29, %s4724_s28 }
  0x89   : > { %v5305_v27 = vpop.permute.xlu1 %546 }
  0x8a   : > { %8574 = vst [vmem:[#allocation40_spill] sm:$0xff] %v5305_v27  ;;  %v5311_v39 = vpop.permute.xlu0 %542  ;;  %v514_v27 = vrot.slane %v5102_v44, 2  ;;  %v5340_v44 = vsel %vm435_vm1, %v511_v47, %v512_v45 }
  0x8b   : > { %8576 = vst [vmem:[#allocation42_spill] sm:$0xff] %v5311_v39  ;;  %692 = vrot.lane.b32.xlu1 %v5301_v31, %s4724_s28 }
  0x8c   : > { %690 = vrot.lane.b32.xlu0 %v5308_v61, %s4724_s28  ;;  %v5335_v58 = vsel %vm435_vm1, %v512_v45, %v514_v27 }
  0x8d   : > { %v5322_v29 = vpop.permute.xlu1 %548 }
  0x8e   : > { %8577 = vst [vmem:[#allocation43_spill] sm:$0xff] %v5322_v29  ;;  %v5328_v39 = vpop.permute.xlu0 %544 }
  0x8f   : > { %8579 = vst [vmem:[#allocation45_spill] sm:$0xff] %v5328_v39  ;;  %696 = vrot.lane.b32.xlu1 %v5318_v35, %s4724_s28 }
  0x90   : > { %694 = vrot.lane.b32.xlu0 %v5325_v63, %s4724_s28 }
  0x91   : > { %v5337_v61 = vpop.permute.xlu1 %552 }
  0x92   : > { %8580 = vst [vmem:[#allocation46_spill] sm:$0xff] %v5337_v61  ;;  %v5342_v18 = vpop.permute.xlu0 %550 }
  0x93   : > { %8581 = vst [vmem:[#allocation47_spill] sm:$0xff] %v5342_v18  ;;  %700 = vrot.lane.b32.xlu1 %v5335_v58, %s4724_s28 }
  0x94   : > { %698 = vrot.lane.b32.xlu0 %v5340_v44, %s4724_s28 }
  0x95   : > { %v5348_v55 = vpop.permute.xlu1 %556 }
  0x96   : > { %8582 = vst [vmem:[#allocation48_spill] sm:$0xff] %v5348_v55  ;;  %v5350_v29 = vpop.permute.xlu0 %554  ;;  %v5474_v55 = vld [vmem:[%s4786_s26 + $0x180] sm:$0xff] }
  0x97   : > { %8583 = vst [vmem:[#allocation49_spill] sm:$0xff] %v5350_v29  ;;  %736 = vrot.lane.b32.xlu1 %v4792_v1, %s4725_s29 }
  0x98   : > { %734 = vrot.lane.b32.xlu0 %v4789_v0, %s4725_s29 }
  0x99   : > { %v5356_v27 = vpop.permute.xlu1 %560 }
  0x9a   : > { %8584 = vst [vmem:[#allocation50_spill] sm:$0xff] %v5356_v27  ;;  %v5358_v45 = vpop.permute.xlu0 %558 }
  0x9b   : > { %8585 = vst [vmem:[#allocation51_spill] sm:$0xff] %v5358_v45  ;;  %740 = vrot.lane.b32.xlu1 %v4812_v11, %s4725_s29 }
  0x9c   : > { %738 = vrot.lane.b32.xlu0 %v4822_v15, %s4725_s29 }
  0x9d   : > { %v5364_v47 = vpop.permute.xlu1 %564 }
  0x9e   : > { %8586 = vst [vmem:[#allocation52_spill] sm:$0xff] %v5364_v47  ;;  %v5366_v29 = vpop.permute.xlu0 %562 }
  0x9f   : > { %8587 = vst [vmem:[#allocation53_spill] sm:$0xff] %v5366_v29  ;;  %744 = vrot.lane.b32.xlu1 %v4836_v22, %s4725_s29 }
  0xa0   : > { %742 = vrot.lane.b32.xlu0 %v4842_v24, %s4725_s29 }
  0xa1   : > { %v5372_v0 = vpop.permute.xlu1 %568 }
  0xa2   : > { %8588 = vst [vmem:[#allocation54_spill] sm:$0xff] %v5372_v0  ;;  %v5374_v1 = vpop.permute.xlu0 %566 }
  0xa3   : > { %8589 = vst [vmem:[#allocation55_spill] sm:$0xff] %v5374_v1  ;;  %748 = vrot.lane.b32.xlu1 %v4857_v30, %s4725_s29 }
  0xa4   : > { %746 = vrot.lane.b32.xlu0 %v4863_v32, %s4725_s29 }
  0xa5   : > { %v5380_v45 = vpop.permute.xlu1 %572 }
  0xa6   : > { %8590 = vst [vmem:[#allocation56_spill] sm:$0xff] %v5380_v45  ;;  %v5382_v47 = vpop.permute.xlu0 %570 }
  0xa7   : > { %8591 = vst [vmem:[#allocation57_spill] sm:$0xff] %v5382_v47  ;;  %752 = vrot.lane.b32.xlu1 %v4879_v38, %s4725_s29 }
  0xa8   : > { %750 = vrot.lane.b32.xlu0 %v4885_v40, %s4725_s29 }
  0xa9   : > { %v5388_v29 = vpop.permute.xlu1 %576 }
  0xaa   : > { %8592 = vst [vmem:[#allocation58_spill] sm:$0xff] %v5388_v29  ;;  %v5390_v0 = vpop.permute.xlu0 %574 }
  0xab   : > { %8593 = vst [vmem:[#allocation59_spill] sm:$0xff] %v5390_v0  ;;  %756 = vrot.lane.b32.xlu1 %v4901_v46, %s4725_s29 }
  0xac   : > { %754 = vrot.lane.b32.xlu0 %v4907_v48, %s4725_s29 }
  0xad   : > { %v5396_v1 = vpop.permute.xlu1 %580 }
  0xae   : > { %8594 = vst [vmem:[#allocation60_spill] sm:$0xff] %v5396_v1  ;;  %v5398_v45 = vpop.permute.xlu0 %578 }
  0xaf   : > { %8595 = vst [vmem:[#allocation61_spill] sm:$0xff] %v5398_v45  ;;  %760 = vrot.lane.b32.xlu1 %v4923_v54, %s4725_s29 }
  0xb0   : > { %758 = vrot.lane.b32.xlu0 %v4929_v56, %s4725_s29 }
  0xb1   : > { %v5404_v47 = vpop.permute.xlu1 %584 }
  0xb2   : > { %8596 = vst [vmem:[#allocation62_spill] sm:$0xff] %v5404_v47  ;;  %v5406_v29 = vpop.permute.xlu0 %582 }
  0xb3   : > { %8597 = vst [vmem:[#allocation63_spill] sm:$0xff] %v5406_v29  ;;  %764 = vrot.lane.b32.xlu1 %v4945_v62, %s4725_s29 }
  0xb4   : > { %762 = vrot.lane.b32.xlu0 %v4951_v3, %s4725_s29 }
  0xb5   : > { %v5412_v0 = vpop.permute.xlu1 %588 }
  0xb6   : > { %8598 = vst [vmem:[#allocation64_spill] sm:$0xff] %v5412_v0  ;;  %v5414_v1 = vpop.permute.xlu0 %586 }
  0xb7   : > { %8599 = vst [vmem:[#allocation65_spill] sm:$0xff] %v5414_v1  ;;  %768 = vrot.lane.b32.xlu1 %v4967_v16, %s4725_s29 }
  0xb8   : > { %766 = vrot.lane.b32.xlu0 %v4973_v19, %s4725_s29 }
  0xb9   : > { %v5420_v45 = vpop.permute.xlu1 %592 }
  0xba   : > { %8600 = vst [vmem:[#allocation66_spill] sm:$0xff] %v5420_v45  ;;  %v5422_v47 = vpop.permute.xlu0 %590 }
  0xbb   : > { %8601 = vst [vmem:[#allocation67_spill] sm:$0xff] %v5422_v47  ;;  %772 = vrot.lane.b32.xlu1 %v4989_v34, %s4725_s29 }
  0xbc   : > { %770 = vrot.lane.b32.xlu0 %v4995_v37, %s4725_s29 }
  0xbd   : > { %v5428_v29 = vpop.permute.xlu1 %596 }
  0xbe   : > { %8602 = vst [vmem:[#allocation68_spill] sm:$0xff] %v5428_v29  ;;  %v5430_v0 = vpop.permute.xlu0 %594 }
  0xbf   : > { %8603 = vst [vmem:[#allocation69_spill] sm:$0xff] %v5430_v0  ;;  %776 = vrot.lane.b32.xlu1 %v5011_v53, %s4725_s29 }
  0xc0   : > { %774 = vrot.lane.b32.xlu0 %v5017_v59, %s4725_s29 }
  0xc1   : > { %v5436_v1 = vpop.permute.xlu1 %600 }
  0xc2   : > { %8604 = vst [vmem:[#allocation70_spill] sm:$0xff] %v5436_v1  ;;  %v5438_v47 = vpop.permute.xlu0 %598 }
  0xc3   : > { %8605 = vst [vmem:[#allocation71_spill] sm:$0xff] %v5438_v47  ;;  %780 = vrot.lane.b32.xlu1 %v5033_v26, %s4725_s29 }
  0xc4   : > { %778 = vrot.lane.b32.xlu0 %v5039_v50, %s4725_s29 }
  0xc5   : > { %v5444_v29 = vpop.permute.xlu1 %604 }
  0xc6   : > { %8606 = vst [vmem:[#allocation72_spill] sm:$0xff] %v5444_v29  ;;  %v5446_v0 = vpop.permute.xlu0 %602 }
  0xc7   : > { %8607 = vst [vmem:[#allocation73_spill] sm:$0xff] %v5446_v0  ;;  %784 = vrot.lane.b32.xlu1 %v5055_v20, %s4725_s29  ;;  %v5469_v0 = vld [vmem:[%s4786_s26 + $0x188] sm:$0xff] }
  0xc8   : > { %782 = vrot.lane.b32.xlu0 %v5061_v13, %s4725_s29 }
  0xc9   : > { %v5452_v1 = vpop.permute.xlu1 %640 }
  0xca   : > { %8608 = vst [vmem:[#allocation74_spill] sm:$0xff] %v5452_v1  ;;  %v5454_v47 = vpop.permute.xlu0 %638  ;;  %v8628_v1 = vld [vmem:[#allocation7_spill] sm:$0xff] }
  0xcb   : > { %8609 = vst [vmem:[#allocation75_spill] sm:$0xff] %v5454_v47  ;;  %788 = vrot.lane.b32.xlu1 %v5077_v60, %s4725_s29 }
  0xcc   : > { %786 = vrot.lane.b32.xlu0 %v5083_v42, %s4725_s29 }
  0xcd   : > { %v5460_v45 = vpop.permute.xlu1 %644 }
  0xce   : > { %8610 = vst [vmem:[#allocation76_spill] sm:$0xff] %v5460_v45  ;;  %v5462_v29 = vpop.permute.xlu0 %642  ;;  %v8624_v45 = vld [vmem:[#allocation5_spill] sm:$0xff] }
  0xcf   : > { %8611 = vst [vmem:[#allocation77_spill] sm:$0xff] %v5462_v29  ;;  %792 = vrot.lane.b32.xlu1 %v5099_v49, %s4725_s29 }
  0xd0   : > { %790 = vrot.lane.b32.xlu0 %v5105_v8, %s4725_s29 }
  0xd1   : > { %v5471_v27 = vpop.permute.xlu1 %648 }
  0xd2   : > { %8612 = vst [vmem:[#allocation78_spill] sm:$0xff] %v5471_v27  ;;  %v5476_v18 = vpop.permute.xlu0 %646 }
  0xd3   : > { %8613 = vst [vmem:[#allocation79_spill] sm:$0xff] %v5476_v18  ;;  %796 = vrot.lane.b32.xlu1 %v5469_v0, %s4725_s29 }
  0xd4   : > { %794 = vrot.lane.b32.xlu0 %v5474_v55, %s4725_s29 }
  0xd5   : > { %v5482_v61 = vpop.permute.xlu1 %652 }
  0xd6   : > { %8614 = vst [vmem:[#allocation80_spill] sm:$0xff] %v5482_v61  ;;  %v5484_v29 = vpop.permute.xlu0 %650 }
  0xd7   : > { %8615 = vst [vmem:[#allocation81_spill] sm:$0xff] %v5484_v29  ;;  %832 = vrot.lane.b32.xlu1 %v4829_v17, %s4726_s30  ;;  %v8620_v17 = vld [vmem:[#allocation3_spill] sm:$0xff] }
  0xd8   : > { %830 = vrot.lane.b32.xlu0 %v4815_v12, %s4726_s30 }
  0xd9   : > { %v5490_v27 = vpop.permute.xlu1 %656 }
  0xda   : > { %8616 = vst [vmem:[#allocation82_spill] sm:$0xff] %v5490_v27  ;;  %v5492_v18 = vpop.permute.xlu0 %654 }
  0xdb   : > { %8617 = vst [vmem:[#allocation83_spill] sm:$0xff] %v5492_v18  ;;  %836 = vrot.lane.b32.xlu1 %v4848_v25, %s4726_s30  ;;  %v8623_v18 = vld [vmem:[#allocation4_spill] sm:$0xff] }
  0xdc   : > { %834 = vrot.lane.b32.xlu0 %v4853_v28, %s4726_s30 }
  0xdd   : > { %v5498_v61 = vpop.permute.xlu1 %660 }
  0xde   : > { %8618 = vst [vmem:[#allocation84_spill] sm:$0xff] %v5498_v61  ;;  %v5500_v29 = vpop.permute.xlu0 %658 }
  0xdf   : > { %8619 = vst [vmem:[#allocation85_spill] sm:$0xff] %v5500_v29  ;;  %840 = vrot.lane.b32.xlu1 %v4870_v33, %s4726_s30  ;;  %v8627_v29 = vld [vmem:[#allocation6_spill] sm:$0xff] }
  0xe0   : > { %838 = vrot.lane.b32.xlu0 %v8620_v17, %s4726_s30 }
  0xe1   : > { %v5506_v12 = vpop.permute.xlu1 %664 }
  0xe2   : > { %8621 = vst [vmem:[#allocation3_spill] sm:$0xff] %v5506_v12  ;;  %v5508_v27 = vpop.permute.xlu0 %662 }
  0xe3   : > { %8622 = vst [vmem:[#allocation86_spill] sm:$0xff] %v5508_v27  ;;  %844 = vrot.lane.b32.xlu1 %v8623_v18, %s4726_s30  ;;  %v8631_v27 = vld [vmem:[#allocation8_spill] sm:$0xff]  ;;  %v8632_v18 = vld [vmem:[#allocation9_spill] sm:$0xff] }
  0xe4   : > { %842 = vrot.lane.b32.xlu0 %v8624_v45, %s4726_s30 }
  0xe5   : > { %v5514_v47 = vpop.permute.xlu1 %668 }
  0xe6   : > { %8625 = vst [vmem:[#allocation87_spill] sm:$0xff] %v5514_v47  ;;  %v5516_v61 = vpop.permute.xlu0 %666 }
  0xe7   : > { %8626 = vst [vmem:[#allocation88_spill] sm:$0xff] %v5516_v61  ;;  %848 = vrot.lane.b32.xlu1 %v8627_v29, %s4726_s30  ;;  %v8635_v61 = vld [vmem:[#allocation10_spill] sm:$0xff]  ;;  %v8636_v29 = vld [vmem:[#allocation11_spill] sm:$0xff] }
  0xe8   : > { %846 = vrot.lane.b32.xlu0 %v8628_v1, %s4726_s30 }
  0xe9   : > { %v5522_v39 = vpop.permute.xlu1 %672 }
  0xea   : > { %8629 = vst [vmem:[#allocation89_spill] sm:$0xff] %v5522_v39  ;;  %v5524_v12 = vpop.permute.xlu0 %670 }
  0xeb   : > { %8630 = vst [vmem:[#allocation90_spill] sm:$0xff] %v5524_v12  ;;  %852 = vrot.lane.b32.xlu1 %v8631_v27, %s4726_s30  ;;  %v8639_v12 = vld [vmem:[#allocation12_spill] sm:$0xff]  ;;  %v8640_v27 = vld [vmem:[#allocation13_spill] sm:$0xff] }
  0xec   : > { %850 = vrot.lane.b32.xlu0 %v8632_v18, %s4726_s30 }
  0xed   : > { %v5530_v45 = vpop.permute.xlu1 %676 }
  0xee   : > { %8633 = vst [vmem:[#allocation91_spill] sm:$0xff] %v5530_v45  ;;  %v5532_v47 = vpop.permute.xlu0 %674 }
  0xef   : > { %8634 = vst [vmem:[#allocation92_spill] sm:$0xff] %v5532_v47  ;;  %856 = vrot.lane.b32.xlu1 %v8635_v61, %s4726_s30  ;;  %v8643_v47 = vld [vmem:[#allocation14_spill] sm:$0xff]  ;;  %v8644_v61 = vld [vmem:[#allocation15_spill] sm:$0xff] }
  0xf0   : > { %854 = vrot.lane.b32.xlu0 %v8636_v29, %s4726_s30 }
  0xf1   : > { %v5538_v1 = vpop.permute.xlu1 %680 }
  0xf2   : > { %8637 = vst [vmem:[#allocation93_spill] sm:$0xff] %v5538_v1  ;;  %v5540_v39 = vpop.permute.xlu0 %678 }
  0xf3   : > { %8638 = vst [vmem:[#allocation94_spill] sm:$0xff] %v5540_v39  ;;  %860 = vrot.lane.b32.xlu1 %v8639_v12, %s4726_s30  ;;  %v8647_v39 = vld [vmem:[#allocation16_spill] sm:$0xff] }
  0xf4   : > { %858 = vrot.lane.b32.xlu0 %v8640_v27, %s4726_s30  ;;  %v8648_v27 = vld [vmem:[#allocation17_spill] sm:$0xff]  ;;  %v8655_v12 = vld [vmem:[#allocation20_spill] sm:$0xff] }
  0xf5   : > { %v5546_v18 = vpop.permute.xlu1 %684 }
  0xf6   : > { %8641 = vst [vmem:[#allocation95_spill] sm:$0xff] %v5546_v18  ;;  %v5548_v45 = vpop.permute.xlu0 %682 }
  0xf7   : > { %8642 = vst [vmem:[#allocation96_spill] sm:$0xff] %v5548_v45  ;;  %864 = vrot.lane.b32.xlu1 %v8643_v47, %s4726_s30  ;;  %v8651_v47 = vld [vmem:[#allocation18_spill] sm:$0xff] }
  0xf8   : > { %862 = vrot.lane.b32.xlu0 %v8644_v61, %s4726_s30  ;;  %v8652_v61 = vld [vmem:[#allocation19_spill] sm:$0xff] }
  0xf9   : > { %v5554_v29 = vpop.permute.xlu1 %688 }
  0xfa   : > { %8645 = vst [vmem:[#allocation97_spill] sm:$0xff] %v5554_v29  ;;  %v5556_v1 = vpop.permute.xlu0 %686 }
  0xfb   : > { %8646 = vst [vmem:[#allocation98_spill] sm:$0xff] %v5556_v1  ;;  %868 = vrot.lane.b32.xlu1 %v8647_v39, %s4726_s30  ;;  %v8656_v39 = vld [vmem:[#allocation21_spill] sm:$0xff] }
  0xfc   : > { %866 = vrot.lane.b32.xlu0 %v8648_v27, %s4726_s30 }
  0xfd   : > { %v5562_v18 = vpop.permute.xlu1 %692 }
  0xfe   : > { %8649 = vst [vmem:[#allocation99_spill] sm:$0xff] %v5562_v18  ;;  %v5564_v45 = vpop.permute.xlu0 %690 }
  0xff   : > { %8650 = vst [vmem:[#allocation100_spill] sm:$0xff] %v5564_v45  ;;  %872 = vrot.lane.b32.xlu1 %v8651_v47, %s4726_s30  ;;  %v8659_v45 = vld [vmem:[#allocation22_spill] sm:$0xff]  ;;  %v8660_v47 = vld [vmem:[#allocation23_spill] sm:$0xff] }
 0x100   : > { %870 = vrot.lane.b32.xlu0 %v8652_v61, %s4726_s30 }
 0x101   : > { %v5570_v29 = vpop.permute.xlu1 %696 }
 0x102   : > { %8653 = vst [vmem:[#allocation101_spill] sm:$0xff] %v5570_v29  ;;  %v5572_v1 = vpop.permute.xlu0 %694  ;;  %v5589_v29 = vld [vmem:[%s4786_s26 + $0x190] sm:$0x3] }
 0x103   : > { %8654 = vst [vmem:[#allocation102_spill] sm:$0xff] %v5572_v1  ;;  %876 = vrot.lane.b32.xlu1 %v8655_v12, %s4726_s30 }
 0x104   : > { %874 = vrot.lane.b32.xlu0 %v8656_v39, %s4726_s30  ;;  %v520_v39 = vrot.slane %v5469_v0, 1 }
 0x105   : > { %v5578_v27 = vpop.permute.xlu1 %700 }
 0x106   : > { %8657 = vst [vmem:[#allocation103_spill] sm:$0xff] %v5578_v27  ;;  %v5580_v18 = vpop.permute.xlu0 %698  ;;  %v519_v27 = vrot.slane %v5474_v55, 1 }
 0x107   : > { %8658 = vst [vmem:[#allocation104_spill] sm:$0xff] %v5580_v18  ;;  %880 = vrot.lane.b32.xlu1 %v8659_v45, %s4726_s30  ;;  %v522_v18 = vrot.slane %v5589_v29, 1 }
 0x108   : > { %878 = vrot.lane.b32.xlu0 %v8660_v47, %s4726_s30 }
 0x109   : > { %v5586_v61 = vpop.permute.xlu1 %736 }
 0x10a   : > { %8661 = vst [vmem:[#allocation105_spill] sm:$0xff] %v5586_v61  ;;  %v5591_v1 = vpop.permute.xlu0 %734  ;;  %v5609_v61 = vsel %vm354_vm0, %v520_v39, %v522_v18 }
 0x10b   : > { %8662 = vst [vmem:[#allocation106_spill] sm:$0xff] %v5591_v1  ;;  %884 = vrot.lane.b32.xlu1 %v5112_v21, %s4726_s30  ;;  %v8665_v1 = vld [vmem:[#allocation26_spill] sm:$0xff] }
 0x10c   : > { %882 = vrot.lane.b32.xlu0 %v5117_v9, %s4726_s30  ;;  %v5614_v9 = vsel %vm354_vm0, %v519_v27, %v520_v39 }
 0x10d   : > { %v5600_v45 = vpop.permute.xlu1 %740 }
 0x10e   : > { %8663 = vst [vmem:[#allocation107_spill] sm:$0xff] %v5600_v45  ;;  %v5602_v47 = vpop.permute.xlu0 %738 }
 0x10f   : > { %8664 = vst [vmem:[#allocation108_spill] sm:$0xff] %v5602_v47  ;;  %888 = vrot.lane.b32.xlu1 %v5125_v57, %s4726_s30 }
 0x110   : > { %886 = vrot.lane.b32.xlu0 %v8665_v1, %s4726_s30 }
 0x111   : > { %v5611_v21 = vpop.permute.xlu1 %744 }
 0x112   : > { %8666 = vst [vmem:[#allocation26_spill] sm:$0xff] %v5611_v21  ;;  %v5616_v12 = vpop.permute.xlu0 %742 }
 0x113   : > { %8667 = vst [vmem:[#allocation109_spill] sm:$0xff] %v5616_v12  ;;  %892 = vrot.lane.b32.xlu1 %v5609_v61, %s4726_s30 }
 0x114   : > { %890 = vrot.lane.b32.xlu0 %v5614_v9, %s4726_s30 }
 0x115   : > { %v5622_v47 = vpop.permute.xlu1 %748 }
 0x116   : > { %8668 = vst [vmem:[#allocation110_spill] sm:$0xff] %v5622_v47  ;;  %v5624_v45 = vpop.permute.xlu0 %746 }
 0x117   : > { %8669 = vst [vmem:[#allocation111_spill] sm:$0xff] %v5624_v45  ;;  %928 = vrot.lane.b32.xlu1 %v5145_v2, %s4727_s7  ;;  %v8674_v2 = vld [vmem:[#allocation27_spill] sm:$0xff] }
 0x118   : > { %926 = vrot.lane.b32.xlu0 %v5150_v36, %s4727_s7 }
 0x119   : > { %v5630_v39 = vpop.permute.xlu1 %752 }
 0x11a   : > { %8670 = vst [vmem:[#allocation112_spill] sm:$0xff] %v5630_v39  ;;  %v5632_v18 = vpop.permute.xlu0 %750 }
 0x11b   : > { %8671 = vst [vmem:[#allocation113_spill] sm:$0xff] %v5632_v18  ;;  %932 = vrot.lane.b32.xlu1 %v5158_v43, %s4727_s7  ;;  %v8677_v18 = vld [vmem:[#allocation28_spill] sm:$0xff] }
 0x11c   : > { %930 = vrot.lane.b32.xlu0 %v5163_v14, %s4727_s7 }
 0x11d   : > { %v5638_v27 = vpop.permute.xlu1 %756 }
 0x11e   : > { %8672 = vst [vmem:[#allocation114_spill] sm:$0xff] %v5638_v27  ;;  %v5640_v45 = vpop.permute.xlu0 %754 }
 0x11f   : > { %8673 = vst [vmem:[#allocation115_spill] sm:$0xff] %v5640_v45  ;;  %936 = vrot.lane.b32.xlu1 %v5171_v5, %s4727_s7  ;;  %v8680_v45 = vld [vmem:[#allocation29_spill] sm:$0xff] }
 0x120   : > { %934 = vrot.lane.b32.xlu0 %v8674_v2, %s4727_s7 }
 0x121   : > { %v5646_v36 = vpop.permute.xlu1 %760 }
 0x122   : > { %8675 = vst [vmem:[#allocation27_spill] sm:$0xff] %v5646_v36  ;;  %v5648_v39 = vpop.permute.xlu0 %758 }
 0x123   : > { %8676 = vst [vmem:[#allocation116_spill] sm:$0xff] %v5648_v39  ;;  %940 = vrot.lane.b32.xlu1 %v5184_v51, %s4727_s7  ;;  %v8683_v39 = vld [vmem:[#allocation30_spill] sm:$0xff] }
 0x124   : > { %938 = vrot.lane.b32.xlu0 %v8677_v18, %s4727_s7 }
 0x125   : > { %v5654_v47 = vpop.permute.xlu1 %764 }
 0x126   : > { %8678 = vst [vmem:[#allocation28_spill] sm:$0xff] %v5654_v47  ;;  %v5656_v27 = vpop.permute.xlu0 %762 }
 0x127   : > { %8679 = vst [vmem:[#allocation117_spill] sm:$0xff] %v5656_v27  ;;  %944 = vrot.lane.b32.xlu1 %v5197_v6, %s4727_s7  ;;  %v8686_v27 = vld [vmem:[#allocation31_spill] sm:$0xff] }
 0x128   : > { %942 = vrot.lane.b32.xlu0 %v8680_v45, %s4727_s7 }
 0x129   : > { %v5662_v12 = vpop.permute.xlu1 %768 }
 0x12a   : > { %8681 = vst [vmem:[#allocation118_spill] sm:$0xff] %v5662_v12  ;;  %v5664_v36 = vpop.permute.xlu0 %766 }
 0x12b   : > { %8682 = vst [vmem:[#allocation119_spill] sm:$0xff] %v5664_v36  ;;  %948 = vrot.lane.b32.xlu1 %v5210_v4, %s4727_s7  ;;  %v8689_v36 = vld [vmem:[#allocation32_spill] sm:$0xff] }
 0x12c   : > { %946 = vrot.lane.b32.xlu0 %v8683_v39, %s4727_s7 }
 0x12d   : > { %v5670_v21 = vpop.permute.xlu1 %772 }
 0x12e   : > { %8684 = vst [vmem:[#allocation120_spill] sm:$0xff] %v5670_v21  ;;  %v5672_v47 = vpop.permute.xlu0 %770 }
 0x12f   : > { %8685 = vst [vmem:[#allocation121_spill] sm:$0xff] %v5672_v47  ;;  %952 = vrot.lane.b32.xlu1 %v5223_v52, %s4727_s7  ;;  %v8692_v47 = vld [vmem:[#allocation34_spill] sm:$0xff] }
 0x130   : > { %950 = vrot.lane.b32.xlu0 %v8686_v27, %s4727_s7 }
 0x131   : > { %v5678_v45 = vpop.permute.xlu1 %776 }
 0x132   : > { %8687 = vst [vmem:[#allocation122_spill] sm:$0xff] %v5678_v45  ;;  %v5680_v12 = vpop.permute.xlu0 %774 }
 0x133   : > { %8688 = vst [vmem:[#allocation123_spill] sm:$0xff] %v5680_v12  ;;  %956 = vrot.lane.b32.xlu1 %v5236_v10, %s4727_s7  ;;  %v8695_v12 = vld [vmem:[#allocation35_spill] sm:$0xff] }
 0x134   : > { %954 = vrot.lane.b32.xlu0 %v8689_v36, %s4727_s7 }
 0x135   : > { %v5686_v39 = vpop.permute.xlu1 %780 }
 0x136   : > { %8690 = vst [vmem:[#allocation124_spill] sm:$0xff] %v5686_v39  ;;  %v5688_v21 = vpop.permute.xlu0 %778 }
 0x137   : > { %8691 = vst [vmem:[#allocation125_spill] sm:$0xff] %v5688_v21  ;;  %960 = vrot.lane.b32.xlu1 %v5249_v7, %s4727_s7  ;;  %v8698_v21 = vld [vmem:[#allocation36_spill] sm:$0xff]  ;;  %v8699_v7 = vld [vmem:[#allocation37_spill] sm:$0xff] }
 0x138   : > { %958 = vrot.lane.b32.xlu0 %v8692_v47, %s4727_s7 }
 0x139   : > { %v5694_v27 = vpop.permute.xlu1 %784 }
 0x13a   : > { %8693 = vst [vmem:[#allocation126_spill] sm:$0xff] %v5694_v27  ;;  %v5696_v45 = vpop.permute.xlu0 %782 }
 0x13b   : > { %8694 = vst [vmem:[#allocation127_spill] sm:$0xff] %v5696_v45  ;;  %964 = vrot.lane.b32.xlu1 %v5262_v41, %s4727_s7  ;;  %v8702_v45 = vld [vmem:[#allocation38_spill] sm:$0xff] }
 0x13c   : > { %962 = vrot.lane.b32.xlu0 %v8695_v12, %s4727_s7 }
 0x13d   : > { %v5702_v36 = vpop.permute.xlu1 %788 }
 0x13e   : > { %8696 = vst [vmem:[#allocation128_spill] sm:$0xff] %v5702_v36  ;;  %v5704_v39 = vpop.permute.xlu0 %786 }
 0x13f   : > { %8697 = vst [vmem:[#allocation129_spill] sm:$0xff] %v5704_v39  ;;  %968 = vrot.lane.b32.xlu1 %v8698_v21, %s4727_s7  ;;  %v8705_v39 = vld [vmem:[#allocation41_spill] sm:$0xff] }
 0x140   : > { %966 = vrot.lane.b32.xlu0 %v8699_v7, %s4727_s7 }
 0x141   : > { %v5710_v47 = vpop.permute.xlu1 %792 }
 0x142   : > { %8700 = vst [vmem:[#allocation36_spill] sm:$0xff] %v5710_v47  ;;  %v5712_v27 = vpop.permute.xlu0 %790 }
 0x143   : > { %8701 = vst [vmem:[#allocation130_spill] sm:$0xff] %v5712_v27  ;;  %972 = vrot.lane.b32.xlu1 %v5288_v23, %s4727_s7  ;;  %v525_v27 = vrot.slane %v5469_v0, 2 }
 0x144   : > { %970 = vrot.lane.b32.xlu0 %v8702_v45, %s4727_s7 }
 0x145   : > { %v5718_v12 = vpop.permute.xlu1 %796 }
 0x146   : > { %8703 = vst [vmem:[#allocation131_spill] sm:$0xff] %v5718_v12  ;;  %v5720_v36 = vpop.permute.xlu0 %794  ;;  %v524_v12 = vrot.slane %v5474_v55, 2 }
 0x147   : > { %8704 = vst [vmem:[#allocation132_spill] sm:$0xff] %v5720_v36  ;;  %976 = vrot.lane.b32.xlu1 %v5301_v31, %s4727_s7  ;;  %v527_v36 = vrot.slane %v5589_v29, 2 }
 0x148   : > { %974 = vrot.lane.b32.xlu0 %v8705_v39, %s4727_s7 }
 0x149   : > { %v5726_v7 = vpop.permute.xlu1 %832 }
 0x14a   : > { %8706 = vst [vmem:[#allocation41_spill] sm:$0xff] %v5726_v7  ;;  %v5728_v47 = vpop.permute.xlu0 %830 }
 0x14b   : > { %8707 = vst [vmem:[#allocation133_spill] sm:$0xff] %v5728_v47  ;;  %980 = vrot.lane.b32.xlu1 %v5318_v35, %s4727_s7  ;;  %v5746_v47 = vsel %vm435_vm1, %v525_v27, %v527_v36 }
 0x14c   : > { %978 = vrot.lane.b32.xlu0 %v5325_v63, %s4727_s7  ;;  %v5751_v63 = vsel %vm435_vm1, %v524_v12, %v525_v27 }
 0x14d   : > { %v5737_v31 = vpop.permute.xlu1 %836 }
 0x14e   : > { %8708 = vst [vmem:[#allocation134_spill] sm:$0xff] %v5737_v31  ;;  %v5739_v45 = vpop.permute.xlu0 %834 }
 0x14f   : > { %8709 = vst [vmem:[#allocation135_spill] sm:$0xff] %v5739_v45  ;;  %984 = vrot.lane.b32.xlu1 %v5335_v58, %s4727_s7 }
 0x150   : > { %982 = vrot.lane.b32.xlu0 %v5340_v44, %s4727_s7 }
 0x151   : > { %v5748_v7 = vpop.permute.xlu1 %840 }
 0x152   : > { %v5753_v29 = vpop.permute.xlu0 %838 }
 0x153   : > { %988 = vrot.lane.b32.xlu1 %v5746_v47, %s4727_s7 }
 0x154   : > { %986 = vrot.lane.b32.xlu0 %v5751_v63, %s4727_s7 }
 0x155   : > { %v5759_v45 = vpop.permute.xlu1 %844 }
 0x156   : > { %v5761_v31 = vpop.permute.xlu0 %842 }
 0x157   : > { %8710 = vst [vmem:[#allocation136_spill] sm:$0xff] %v5761_v31  ;;  %1024 = vrot.lane.b32.xlu1 %v4812_v11, %s4728_s8 }
 0x158   : > { %1022 = vrot.lane.b32.xlu0 %v4822_v15, %s4728_s8 }
 0x159   : > { %v5767_v12 = vpop.permute.xlu1 %848 }
 0x15a   : > { %v5769_v27 = vpop.permute.xlu0 %846 }
 0x15b   : > { %1028 = vrot.lane.b32.xlu1 %v4836_v22, %s4728_s8 }
 0x15c   : > { %1026 = vrot.lane.b32.xlu0 %v4842_v24, %s4728_s8 }
 0x15d   : > { %v5775_v36 = vpop.permute.xlu1 %852 }
 0x15e   : > { %v5777_v31 = vpop.permute.xlu0 %850 }
 0x15f   : > { %1032 = vrot.lane.b32.xlu1 %v4857_v30, %s4728_s8 }
 0x160   : > { %1030 = vrot.lane.b32.xlu0 %v4863_v32, %s4728_s8 }
 0x161   : > { %v5783_v11 = vpop.permute.xlu1 %856 }
 0x162   : > { %v5785_v15 = vpop.permute.xlu0 %854 }
 0x163   : > { %1036 = vrot.lane.b32.xlu1 %v4879_v38, %s4728_s8 }
 0x164   : > { %1034 = vrot.lane.b32.xlu0 %v4885_v40, %s4728_s8 }
 0x165   : > { %v5791_v22 = vpop.permute.xlu1 %860 }
 0x166   : > { %8711 = vst [vmem:[#allocation137_spill] sm:$0xff] %v5791_v22  ;;  %v5793_v24 = vpop.permute.xlu0 %858 }
 0x167   : > { %8712 = vst [vmem:[#allocation138_spill] sm:$0xff] %v5793_v24  ;;  %1040 = vrot.lane.b32.xlu1 %v4901_v46, %s4728_s8  ;;  %v8821_v24 = vld [vmem:[#allocation105_spill] sm:$0xff] }
 0x168   : > { %1038 = vrot.lane.b32.xlu0 %v4907_v48, %s4728_s8 }
 0x169   : > { %v5799_v30 = vpop.permute.xlu1 %864 }
 0x16a   : > { %8713 = vst [vmem:[#allocation139_spill] sm:$0xff] %v5799_v30  ;;  %v5801_v32 = vpop.permute.xlu0 %862 }
 0x16b   : > { %8714 = vst [vmem:[#allocation140_spill] sm:$0xff] %v5801_v32  ;;  %1044 = vrot.lane.b32.xlu1 %v4923_v54, %s4728_s8 }
 0x16c   : > { %1042 = vrot.lane.b32.xlu0 %v4929_v56, %s4728_s8 }
 0x16d   : > { %v5807_v38 = vpop.permute.xlu1 %868 }
 0x16e   : > { %8715 = vst [vmem:[#allocation141_spill] sm:$0xff] %v5807_v38  ;;  %v5809_v40 = vpop.permute.xlu0 %866 }
 0x16f   : > { %8716 = vst [vmem:[#allocation142_spill] sm:$0xff] %v5809_v40  ;;  %1048 = vrot.lane.b32.xlu1 %v4945_v62, %s4728_s8  ;;  %v8743_v40 = vld [vmem:[#allocation12_spill] sm:$0xff] }
 0x170   : > { %1046 = vrot.lane.b32.xlu0 %v4951_v3, %s4728_s8 }
 0x171   : > { %v5815_v46 = vpop.permute.xlu1 %872 }
 0x172   : > { %8717 = vst [vmem:[#allocation143_spill] sm:$0xff] %v5815_v46  ;;  %v5817_v48 = vpop.permute.xlu0 %870 }
 0x173   : > { %8718 = vst [vmem:[#allocation144_spill] sm:$0xff] %v5817_v48  ;;  %1052 = vrot.lane.b32.xlu1 %v4967_v16, %s4728_s8  ;;  %v8739_v48 = vld [vmem:[#allocation10_spill] sm:$0xff] }
 0x174   : > { %1050 = vrot.lane.b32.xlu0 %v4973_v19, %s4728_s8 }
 0x175   : > { %v5823_v54 = vpop.permute.xlu1 %876 }
 0x176   : > { %8719 = vst [vmem:[#allocation145_spill] sm:$0xff] %v5823_v54  ;;  %v5825_v56 = vpop.permute.xlu0 %874 }
 0x177   : > { %8720 = vst [vmem:[#allocation146_spill] sm:$0xff] %v5825_v56  ;;  %1056 = vrot.lane.b32.xlu1 %v4989_v34, %s4728_s8  ;;  %v8735_v56 = vld [vmem:[#allocation8_spill] sm:$0xff] }
 0x178   : > { %1054 = vrot.lane.b32.xlu0 %v4995_v37, %s4728_s8 }
 0x179   : > { %v5831_v62 = vpop.permute.xlu1 %880 }
 0x17a   : > { %8721 = vst [vmem:[#allocation147_spill] sm:$0xff] %v5831_v62  ;;  %v5833_v3 = vpop.permute.xlu0 %878 }
 0x17b   : > { %8722 = vst [vmem:[#allocation148_spill] sm:$0xff] %v5833_v3  ;;  %1060 = vrot.lane.b32.xlu1 %v5011_v53, %s4728_s8  ;;  %v8731_v3 = vld [vmem:[#allocation6_spill] sm:$0xff] }
 0x17c   : > { %1058 = vrot.lane.b32.xlu0 %v5017_v59, %s4728_s8 }
 0x17d   : > { %v5839_v16 = vpop.permute.xlu1 %884 }
 0x17e   : > { %8723 = vst [vmem:[#allocation149_spill] sm:$0xff] %v5839_v16  ;;  %v5841_v19 = vpop.permute.xlu0 %882 }
 0x17f   : > { %8724 = vst [vmem:[#allocation150_spill] sm:$0xff] %v5841_v19  ;;  %1064 = vrot.lane.b32.xlu1 %v5033_v26, %s4728_s8  ;;  %v8729_v19 = vld [vmem:[#allocation4_spill] sm:$0xff] }
 0x180   : > { %1062 = vrot.lane.b32.xlu0 %v5039_v50, %s4728_s8 }
 0x181   : > { %v5847_v34 = vpop.permute.xlu1 %888 }
 0x182   : > { %8725 = vst [vmem:[#allocation151_spill] sm:$0xff] %v5847_v34  ;;  %v5849_v37 = vpop.permute.xlu0 %886 }
 0x183   : > { %8726 = vst [vmem:[#allocation152_spill] sm:$0xff] %v5849_v37  ;;  %1068 = vrot.lane.b32.xlu1 %v5055_v20, %s4728_s8 }
 0x184   : > { %1066 = vrot.lane.b32.xlu0 %v5061_v13, %s4728_s8 }
 0x185   : > { %v5855_v53 = vpop.permute.xlu1 %892 }
 0x186   : > { %8727 = vst [vmem:[#allocation153_spill] sm:$0xff] %v5855_v53  ;;  %v5857_v59 = vpop.permute.xlu0 %890 }
 0x187   : > { %8728 = vst [vmem:[#allocation154_spill] sm:$0xff] %v5857_v59  ;;  %1072 = vrot.lane.b32.xlu1 %v5077_v60, %s4728_s8  ;;  %v5880_v60 = vld [vmem:[%s4786_s26 + $0x1a0] sm:$0xff]  ;;  %v5885_v59 = vld [vmem:[%s4786_s26 + $0x198] sm:$0xff] }
 0x188   : > { %1070 = vrot.lane.b32.xlu0 %v5083_v42, %s4728_s8 }
 0x189   : > { %v5863_v50 = vpop.permute.xlu1 %928 }
 0x18a   : > { %v5865_v26 = vpop.permute.xlu0 %926 }
 0x18b   : > { %1076 = vrot.lane.b32.xlu1 %v5099_v49, %s4728_s8 }
 0x18c   : > { %1074 = vrot.lane.b32.xlu0 %v5105_v8, %s4728_s8 }
 0x18d   : > { %v5871_v20 = vpop.permute.xlu1 %932 }
 0x18e   : > { %v5873_v13 = vpop.permute.xlu0 %930 }
 0x18f   : > { %1080 = vrot.lane.b32.xlu1 %v5469_v0, %s4728_s8 }
 0x190   : > { %1078 = vrot.lane.b32.xlu0 %v5474_v55, %s4728_s8 }
 0x191   : > { %v5882_v42 = vpop.permute.xlu1 %936 }
 0x192   : > { %v5887_v49 = vpop.permute.xlu0 %934 }
 0x193   : > { %1084 = vrot.lane.b32.xlu1 %v5880_v60, %s4728_s8 }
 0x194   : > { %1082 = vrot.lane.b32.xlu0 %v5885_v59, %s4728_s8 }
 0x195   : > { %v5893_v8 = vpop.permute.xlu1 %940 }
 0x196   : > { %v5895_v0 = vpop.permute.xlu0 %938 }
 0x197   : > { %1120 = vrot.lane.b32.xlu1 %v4848_v25, %s4729_s9  ;;  %v8730_v25 = vld [vmem:[#allocation5_spill] sm:$0xff] }
 0x198   : > { %1118 = vrot.lane.b32.xlu0 %v4853_v28, %s4729_s9 }
 0x199   : > { %v5901_v55 = vpop.permute.xlu1 %944 }
 0x19a   : > { %v5903_v53 = vpop.permute.xlu0 %942 }
 0x19b   : > { %1124 = vrot.lane.b32.xlu1 %v4870_v33, %s4729_s9  ;;  %v8732_v33 = vld [vmem:[#allocation7_spill] sm:$0xff] }
 0x19c   : > { %1122 = vrot.lane.b32.xlu0 %v8620_v17, %s4729_s9 }
 0x19d   : > { %v5909_v37 = vpop.permute.xlu1 %948 }
 0x19e   : > { %v5911_v34 = vpop.permute.xlu0 %946 }
 0x19f   : > { %1128 = vrot.lane.b32.xlu1 %v8729_v19, %s4729_s9  ;;  %v8736_v19 = vld [vmem:[#allocation9_spill] sm:$0xff] }
 0x1a0   : > { %1126 = vrot.lane.b32.xlu0 %v8730_v25, %s4729_s9 }
 0x1a1   : > { %v5917_v28 = vpop.permute.xlu1 %952 }
 0x1a2   : > { %v5919_v16 = vpop.permute.xlu0 %950 }
 0x1a3   : > { %1132 = vrot.lane.b32.xlu1 %v8731_v3, %s4729_s9  ;;  %v8740_v3 = vld [vmem:[#allocation11_spill] sm:$0xff] }
 0x1a4   : > { %1130 = vrot.lane.b32.xlu0 %v8732_v33, %s4729_s9 }
 0x1a5   : > { %v5925_v17 = vpop.permute.xlu1 %956 }
 0x1a6   : > { %8733 = vst [vmem:[#allocation4_spill] sm:$0xff] %v5925_v17  ;;  %v5927_v62 = vpop.permute.xlu0 %954  ;;  %v8820_v17 = vld [vmem:[#allocation75_spill] sm:$0xff] }
 0x1a7   : > { %8734 = vst [vmem:[#allocation5_spill] sm:$0xff] %v5927_v62  ;;  %1136 = vrot.lane.b32.xlu1 %v8735_v56, %s4729_s9  ;;  %v8744_v56 = vld [vmem:[#allocation13_spill] sm:$0xff] }
 0x1a8   : > { %1134 = vrot.lane.b32.xlu0 %v8736_v19, %s4729_s9 }
 0x1a9   : > { %v5933_v25 = vpop.permute.xlu1 %960 }
 0x1aa   : > { %8737 = vst [vmem:[#allocation6_spill] sm:$0xff] %v5933_v25  ;;  %v5935_v54 = vpop.permute.xlu0 %958 }
 0x1ab   : > { %8738 = vst [vmem:[#allocation7_spill] sm:$0xff] %v5935_v54  ;;  %1140 = vrot.lane.b32.xlu1 %v8739_v48, %s4729_s9  ;;  %v8747_v54 = vld [vmem:[#allocation14_spill] sm:$0xff]  ;;  %v8748_v48 = vld [vmem:[#allocation15_spill] sm:$0xff] }
 0x1ac   : > { %1138 = vrot.lane.b32.xlu0 %v8740_v3, %s4729_s9 }
 0x1ad   : > { %v5941_v33 = vpop.permute.xlu1 %964 }
 0x1ae   : > { %8741 = vst [vmem:[#allocation8_spill] sm:$0xff] %v5941_v33  ;;  %v5943_v46 = vpop.permute.xlu0 %962 }
 0x1af   : > { %8742 = vst [vmem:[#allocation9_spill] sm:$0xff] %v5943_v46  ;;  %1144 = vrot.lane.b32.xlu1 %v8743_v40, %s4729_s9  ;;  %v8751_v46 = vld [vmem:[#allocation16_spill] sm:$0xff]  ;;  %v8752_v40 = vld [vmem:[#allocation17_spill] sm:$0xff] }
 0x1b0   : > { %1142 = vrot.lane.b32.xlu0 %v8744_v56, %s4729_s9 }
 0x1b1   : > { %v5949_v19 = vpop.permute.xlu1 %968 }
 0x1b2   : > { %8745 = vst [vmem:[#allocation10_spill] sm:$0xff] %v5949_v19  ;;  %v5951_v38 = vpop.permute.xlu0 %966 }
 0x1b3   : > { %8746 = vst [vmem:[#allocation11_spill] sm:$0xff] %v5951_v38  ;;  %1148 = vrot.lane.b32.xlu1 %v8747_v54, %s4729_s9  ;;  %v8755_v38 = vld [vmem:[#allocation18_spill] sm:$0xff]  ;;  %v8756_v54 = vld [vmem:[#allocation19_spill] sm:$0xff] }
 0x1b4   : > { %1146 = vrot.lane.b32.xlu0 %v8748_v48, %s4729_s9 }
 0x1b5   : > { %v5957_v3 = vpop.permute.xlu1 %972 }
 0x1b6   : > { %8749 = vst [vmem:[#allocation12_spill] sm:$0xff] %v5957_v3  ;;  %v5959_v33 = vpop.permute.xlu0 %970 }
 0x1b7   : > { %8750 = vst [vmem:[#allocation13_spill] sm:$0xff] %v5959_v33  ;;  %1152 = vrot.lane.b32.xlu1 %v8751_v46, %s4729_s9  ;;  %v8759_v33 = vld [vmem:[#allocation20_spill] sm:$0xff]  ;;  %v8760_v46 = vld [vmem:[#allocation21_spill] sm:$0xff] }
 0x1b8   : > { %1150 = vrot.lane.b32.xlu0 %v8752_v40, %s4729_s9  ;;  %v1574_v40 = vld [vmem:[%s8417_s1] sm:$0xff] }
 0x1b9   : > { %v5965_v56 = vpop.permute.xlu1 %976 }
 0x1ba   : > { %8753 = vst [vmem:[#allocation14_spill] sm:$0xff] %v5965_v56  ;;  %v5967_v19 = vpop.permute.xlu0 %974  ;;  %v6012_v56 = vld [vmem:[%s4786_s26 + $0x1a8] sm:$0x3] }
 0x1bb   : > { %8754 = vst [vmem:[#allocation15_spill] sm:$0xff] %v5967_v19  ;;  %1156 = vrot.lane.b32.xlu1 %v8755_v38, %s4729_s9  ;;  %v1575_v38 = vld [vmem:[%s8417_s1 + $0x8] sm:$0xff] }
 0x1bc   : > { %1154 = vrot.lane.b32.xlu0 %v8756_v54, %s4729_s9  ;;  %v4608_v54 = vpack.c.bf16 %v1575_v38, %v1574_v40 }
 0x1bd   : > { %v5973_v48 = vpop.permute.xlu1 %980 }
 0x1be   : > { %8757 = vst [vmem:[#allocation16_spill] sm:$0xff] %v5973_v48  ;;  %v5975_v3 = vpop.permute.xlu0 %978  ;;  %4609 = vmatprep.subr.bf16.mxu0 %v4608_v54 }
 0x1bf   : > { %8758 = vst [vmem:[#allocation17_spill] sm:$0xff] %v5975_v3  ;;  %1160 = vrot.lane.b32.xlu1 %v8759_v33, %s4729_s9  ;;  %v8763_v3 = vld [vmem:[#allocation22_spill] sm:$0xff]  ;;  %v8764_v33 = vld [vmem:[#allocation23_spill] sm:$0xff]  ;;  %4611 = vmatpush3.bf16.msra.mxu0 %v4608_v54 }
 0x1c0   : > { %1158 = vrot.lane.b32.xlu0 %v8760_v46, %s4729_s9  ;;  %v1576_v46 = vld [vmem:[%s8417_s1 + $0x10] sm:$0xff] }
 0x1c1   : > { %v5987_v19 = vpop.permute.xlu1 %984 }
 0x1c2   : > { %8761 = vst [vmem:[#allocation18_spill] sm:$0xff] %v5987_v19  ;;  %v5989_v48 = vpop.permute.xlu0 %982  ;;  %v1577_v19 = vld [vmem:[%s8417_s1 + $0x18] sm:$0xff] }
 0x1c3   : > { %8762 = vst [vmem:[#allocation19_spill] sm:$0xff] %v5989_v48  ;;  %1164 = vrot.lane.b32.xlu1 %v8763_v3, %s4729_s9  ;;  %v4612_v38 = vpack.c.bf16 %v1577_v19, %v1576_v46  ;;  %v8767_v3 = vld [vmem:[#allocation24_spill] sm:$0xff]  ;;  %v1578_v19 = vld [vmem:[%s8417_s1 + $0x20] sm:$0xf]  ;;  %v533_v46 = vrot.slane %v5880_v60, 1 }
 0x1c4   : > { %1162 = vrot.lane.b32.xlu0 %v8764_v33, %s4729_s9  ;;  %v8768_v33 = vld [vmem:[#allocation25_spill] sm:$0xff] }
 0x1c5   : > { %v6001_v40 = vpop.permute.xlu1 %988  ;;  %4613 = vmatprep.subr.bf16.mxu0 %v4612_v38 }
 0x1c6   : > { %8765 = vst [vmem:[#allocation20_spill] sm:$0xff] %v6001_v40  ;;  %v6003_v48 = vpop.permute.xlu0 %986  ;;  %4615 = vmatpush3.bf16.msra.mxu0 %v4612_v38  ;;  %v535_v38 = vrot.slane %v6012_v56, 1 }
 0x1c7   : > { %8766 = vst [vmem:[#allocation21_spill] sm:$0xff] %v6003_v48  ;;  %1168 = vrot.lane.b32.xlu1 %v8767_v3, %s4729_s9  ;;  %4492 = vmatprep.subr.msk.mxu0 %vm1676_vm2, %v1578_v19  ;;  %v532_v3 = vrot.slane %v5885_v59, 1 }
 0x1c8   : > { %1166 = vrot.lane.b32.xlu0 %v8768_v33, %s4729_s9 }
 0x1c9   : > { %v6009_v54 = vpop.permute.xlu1 %1024 }
 0x1ca   : > { %v6014_v25 = vpop.permute.xlu0 %1022  ;;  %4493 = vmatpush3.msk.msra.mxu0 %vm1676_vm2, %v1578_v19 }
 0x1cb   : > { %1172 = vrot.lane.b32.xlu1 %v5125_v57, %s4729_s9  ;;  %v536_v57 = vsel %vm354_vm0, %v533_v46, %v535_v38 }
 0x1cc   : > { %1170 = vrot.lane.b32.xlu0 %v8665_v1, %s4729_s9  ;;  %v534_v1 = vsel %vm354_vm0, %v532_v3, %v533_v46  ;;  %vm3645_vm0 = vcmask 523264  }
 0x1cd   : > { %v6026_v33 = vpop.permute.xlu1 %1028 }
 0x1ce   : > { %v6028_v48 = vpop.permute.xlu0 %1026 }
 0x1cf   : > { %1176 = vrot.lane.b32.xlu1 %v5609_v61, %s4729_s9 }
 0x1d0   : > { %1174 = vrot.lane.b32.xlu0 %v5614_v9, %s4729_s9 }
 0x1d1   : > { %v6035_v40 = vpop.permute.xlu1 %1032 }
 0x1d2   : > { %v6038_v32 = vpop.permute.xlu0 %1030 }
 0x1d3   : > { %1180 = vrot.lane.b32.xlu1 %v536_v57, %s4729_s9 }
 0x1d4   : > { %1178 = vrot.lane.b32.xlu0 %v534_v1, %s4729_s9 }
 0x1d5   : > { %v6042_v19 = vpop.permute.xlu1 %1036 }
 0x1d6   : > { %v6044_v30 = vpop.permute.xlu0 %1034 }
 0x1d7   : > { %1216 = vrot.lane.b32.xlu1 %v5158_v43, %s4730_s20 }
 0x1d8   : > { %1214 = vrot.lane.b32.xlu0 %v5163_v14, %s4730_s20 }
 0x1d9   : > { %v6050_v9 = vpop.permute.xlu1 %1040 }
 0x1da   : > { %v6052_v61 = vpop.permute.xlu0 %1038 }
 0x1db   : > { %1220 = vrot.lane.b32.xlu1 %v5171_v5, %s4730_s20  ;;  %v8770_v5 = vld [vmem:[#allocation29_spill] sm:$0xff] }
 0x1dc   : > { %1218 = vrot.lane.b32.xlu0 %v8674_v2, %s4730_s20 }
 0x1dd   : > { %v6058_v46 = vpop.permute.xlu1 %1044 }
 0x1de   : > { %v6060_v38 = vpop.permute.xlu0 %1042 }
 0x1df   : > { %1224 = vrot.lane.b32.xlu1 %v5184_v51, %s4730_s20  ;;  %v8773_v51 = vld [vmem:[#allocation30_spill] sm:$0xff] }
 0x1e0   : > { %1222 = vrot.lane.b32.xlu0 %v8677_v18, %s4730_s20 }
 0x1e1   : > { %v6066_v43 = vpop.permute.xlu1 %1048 }
 0x1e2   : > { %v6068_v14 = vpop.permute.xlu0 %1046 }
 0x1e3   : > { %8769 = vst [vmem:[#allocation22_spill] sm:$0xff] %v6068_v14  ;;  %1228 = vrot.lane.b32.xlu1 %v5197_v6, %s4730_s20  ;;  %v8776_v6 = vld [vmem:[#allocation31_spill] sm:$0xff] }
 0x1e4   : > { %1226 = vrot.lane.b32.xlu0 %v8770_v5, %s4730_s20 }
 0x1e5   : > { %v6074_v2 = vpop.permute.xlu1 %1052 }
 0x1e6   : > { %8771 = vst [vmem:[#allocation23_spill] sm:$0xff] %v6074_v2  ;;  %v6076_v3 = vpop.permute.xlu0 %1050 }
 0x1e7   : > { %8772 = vst [vmem:[#allocation24_spill] sm:$0xff] %v6076_v3  ;;  %1232 = vrot.lane.b32.xlu1 %v5210_v4, %s4730_s20  ;;  %v8779_v4 = vld [vmem:[#allocation32_spill] sm:$0xff] }
 0x1e8   : > { %1230 = vrot.lane.b32.xlu0 %v8773_v51, %s4730_s20 }
 0x1e9   : > { %v6082_v18 = vpop.permute.xlu1 %1056 }
 0x1ea   : > { %8774 = vst [vmem:[#allocation25_spill] sm:$0xff] %v6082_v18  ;;  %v6084_v57 = vpop.permute.xlu0 %1054 }
 0x1eb   : > { %8775 = vst [vmem:[#allocation29_spill] sm:$0xff] %v6084_v57  ;;  %1236 = vrot.lane.b32.xlu1 %v5223_v52, %s4730_s20  ;;  %v8782_v57 = vld [vmem:[#allocation33_spill] sm:$0xff]  ;;  %v8783_v52 = vld [vmem:[#allocation34_spill] sm:$0xff] }
 0x1ec   : > { %1234 = vrot.lane.b32.xlu0 %v8776_v6, %s4730_s20 }
 0x1ed   : > { %v6090_v1 = vpop.permute.xlu1 %1060 }
 0x1ee   : > { %8777 = vst [vmem:[#allocation30_spill] sm:$0xff] %v6090_v1  ;;  %v6092_v5 = vpop.permute.xlu0 %1058 }
 0x1ef   : > { %8778 = vst [vmem:[#allocation31_spill] sm:$0xff] %v6092_v5  ;;  %1240 = vrot.lane.b32.xlu1 %v5236_v10, %s4730_s20  ;;  %v8786_v10 = vld [vmem:[#allocation35_spill] sm:$0xff] }
 0x1f0   : > { %1238 = vrot.lane.b32.xlu0 %v8779_v4, %s4730_s20 }
 0x1f1   : > { %v6098_v51 = vpop.permute.xlu1 %1064 }
 0x1f2   : > { %8780 = vst [vmem:[#allocation32_spill] sm:$0xff] %v6098_v51  ;;  %v6100_v18 = vpop.permute.xlu0 %1062 }
 0x1f3   : > { %8781 = vst [vmem:[#allocation155_spill] sm:$0xff] %v6100_v18  ;;  %1244 = vrot.lane.b32.xlu1 %v8782_v57, %s4730_s20  ;;  %v8789_v57 = vld [vmem:[#allocation37_spill] sm:$0xff] }
 0x1f4   : > { %1242 = vrot.lane.b32.xlu0 %v8783_v52, %s4730_s20 }
 0x1f5   : > { %v6106_v6 = vpop.permute.xlu1 %1068 }
 0x1f6   : > { %8784 = vst [vmem:[#allocation33_spill] sm:$0xff] %v6106_v6  ;;  %v6108_v1 = vpop.permute.xlu0 %1066 }
 0x1f7   : > { %8785 = vst [vmem:[#allocation34_spill] sm:$0xff] %v6108_v1  ;;  %1248 = vrot.lane.b32.xlu1 %v5262_v41, %s4730_s20  ;;  %v8792_v41 = vld [vmem:[#allocation38_spill] sm:$0xff] }
 0x1f8   : > { %1246 = vrot.lane.b32.xlu0 %v8786_v10, %s4730_s20 }
 0x1f9   : > { %v6114_v4 = vpop.permute.xlu1 %1072 }
 0x1fa   : > { %8787 = vst [vmem:[#allocation35_spill] sm:$0xff] %v6114_v4  ;;  %v6116_v51 = vpop.permute.xlu0 %1070 }
 0x1fb   : > { %8788 = vst [vmem:[#allocation156_spill] sm:$0xff] %v6116_v51  ;;  %1252 = vrot.lane.b32.xlu1 %v8698_v21, %s4730_s20  ;;  %v8795_v51 = vld [vmem:[#allocation39_spill] sm:$0xff] }
 0x1fc   : > { %1250 = vrot.lane.b32.xlu0 %v8789_v57, %s4730_s20 }
 0x1fd   : > { %v6122_v52 = vpop.permute.xlu1 %1076 }
 0x1fe   : > { %8790 = vst [vmem:[#allocation37_spill] sm:$0xff] %v6122_v52  ;;  %v6124_v6 = vpop.permute.xlu0 %1074 }
 0x1ff   : > { %8791 = vst [vmem:[#allocation157_spill] sm:$0xff] %v6124_v6  ;;  %1256 = vrot.lane.b32.xlu1 %v5288_v23, %s4730_s20  ;;  %v8798_v23 = vld [vmem:[#allocation44_spill] sm:$0xff] }
 0x200   : > { %1254 = vrot.lane.b32.xlu0 %v8792_v41, %s4730_s20 }
 0x201   : > { %v6130_v10 = vpop.permute.xlu1 %1080 }
 0x202   : > { %8793 = vst [vmem:[#allocation38_spill] sm:$0xff] %v6130_v10  ;;  %v6132_v4 = vpop.permute.xlu0 %1078 }
 0x203   : > { %8794 = vst [vmem:[#allocation158_spill] sm:$0xff] %v6132_v4  ;;  %1260 = vrot.lane.b32.xlu1 %v8795_v51, %s4730_s20  ;;  %v538_v51 = vrot.slane %v5880_v60, 2 }
 0x204   : > { %1258 = vrot.lane.b32.xlu0 %v8705_v39, %s4730_s20  ;;  %v540_v39 = vrot.slane %v6012_v56, 2 }
 0x205   : > { %v6138_v21 = vpop.permute.xlu1 %1084 }
 0x206   : > { %8796 = vst [vmem:[#allocation39_spill] sm:$0xff] %v6138_v21  ;;  %v6140_v57 = vpop.permute.xlu0 %1082 }
 0x207   : > { %8797 = vst [vmem:[#allocation159_spill] sm:$0xff] %v6140_v57  ;;  %1264 = vrot.lane.b32.xlu1 %v5318_v35, %s4730_s20  ;;  %v537_v57 = vrot.slane %v5885_v59, 2 }
 0x208   : > { %1262 = vrot.lane.b32.xlu0 %v8798_v23, %s4730_s20 }
 0x209   : > { %v6146_v41 = vpop.permute.xlu1 %1120 }
 0x20a   : > { %v6148_v10 = vpop.permute.xlu0 %1118 }
 0x20b   : > { %1268 = vrot.lane.b32.xlu1 %v5335_v58, %s4730_s20  ;;  %v541_v58 = vsel %vm435_vm1, %v538_v51, %v540_v39 }
 0x20c   : > { %1266 = vrot.lane.b32.xlu0 %v5340_v44, %s4730_s20  ;;  %v539_v44 = vsel %vm435_vm1, %v537_v57, %v538_v51  ;;  %vm3694_vm1 = vcmask 588800  }
 0x20d   : > { %v6157_v35 = vpop.permute.xlu1 %1124 }
 0x20e   : > { %v6159_v21 = vpop.permute.xlu0 %1122 }
 0x20f   : > { %1272 = vrot.lane.b32.xlu1 %v5746_v47, %s4730_s20  ;;  %v4369_v47 = vld [vmem:[%s8421_s5] ss:$0 sm:$0xff] }
 0x210   : > { %1270 = vrot.lane.b32.xlu0 %v5751_v63, %s4730_s20 }
 0x211   : > { %v6166_v60 = vpop.permute.xlu1 %1128 }
 0x212   : > { %v6169_v23 = vpop.permute.xlu0 %1126 }
 0x213   : > { %1276 = vrot.lane.b32.xlu1 %v541_v58, %s4730_s20 }
 0x214   : > { %1274 = vrot.lane.b32.xlu0 %v539_v44, %s4730_s20 }
 0x215   : > { %v6173_v59 = vpop.permute.xlu1 %1132 }
 0x216   : > { %v6178_v56 = vpop.permute.xlu0 %1130 }
 0x218   : > { %1982 = vrot.lane.b32.xlu0 %v4369_v47, %s4724_s28 }
 0x219   : > { %v6181_v63 = vpop.permute.xlu1 %1136 }
 0x21a   : > { %v6183_v39 = vpop.permute.xlu0 %1134 }
 0x21d   : > { %v6185_v57 = vpop.permute.xlu1 %1140 }
 0x21e   : > { %v6187_v51 = vpop.permute.xlu0 %1138 }
 0x221   : > { %v6189_v58 = vpop.permute.xlu1 %1144 }
 0x222   : > { %8799 = vst [vmem:[#allocation44_spill] sm:$0xff] %v6189_v58  ;;  %v6191_v44 = vpop.permute.xlu0 %1142  ;;  %v8824_v58 = vld [vmem:[#allocation106_spill] sm:$0xff] }
 0x223   : > { %8800 = vst [vmem:[#allocation160_spill] sm:$0xff] %v6191_v44 }
 0x225   : > { %v6193_v4 = vpop.permute.xlu1 %1148 }
 0x226   : > { %8801 = vst [vmem:[#allocation161_spill] sm:$0xff] %v6193_v4  ;;  %v6195_v6 = vpop.permute.xlu0 %1146 }
 0x227   : > { %8802 = vst [vmem:[#allocation162_spill] sm:$0xff] %v6195_v6 }
 0x229   : > { %v6197_v52 = vpop.permute.xlu1 %1152 }
 0x22a   : > { %8803 = vst [vmem:[#allocation163_spill] sm:$0xff] %v6197_v52  ;;  %v6199_v1 = vpop.permute.xlu0 %1150 }
 0x22b   : > { %8804 = vst [vmem:[#allocation164_spill] sm:$0xff] %v6199_v1 }
 0x22d   : > { %v6201_v47 = vpop.permute.xlu1 %1156 }
 0x22e   : > { %8805 = vst [vmem:[#allocation165_spill] sm:$0xff] %v6201_v47  ;;  %v6203_v18 = vpop.permute.xlu0 %1154  ;;  %v8819_v47 = vld [vmem:[#allocation74_spill] sm:$0xff] }
 0x22f   : > { %8806 = vst [vmem:[#allocation166_spill] sm:$0xff] %v6203_v18 }
 0x231   : > { %v6205_v5 = vpop.permute.xlu1 %1160 }
 0x232   : > { %8807 = vst [vmem:[#allocation167_spill] sm:$0xff] %v6205_v5  ;;  %v6207_v3 = vpop.permute.xlu0 %1158 }
 0x233   : > { %8808 = vst [vmem:[#allocation168_spill] sm:$0xff] %v6207_v3  ;;  %v4665_v3 = vld [vmem:[%s4786_s26 + $0x8] sm:$0xff] }
 0x235   : > { %v6209_v2 = vpop.permute.xlu1 %1164 }
 0x236   : > { %8809 = vst [vmem:[#allocation169_spill] sm:$0xff] %v6209_v2  ;;  %v6211_v62 = vpop.permute.xlu0 %1162  ;;  %v8817_v2 = vld [vmem:[#allocation45_spill] sm:$0xff] }
 0x237   : > { %8810 = vst [vmem:[#allocation170_spill] sm:$0xff] %v6211_v62  ;;  %v1312_v62 = vsel %vm1310_vm3, %v4665_v3, %v8817_v2  ;;  %v4667_v2 = vld [vmem:[%s4786_s26 + $0x18] sm:$0xff] }
 0x238   : > { %v8823_v3 = vld [vmem:[#allocation40_spill] sm:$0xff] }
 0x239   : > { %v6213_v4 = vpop.permute.xlu1 %1168  ;;  %v1313_v22 = vsel %vm1310_vm3, %v4667_v2, %v8823_v3  ;;  %v8828_v2 = vld [vmem:[#allocation76_spill] sm:$0xff] }
 0x23a   : > { %8811 = vst [vmem:[#allocation171_spill] sm:$0xff] %v6213_v4  ;;  %v6215_v6 = vpop.permute.xlu0 %1166  ;;  %v4666_v4 = vld [vmem:[%s4786_s26] sm:$0xff] }
 0x23b   : > { %8812 = vst [vmem:[#allocation172_spill] sm:$0xff] %v6215_v6  ;;  %v8818_v6 = vld [vmem:[#allocation42_spill] sm:$0xff] }
 0x23d   : > { %v6217_v52 = vpop.permute.xlu1 %1172 }
 0x23e   : > { %8813 = vst [vmem:[#allocation173_spill] sm:$0xff] %v6217_v52  ;;  %v6219_v1 = vpop.permute.xlu0 %1170  ;;  %v1311_v52 = vsel %vm1310_vm3, %v4666_v4, %v8818_v6  ;;  %v8825_v4 = vld [vmem:[#allocation41_spill] sm:$0xff] }
 0x23f   : > { %8814 = vst [vmem:[#allocation174_spill] sm:$0xff] %v6219_v1  ;;  %v1345_v1 = vsel %vm1343_vm4, %v1312_v62, %v8819_v47 }
 0x241   : > { %v6221_v18 = vpop.permute.xlu1 %1176 }
 0x242   : > { %8815 = vst [vmem:[#allocation175_spill] sm:$0xff] %v6221_v18  ;;  %v6223_v5 = vpop.permute.xlu0 %1174  ;;  %v1344_v18 = vsel %vm1343_vm4, %v1311_v52, %v8820_v17  ;;  %v4668_v17 = vld [vmem:[%s4786_s26 + $0x20] sm:$0xff]  ;;  %v8826_v52 = vld [vmem:[#allocation43_spill] sm:$0xff] }
 0x243   : > { %8816 = vst [vmem:[#allocation176_spill] sm:$0xff] %v6223_v5  ;;  %v1378_v5 = vsel %vm1376_vm5, %v1345_v1, %v8821_v24  ;;  %v1377_v6 = vsel %vm1376_vm5, %v1344_v18, %v8824_v58  ;;  %v1314_v24 = vsel %vm1310_vm3, %v4668_v17, %v8826_v52  ;;  %v8827_v1 = vld [vmem:[#allocation133_spill] sm:$0xff]  ;;  %v8830_v17 = vld [vmem:[#allocation107_spill] sm:$0xff] }
 0x244   : > { %v1411_v62 = vsel %vm1409_vm6, %v1378_v5, %v8825_v4  ;;  %v1347_v18 = vsel %vm1343_vm4, %v1314_v24, %v8828_v2  ;;  %v8829_v58 = vld [vmem:[#allocation77_spill] sm:$0xff]  ;;  %v8831_v24 = vld [vmem:[#allocation108_spill] sm:$0xff] }
 0x245   : > { %v6237_v44 = vpop.permute.xlu1 %1180  ;;  %v1444_v14 = vsel %vm1442_vm7, %v1411_v62, %v5863_v50  ;;  %v1346_v5 = vsel %vm1343_vm4, %v1313_v22, %v8829_v58  ;;  %v4669_v2 = vld [vmem:[%s4786_s26 + $0x38] sm:$0xff]  ;;  %v8834_v58 = vld [vmem:[#allocation135_spill] sm:$0xff] }
 0x246   : > { %8822 = vst [vmem:[#allocation45_spill] sm:$0xff] %v6237_v44  ;;  %v6246_v47 = vpop.permute.xlu0 %1178  ;;  %v1410_v44 = vsel %vm1409_vm6, %v1377_v6, %v8827_v1  ;;  %v1477_v4 = vsel %vm1475_vm8, %v1444_v14, %v6009_v54  ;;  %v1380_v6 = vsel %vm1376_vm5, %v1347_v18, %v8830_v17  ;;  %v1379_v22 = vsel %vm1376_vm5, %v1346_v5, %v8831_v24  ;;  %v8832_v1 = vld [vmem:[#allocation134_spill] sm:$0xff]  ;;  %v8835_v17 = vld [vmem:[#allocation47_spill] sm:$0xff] }
 0x247   : > { %v1443_v3 = vsel %vm1442_vm7, %v1410_v44, %v5865_v26  ;;  %v1510_v62 = vsel %vm1508_vm9, %v1477_v4, %v6146_v41  ;;  %v1413_v26 = vsel %vm1409_vm6, %v1380_v6, %v8832_v1  ;;  %v8833_v18 = vld [vmem:[#allocation46_spill] sm:$0xff]  ;;  %v1412_v41 = vsel %vm1409_vm6, %v1379_v22, %v8834_v58  ;;  %v4670_v4 = vld [vmem:[%s4786_s26 + $0x30] sm:$0xff] }
 0x248   : > { %v1476_v50 = vsel %vm1475_vm8, %v1443_v3, %v6014_v25  ;;  %v1316_v25 = vsel %vm1310_vm3, %v4669_v2, %v8833_v18  ;;  %v1446_v3 = vsel %vm1442_vm7, %v1413_v26, %v5871_v20  ;;  %v1315_v6 = vsel %vm1310_vm3, %v4670_v4, %v8835_v17  ;;  %v8837_v24 = vld [vmem:[#allocation79_spill] sm:$0xff]  ;;  %v8838_v22 = vld [vmem:[#allocation26_spill] sm:$0xff] }
 0x249   : > { %v1217_v52 = vpop.permute.xlu1 %1216  ;;  %v1509_v54 = vsel %vm1508_vm9, %v1476_v50, %v6148_v10  ;;  %v8836_v10 = vld [vmem:[#allocation78_spill] sm:$0xff]  ;;  %v1348_v20 = vsel %vm1343_vm4, %v1315_v6, %v8837_v24 }
 0x24a   : > { %v1543_v14 = vsel %vm1541_vm10, %v1510_v62, %v1217_v52  ;;  %v1215_v44 = vpop.permute.xlu0 %1214  ;;  %v1349_v50 = vsel %vm1343_vm4, %v1316_v25, %v8836_v10  ;;  %v1445_v62 = vsel %vm1442_vm7, %v1412_v41, %v5873_v13  ;;  %v1479_v52 = vsel %vm1475_vm8, %v1446_v3, %v6026_v33  ;;  %v4671_v41 = vld [vmem:[%s4786_s26 + $0x50] sm:$0xff]  ;;  %v4672_v4 = vld [vmem:[%s4786_s26 + $0x48] sm:$0xff] }
 0x24b   : > { %v1542_v5 = vsel %vm1541_vm10, %v1509_v54, %v1215_v44  ;;  %v1382_v1 = vsel %vm1376_vm5, %v1349_v50, %v8838_v22  ;;  %v1478_v26 = vsel %vm1475_vm8, %v1445_v62, %v6028_v48  ;;  %v1512_v54 = vsel %vm1508_vm9, %v1479_v52, %v6157_v35  ;;  %v8839_v44 = vld [vmem:[#allocation109_spill] sm:$0xff]  ;;  %v8840_v48 = vld [vmem:[#allocation48_spill] sm:$0xff]  ;;  %v8844_v62 = vld [vmem:[#allocation110_spill] sm:$0xff] }
 0x24c   : > { %4494 = vmatprep.mubr.msk.f32.mxu0 %vm1579_vm11, %v1542_v5  ;;  %v1381_v33 = vsel %vm1376_vm5, %v1348_v20, %v8839_v44  ;;  %v1415_v2 = vsel %vm1409_vm6, %v1382_v1, %v5748_v7  ;;  %v1511_v18 = vsel %vm1508_vm9, %v1478_v26, %v6159_v21  ;;  %v1318_v3 = vsel %vm1310_vm3, %v4671_v41, %v8840_v48  ;;  %v8841_v7 = vld [vmem:[#allocation49_spill] sm:$0xff]  ;;  %v8842_v21 = vld [vmem:[#allocation80_spill] sm:$0xff]  ;;  %v8845_v22 = vld [vmem:[#allocation111_spill] sm:$0xff] }
 0x24d   : > { %4495 = vmatmul.mubr.msk.f32.vlgmr.msra.gmra.mrb[0].mxu0 %vm1579_vm11, %v1543_v14  ;;  %v1221_v13 = vpop.permute.xlu1 %1220  ;;  %v1414_v35 = vsel %vm1409_vm6, %v1381_v33, %v5753_v29  ;;  %v1448_v14 = vsel %vm1442_vm7, %v1415_v2, %v5882_v42  ;;  %v1317_v17 = vsel %vm1310_vm3, %v4672_v4, %v8841_v7  ;;  %v1351_v6 = vsel %vm1343_vm4, %v1318_v3, %v8842_v21  ;;  %v8843_v29 = vld [vmem:[#allocation81_spill] sm:$0xff]  ;;  %v4673_v44 = vld [vmem:[%s4786_s26 + $0x68] sm:$0xff] }
 0x24e   : > { %v1545_v25 = vsel %vm1541_vm10, %v1512_v54, %v1221_v13  ;;  %v1219_v58 = vpop.permute.xlu0 %1218  ;;  %v1447_v10 = vsel %vm1442_vm7, %v1414_v35, %v5887_v49  ;;  %v1481_v50 = vsel %vm1475_vm8, %v1448_v14, %v6035_v40  ;;  %v1350_v42 = vsel %vm1343_vm4, %v1317_v17, %v8843_v29  ;;  %v8850_v14 = vld [vmem:[#allocation83_spill] sm:$0xff]  ;;  %v8852_v21 = vld [vmem:[#allocation113_spill] sm:$0xff] }
 0x24f   : > { %v1544_v5 = vsel %vm1541_vm10, %v1511_v18, %v1219_v58  ;;  %v1384_v52 = vsel %vm1376_vm5, %v1351_v6, %v8844_v62  ;;  %v1480_v24 = vsel %vm1475_vm8, %v1447_v10, %v6038_v32  ;;  %v1514_v20 = vsel %vm1508_vm9, %v1481_v50, %v6166_v60  ;;  %v8846_v32 = vld [vmem:[#allocation50_spill] sm:$0xff]  ;;  %v8847_v60 = vld [vmem:[#allocation136_spill] sm:$0xff]  ;;  %v4674_v58 = vld [vmem:[%s4786_s26 + $0x60] sm:$0xff] }
 0x250   : > { %4497 = vmatprep.mubr.msk.f32.mxu0 %vm1579_vm11, %v1544_v5  ;;  %v1383_v40 = vsel %vm1376_vm5, %v1350_v42, %v8845_v22  ;;  %v1417_v1 = vsel %vm1409_vm6, %v1384_v52, %v5759_v45  ;;  %v1513_v26 = vsel %vm1508_vm9, %v1480_v24, %v6169_v23  ;;  %v1320_v33 = vsel %vm1310_vm3, %v4673_v44, %v8846_v32  ;;  %v8848_v45 = vld [vmem:[#allocation51_spill] sm:$0xff]  ;;  %v8849_v23 = vld [vmem:[#allocation82_spill] sm:$0xff]  ;;  %v8851_v5 = vld [vmem:[#allocation112_spill] sm:$0xff] }
 0x251   : > { %4498 = vmatmul.mubr.msk.f32.gmra.mrb[2].mxu0 %vm1579_vm11, %v1545_v25  ;;  %v1225_v49 = vpop.permute.xlu1 %1224  ;;  %v1416_v2 = vsel %vm1409_vm6, %v1383_v40, %v8847_v60  ;;  %v1450_v18 = vsel %vm1442_vm7, %v1417_v1, %v5893_v8  ;;  %v1319_v41 = vsel %vm1310_vm3, %v4674_v58, %v8848_v45  ;;  %v1353_v48 = vsel %vm1343_vm4, %v1320_v33, %v8849_v23  ;;  %v4675_v42 = vld [vmem:[%s4786_s26 + $0x80] sm:$0xff]  ;;  %v8858_v32 = vld [vmem:[#allocation115_spill] sm:$0xff] }
 0x252   : > { %v1547_v54 = vsel %vm1541_vm10, %v1514_v20, %v1225_v49  ;;  %v1223_v13 = vpop.permute.xlu0 %1222  ;;  %v1449_v3 = vsel %vm1442_vm7, %v1416_v2, %v5895_v0  ;;  %v1483_v35 = vsel %vm1475_vm8, %v1450_v18, %v6042_v19  ;;  %v1352_v8 = vsel %vm1343_vm4, %v1319_v41, %v8850_v14  ;;  %v4676_v20 = vld [vmem:[%s4786_s26 + $0x78] sm:$0xff]  ;;  %v4678_v23 = vld [vmem:[%s4786_s26 + $0x90] sm:$0xff] }
 0x253   : > { %v1546_v25 = vsel %vm1541_vm10, %v1513_v26, %v1223_v13  ;;  %v1386_v4 = vsel %vm1376_vm5, %v1353_v48, %v8851_v5  ;;  %v1482_v7 = vsel %vm1475_vm8, %v1449_v3, %v6044_v30  ;;  %v1516_v17 = vsel %vm1508_vm9, %v1483_v35, %v6173_v59  ;;  %v8853_v30 = vld [vmem:[#allocation52_spill] sm:$0xff]  ;;  %v8857_v26 = vld [vmem:[#allocation114_spill] sm:$0xff] }
 0x254   : > { %4500 = vmatprep.mubr.msk.f32.mxu0 %vm1579_vm11, %v1546_v25  ;;  %v1385_v19 = vsel %vm1376_vm5, %v1352_v8, %v8852_v21  ;;  %v1419_v6 = vsel %vm1409_vm6, %v1386_v4, %v5767_v12  ;;  %v1515_v10 = vsel %vm1508_vm9, %v1482_v7, %v6178_v56  ;;  %v1322_v62 = vsel %vm1310_vm3, %v4675_v42, %v8853_v30  ;;  %v8854_v12 = vld [vmem:[#allocation53_spill] sm:$0xff]  ;;  %v8855_v56 = vld [vmem:[#allocation84_spill] sm:$0xff]  ;;  %v8863_v8 = vld [vmem:[#allocation27_spill] sm:$0xff] }
 0x255   : > { %4501 = vmatmul.mubr.msk.f32.gmra.mrb[4].mxu0 %vm1579_vm11, %v1547_v54  ;;  %v1229_v0 = vpop.permute.xlu1 %1228  ;;  %v1418_v59 = vsel %vm1409_vm6, %v1385_v19, %v5769_v27  ;;  %v1452_v52 = vsel %vm1442_vm7, %v1419_v6, %v5901_v55  ;;  %v1321_v49 = vsel %vm1310_vm3, %v4676_v20, %v8854_v12  ;;  %v1355_v22 = vsel %vm1343_vm4, %v1322_v62, %v8855_v56  ;;  %v8856_v27 = vld [vmem:[#allocation85_spill] sm:$0xff]  ;;  %v4677_v25 = vld [vmem:[%s4786_s26 + $0x98] sm:$0xff]  ;;  %v4680_v30 = vld [vmem:[%s4786_s26 + $0xa8] sm:$0xff] }
 0x256   : > { %v1549_v50 = vsel %vm1541_vm10, %v1516_v17, %v1229_v0  ;;  %v1227_v29 = vpop.permute.xlu0 %1226  ;;  %v1451_v40 = vsel %vm1442_vm7, %v1418_v59, %v5903_v53  ;;  %v1485_v1 = vsel %vm1475_vm8, %v1452_v52, %v6050_v9  ;;  %v1354_v55 = vsel %vm1343_vm4, %v1321_v49, %v8856_v27  ;;  %v8864_v17 = vld [vmem:[#allocation116_spill] sm:$0xff]  ;;  %v8870_v49 = vld [vmem:[#allocation22_spill] sm:$0xff]  ;;  %v8873_v27 = vld [vmem:[#allocation137_spill] sm:$0xff] }
 0x257   : > { %v1548_v24 = vsel %vm1541_vm10, %v1515_v10, %v1227_v29  ;;  %v1388_v54 = vsel %vm1376_vm5, %v1355_v22, %v8857_v26  ;;  %v1484_v13 = vsel %vm1475_vm8, %v1451_v40, %v6052_v61  ;;  %v1518_v44 = vsel %vm1508_vm9, %v1485_v1, %v6181_v63  ;;  %v8859_v61 = vld [vmem:[#allocation54_spill] sm:$0xff]  ;;  %v4679_v10 = vld [vmem:[%s4786_s26 + $0xb0] sm:$0xff]  ;;  %v8869_v20 = vld [vmem:[#allocation28_spill] sm:$0xff] }
 0x258   : > { %4503 = vmatprep.mubr.msk.f32.mxu0 %vm1579_vm11, %v1548_v24  ;;  %v1387_v9 = vsel %vm1376_vm5, %v1354_v55, %v8858_v32  ;;  %v1421_v33 = vsel %vm1409_vm6, %v1388_v54, %v5775_v36  ;;  %v1517_v60 = vsel %vm1508_vm9, %v1484_v13, %v6183_v39  ;;  %v1324_v58 = vsel %vm1310_vm3, %v4677_v25, %v8859_v61  ;;  %v8860_v36 = vld [vmem:[#allocation55_spill] sm:$0xff]  ;;  %v8871_v22 = vld [vmem:[#allocation44_spill] sm:$0xff]  ;;  %v8872_v1 = vld [vmem:[#allocation117_spill] sm:$0xff] }
 0x259   : > { %4504 = vmatmul.mubr.msk.f32.gmra.mrb[6].mxu0 %vm1579_vm11, %v1549_v50  ;;  %v1233_v53 = vpop.permute.xlu1 %1232  ;;  %v1420_v63 = vsel %vm1409_vm6, %v1387_v9, %v5777_v31  ;;  %v1454_v45 = vsel %vm1442_vm7, %v1421_v33, %v5909_v37  ;;  %v1323_v48 = vsel %vm1310_vm3, %v4678_v23, %v8860_v36  ;;  %v8861_v39 = vld [vmem:[#allocation3_spill] sm:$0xff]  ;;  %v8862_v31 = vld [vmem:[#allocation86_spill] sm:$0xff]  ;;  %v8874_v26 = vld [vmem:[#allocation160_spill] sm:$0xff] }
 0x25a   : > { %v1551_v2 = vsel %vm1541_vm10, %v1518_v44, %v1233_v53  ;;  %v1231_v18 = vpop.permute.xlu0 %1230  ;;  %v1357_v3 = vsel %vm1343_vm4, %v1324_v58, %v8861_v39  ;;  %v1453_v35 = vsel %vm1442_vm7, %v1420_v63, %v5911_v34  ;;  %v1487_v14 = vsel %vm1475_vm8, %v1454_v45, %v6058_v46  ;;  %v4681_v53 = vld [vmem:[%s4786_s26 + $0xc8] sm:$0xff]  ;;  %v4682_v61 = vld [vmem:[%s4786_s26 + $0xc0] sm:$0xff]  ;;  %v8878_v58 = vld [vmem:[#allocation59_spill] sm:$0xff] }
 0x25b   : > { %v1550_v41 = vsel %vm1541_vm10, %v1517_v60, %v1231_v18  ;;  %v1356_v37 = vsel %vm1343_vm4, %v1323_v48, %v8862_v31  ;;  %v1390_v5 = vsel %vm1376_vm5, %v1357_v3, %v8863_v8  ;;  %v1486_v4 = vsel %vm1475_vm8, %v1453_v35, %v6060_v38  ;;  %v8865_v38 = vld [vmem:[#allocation56_spill] sm:$0xff]  ;;  %v8875_v32 = vld [vmem:[#allocation58_spill] sm:$0xff]  ;;  %v8879_v45 = vld [vmem:[#allocation89_spill] sm:$0xff] }
 0x25c   : > { %4506 = vmatprep.mubr.msk.f32.mxu0 %vm1579_vm11, %v1550_v41  ;;  %v1520_v7 = vsel %vm1508_vm9, %v1487_v14, %v6185_v57  ;;  %v1389_v46 = vsel %vm1376_vm5, %v1356_v37, %v8864_v17  ;;  %v1423_v0 = vsel %vm1409_vm6, %v1390_v5, %v5783_v11  ;;  %v1519_v21 = vsel %vm1508_vm9, %v1486_v4, %v6187_v51  ;;  %v8866_v11 = vld [vmem:[#allocation57_spill] sm:$0xff]  ;;  %v8867_v51 = vld [vmem:[#allocation87_spill] sm:$0xff]  ;;  %v8876_v33 = vld [vmem:[#allocation138_spill] sm:$0xff] }
 0x25d   : > { %4507 = vmatmul.mubr.msk.f32.gmra.mrb[8].mxu0 %vm1579_vm11, %v1551_v2  ;;  %v1237_v34 = vpop.permute.xlu1 %1236  ;;  %v1326_v50 = vsel %vm1310_vm3, %v4679_v10, %v8865_v38  ;;  %v1422_v57 = vsel %vm1409_vm6, %v1389_v46, %v5785_v15  ;;  %v1456_v29 = vsel %vm1442_vm7, %v1423_v0, %v5917_v28  ;;  %v1325_v62 = vsel %vm1310_vm3, %v4680_v30, %v8866_v11  ;;  %v8868_v15 = vld [vmem:[#allocation88_spill] sm:$0xff]  ;;  %v8880_v23 = vld [vmem:[#allocation5_spill] sm:$0xff]  ;;  %v8881_v48 = vld [vmem:[#allocation23_spill] sm:$0xff] }
 0x25e   : > { %v1553_v19 = vsel %vm1541_vm10, %v1520_v7, %v1237_v34  ;;  %v1235_v6 = vpop.permute.xlu0 %1234  ;;  %v1359_v59 = vsel %vm1343_vm4, %v1326_v50, %v8867_v51  ;;  %v1455_v52 = vsel %vm1442_vm7, %v1422_v57, %v5919_v16  ;;  %v1489_v24 = vsel %vm1475_vm8, %v1456_v29, %v6066_v43  ;;  %v8877_v2 = vld [vmem:[#allocation4_spill] sm:$0xff]  ;;  %v8882_v3 = vld [vmem:[#allocation90_spill] sm:$0xff]  ;;  %v8885_v5 = vld [vmem:[#allocation161_spill] sm:$0xff] }
 0x25f   : > { %v1552_v42 = vsel %vm1541_vm10, %v1519_v21, %v1235_v6  ;;  %v1358_v28 = vsel %vm1343_vm4, %v1325_v62, %v8868_v15  ;;  %v1392_v12 = vsel %vm1376_vm5, %v1359_v59, %v8869_v20  ;;  %v1488_v56 = vsel %vm1475_vm8, %v1455_v52, %v8870_v49  ;;  %v8883_v14 = vld [vmem:[#allocation118_spill] sm:$0xff]  ;;  %v8884_v37 = vld [vmem:[#allocation24_spill] sm:$0xff]  ;;  %v8886_v34 = vld [vmem:[#allocation119_spill] sm:$0xff] }
 0x260   : > { %4509 = vmatprep.mubr.msk.f32.mxu0 %vm1579_vm11, %v1552_v42  ;;  %v1522_v40 = vsel %vm1508_vm9, %v1489_v24, %v8871_v22  ;;  %v1391_v43 = vsel %vm1376_vm5, %v1358_v28, %v8872_v1  ;;  %v1425_v55 = vsel %vm1409_vm6, %v1392_v12, %v8873_v27  ;;  %v1521_v54 = vsel %vm1508_vm9, %v1488_v56, %v8874_v26  ;;  %v8887_v46 = vld [vmem:[#allocation139_spill] sm:$0xff]  ;;  %v8888_v21 = vld [vmem:[#allocation162_spill] sm:$0xff]  ;;  %v4683_v38 = vld [vmem:[%s4786_s26 + $0xe0] sm:$0xff] }
 0x261   : > { %4510 = vmatmul.mubr.msk.f32.gmra.mrb[10].mxu0 %vm1579_vm11, %v1553_v19  ;;  %v1241_v16 = vpop.permute.xlu1 %1240  ;;  %v1328_v9 = vsel %vm1310_vm3, %v4681_v53, %v8875_v32  ;;  %v1424_v60 = vsel %vm1409_vm6, %v1391_v43, %v8876_v33  ;;  %v1458_v18 = vsel %vm1442_vm7, %v1425_v55, %v8877_v2  ;;  %v1327_v63 = vsel %vm1310_vm3, %v4682_v61, %v8878_v58  ;;  %v8889_v50 = vld [vmem:[#allocation60_spill] sm:$0xff]  ;;  %v8891_v30 = vld [vmem:[#allocation6_spill] sm:$0xff]  ;;  %v8892_v59 = vld [vmem:[#allocation61_spill] sm:$0xff] }
 0x262   : > { %v1555_v13 = vsel %vm1541_vm10, %v1522_v40, %v1241_v16  ;;  %v1239_v44 = vpop.permute.xlu0 %1238  ;;  %v1361_v41 = vsel %vm1343_vm4, %v1328_v9, %v8879_v45  ;;  %v1457_v36 = vsel %vm1442_vm7, %v1424_v60, %v8880_v23  ;;  %v1491_v39 = vsel %vm1475_vm8, %v1458_v18, %v8881_v48  ;;  %v8890_v29 = vld [vmem:[#allocation140_spill] sm:$0xff]  ;;  %v8893_v24 = vld [vmem:[#allocation91_spill] sm:$0xff]  ;;  %v8895_v12 = vld [vmem:[#allocation25_spill] sm:$0xff] }
 0x263   : > { %v1554_v25 = vsel %vm1541_vm10, %v1521_v54, %v1239_v44  ;;  %v1360_v35 = vsel %vm1343_vm4, %v1327_v63, %v8882_v3  ;;  %v1394_v31 = vsel %vm1376_vm5, %v1361_v41, %v8883_v14  ;;  %v1490_v8 = vsel %vm1475_vm8, %v1457_v36, %v8884_v37  ;;  %v4684_v51 = vld [vmem:[%s4786_s26 + $0xd8] sm:$0xff]  ;;  %v8894_v28 = vld [vmem:[#allocation7_spill] sm:$0xff]  ;;  %v8898_v1 = vld [vmem:[#allocation29_spill] sm:$0xff] }
 0x264   : > { %4512 = vmatprep.mubr.msk.f32.mxu0 %vm1579_vm11, %v1554_v25  ;;  %v1524_v4 = vsel %vm1508_vm9, %v1491_v39, %v8885_v5  ;;  %v1393_v17 = vsel %vm1376_vm5, %v1360_v35, %v8886_v34  ;;  %v1427_v0 = vsel %vm1409_vm6, %v1394_v31, %v8887_v46  ;;  %v1523_v19 = vsel %vm1508_vm9, %v1490_v8, %v8888_v21  ;;  %v8896_v56 = vld [vmem:[#allocation92_spill] sm:$0xff]  ;;  %v8899_v27 = vld [vmem:[#allocation163_spill] sm:$0xff]  ;;  %v8900_v54 = vld [vmem:[#allocation121_spill] sm:$0xff] }
 0x265   : > { %4513 = vmatmul.mubr.msk.f32.gmra.mrb[12].mxu0 %vm1579_vm11, %v1555_v13  ;;  %v1245_v7 = vpop.permute.xlu1 %1244  ;;  %v1330_v57 = vsel %vm1310_vm3, %v4683_v38, %v8889_v50  ;;  %v1426_v42 = vsel %vm1409_vm6, %v1393_v17, %v8890_v29  ;;  %v1460_v11 = vsel %vm1442_vm7, %v1427_v0, %v8891_v30  ;;  %v1329_v52 = vsel %vm1310_vm3, %v4684_v51, %v8892_v59  ;;  %v8897_v40 = vld [vmem:[#allocation120_spill] sm:$0xff]  ;;  %v8901_v44 = vld [vmem:[#allocation141_spill] sm:$0xff]  ;;  %v8903_v18 = vld [vmem:[#allocation62_spill] sm:$0xff] }
 0x266   : > { %v1557_v6 = vsel %vm1541_vm10, %v1524_v4, %v1245_v7  ;;  %v1243_v10 = vpop.permute.xlu0 %1242  ;;  %v1363_v15 = vsel %vm1343_vm4, %v1330_v57, %v8893_v24  ;;  %v1459_v20 = vsel %vm1442_vm7, %v1426_v42, %v8894_v28  ;;  %v1493_v49 = vsel %vm1475_vm8, %v1460_v11, %v8895_v12  ;;  %v8902_v32 = vld [vmem:[#allocation164_spill] sm:$0xff]  ;;  %v8904_v61 = vld [vmem:[#allocation142_spill] sm:$0xff]  ;;  %v4686_v23 = vld [vmem:[%s4786_s26 + $0xf0] sm:$0xff] }
 0x267   : > { %v1556_v62 = vsel %vm1541_vm10, %v1523_v19, %v1243_v10  ;;  %v1362_v22 = vsel %vm1343_vm4, %v1329_v52, %v8896_v56  ;;  %v1396_v16 = vsel %vm1376_vm5, %v1363_v15, %v8897_v40  ;;  %v1492_v43 = vsel %vm1475_vm8, %v1459_v20, %v8898_v1  ;;  %v4685_v2 = vld [vmem:[%s4786_s26 + $0xf8] sm:$0xff]  ;;  %v8906_v36 = vld [vmem:[#allocation63_spill] sm:$0xff]  ;;  %v8907_v39 = vld [vmem:[#allocation93_spill] sm:$0xff] }
 0x268   : > { %4515 = vmatprep.mubr.msk.f32.mxu0 %vm1579_vm11, %v1556_v62  ;;  %v1526_v55 = vsel %vm1508_vm9, %v1493_v49, %v8899_v27  ;;  %v1395_v13 = vsel %vm1376_vm5, %v1362_v22, %v8900_v54  ;;  %v1429_v53 = vsel %vm1409_vm6, %v1396_v16, %v8901_v44  ;;  %v1525_v9 = vsel %vm1508_vm9, %v1492_v43, %v8902_v32  ;;  %v8905_v63 = vld [vmem:[#allocation8_spill] sm:$0xff]  ;;  %v8908_v35 = vld [vmem:[#allocation9_spill] sm:$0xff]  ;;  %v8909_v31 = vld [vmem:[#allocation30_spill] sm:$0xff] }
 0x269   : > { %4516 = vmatmul.mubr.msk.f32.gmra.mrb[14].mxu0 %vm1579_vm11, %v1557_v6  ;;  %v1249_v26 = vpop.permute.xlu1 %1248  ;;  %v1332_v25 = vsel %vm1310_vm3, %v4685_v2, %v8903_v18  ;;  %v1428_v58 = vsel %vm1409_vm6, %v1395_v13, %v8904_v61  ;;  %v1462_v45 = vsel %vm1442_vm7, %v1429_v53, %v8905_v63  ;;  %v1331_v48 = vsel %vm1310_vm3, %v4686_v23, %v8906_v36  ;;  %v8910_v8 = vld [vmem:[#allocation94_spill] sm:$0xff]  ;;  %v8912_v34 = vld [vmem:[#allocation31_spill] sm:$0xff]  ;;  %v8913_v46 = vld [vmem:[#allocation165_spill] sm:$0xff] }
 0x26a   : > { %v1559_v33 = vsel %vm1541_vm10, %v1526_v55, %v1249_v26  ;;  %v1247_v60 = vpop.permute.xlu0 %1246  ;;  %v1365_v3 = vsel %vm1343_vm4, %v1332_v25, %v8907_v39  ;;  %v1461_v14 = vsel %vm1442_vm7, %v1428_v58, %v8908_v35  ;;  %v1495_v37 = vsel %vm1475_vm8, %v1462_v45, %v8909_v31  ;;  %v8911_v4 = vld [vmem:[#allocation122_spill] sm:$0xff]  ;;  %v8914_v19 = vld [vmem:[#allocation123_spill] sm:$0xff]  ;;  %v8917_v11 = vld [vmem:[#allocation64_spill] sm:$0xff] }
 0x26b   : > { %v1558_v41 = vsel %vm1541_vm10, %v1525_v9, %v1247_v60  ;;  %v1364_v5 = vsel %vm1343_vm4, %v1331_v48, %v8910_v8  ;;  %v1398_v7 = vsel %vm1376_vm5, %v1365_v3, %v8911_v4  ;;  %v1494_v17 = vsel %vm1475_vm8, %v1461_v14, %v8912_v34  ;;  %v8915_v10 = vld [vmem:[#allocation143_spill] sm:$0xff]  ;;  %v8916_v50 = vld [vmem:[#allocation166_spill] sm:$0xff]  ;;  %v8918_v51 = vld [vmem:[#allocation144_spill] sm:$0xff] }
 0x26c   : > { %4518 = vmatprep.mubr.msk.f32.mxu0 %vm1579_vm11, %v1558_v41  ;;  %v1528_v0 = vsel %vm1508_vm9, %v1495_v37, %v8913_v46  ;;  %v1397_v6 = vsel %vm1376_vm5, %v1364_v5, %v8914_v19  ;;  %v1431_v38 = vsel %vm1409_vm6, %v1398_v7, %v8915_v10  ;;  %v1527_v57 = vsel %vm1508_vm9, %v1494_v17, %v8916_v50  ;;  %v4687_v30 = vld [vmem:[%s4786_s26 + $0x110] sm:$0xff]  ;;  %v8919_v52 = vld [vmem:[#allocation10_spill] sm:$0xff]  ;;  %v8920_v20 = vld [vmem:[#allocation65_spill] sm:$0xff] }
 0x26d   : > { %4519 = vmatmul.mubr.msk.f32.gmra.mrb[16].mxu0 %vm1579_vm11, %v1559_v33  ;;  %v1253_v21 = vpop.permute.xlu1 %1252  ;;  %v1334_v62 = vsel %vm1310_vm3, %v4687_v30, %v8917_v11  ;;  %v1430_v59 = vsel %vm1409_vm6, %v1397_v6, %v8918_v51  ;;  %v1464_v24 = vsel %vm1442_vm7, %v1431_v38, %v8919_v52  ;;  %v4688_v28 = vld [vmem:[%s4786_s26 + $0x108] sm:$0xff]  ;;  %v8921_v49 = vld [vmem:[#allocation95_spill] sm:$0xff]  ;;  %v8923_v16 = vld [vmem:[#allocation32_spill] sm:$0xff] }
 0x26e   : > { %v1561_v29 = vsel %vm1541_vm10, %v1528_v0, %v1253_v21  ;;  %v1251_v42 = vpop.permute.xlu0 %1250  ;;  %v1333_v12 = vsel %vm1310_vm3, %v4688_v28, %v8920_v20  ;;  %v1367_v56 = vsel %vm1343_vm4, %v1334_v62, %v8921_v49  ;;  %v8922_v22 = vld [vmem:[#allocation11_spill] sm:$0xff]  ;;  %v1497_v1 = vsel %vm1475_vm8, %v1464_v24, %v8923_v16  ;;  %v8924_v43 = vld [vmem:[#allocation96_spill] sm:$0xff]  ;;  %v8928_v9 = vld [vmem:[#allocation125_spill] sm:$0xff] }
 0x26f   : > { %v1560_v15 = vsel %vm1541_vm10, %v1527_v57, %v1251_v42  ;;  %v1463_v40 = vsel %vm1442_vm7, %v1430_v59, %v8922_v22  ;;  %v1366_v27 = vsel %vm1343_vm4, %v1333_v12, %v8924_v43  ;;  %v8925_v55 = vld [vmem:[#allocation124_spill] sm:$0xff]  ;;  %v8926_v54 = vld [vmem:[#allocation155_spill] sm:$0xff]  ;;  %v8929_v60 = vld [vmem:[#allocation145_spill] sm:$0xff] }
 0x270   : > { %4521 = vmatprep.mubr.msk.f32.mxu0 %vm1579_vm11, %v1560_v15  ;;  %v1400_v26 = vsel %vm1376_vm5, %v1367_v56, %v8925_v55  ;;  %v1496_v13 = vsel %vm1475_vm8, %v1463_v40, %v8926_v54  ;;  %v8927_v44 = vld [vmem:[#allocation167_spill] sm:$0xff]  ;;  %v1399_v33 = vsel %vm1376_vm5, %v1366_v27, %v8928_v9  ;;  %v8930_v18 = vld [vmem:[#allocation168_spill] sm:$0xff]  ;;  %v4689_v63 = vld [vmem:[%s4786_s26 + $0x128] sm:$0xff] }
 0x271   : > { %v1530_v53 = vsel %vm1508_vm9, %v1497_v1, %v8927_v44  ;;  %4522 = vmatmul.mubr.msk.f32.gmra.mrb[18].mxu0 %vm1579_vm11, %v1561_v29  ;;  %v1257_v32 = vpop.permute.xlu1 %1256  ;;  %v1433_v2 = vsel %vm1409_vm6, %v1400_v26, %v8929_v60  ;;  %v1529_v25 = vsel %vm1508_vm9, %v1496_v13, %v8930_v18  ;;  %v8931_v45 = vld [vmem:[#allocation66_spill] sm:$0xff]  ;;  %v8933_v48 = vld [vmem:[#allocation12_spill] sm:$0xff]  ;;  %v4690_v35 = vld [vmem:[%s4786_s26 + $0x120] sm:$0xff] }
 0x272   : > { %v1563_v61 = vsel %vm1541_vm10, %v1530_v53, %v1257_v32  ;;  %v1255_v58 = vpop.permute.xlu0 %1254  ;;  %v1336_v41 = vsel %vm1310_vm3, %v4689_v63, %v8931_v45  ;;  %v8932_v23 = vld [vmem:[#allocation146_spill] sm:$0xff]  ;;  %v1466_v39 = vsel %vm1442_vm7, %v1433_v2, %v8933_v48  ;;  %v8934_v14 = vld [vmem:[#allocation67_spill] sm:$0xff]  ;;  %v8935_v37 = vld [vmem:[#allocation97_spill] sm:$0xff] }
 0x273   : > { %v1432_v36 = vsel %vm1409_vm6, %v1399_v33, %v8932_v23  ;;  %v1562_v3 = vsel %vm1541_vm10, %v1529_v25, %v1255_v58  ;;  %v1335_v31 = vsel %vm1310_vm3, %v4690_v35, %v8934_v14  ;;  %v1369_v8 = vsel %vm1343_vm4, %v1336_v41, %v8935_v37  ;;  %v8936_v5 = vld [vmem:[#allocation13_spill] sm:$0xff]  ;;  %v8938_v17 = vld [vmem:[#allocation98_spill] sm:$0xff]  ;;  %v8942_v57 = vld [vmem:[#allocation127_spill] sm:$0xff] }
 0x274   : > { %v1465_v4 = vsel %vm1442_vm7, %v1432_v36, %v8936_v5  ;;  %v8937_v7 = vld [vmem:[#allocation33_spill] sm:$0xff]  ;;  %4524 = vmatprep.mubr.msk.f32.mxu0 %vm1579_vm11, %v1562_v3  ;;  %v1368_v46 = vsel %vm1343_vm4, %v1335_v31, %v8938_v17  ;;  %v8939_v0 = vld [vmem:[#allocation126_spill] sm:$0xff]  ;;  %v8943_v42 = vld [vmem:[#allocation147_spill] sm:$0xff] }
 0x275   : > { %v1499_v34 = vsel %vm1475_vm8, %v1466_v39, %v8937_v7  ;;  %v1402_v21 = vsel %vm1376_vm5, %v1369_v8, %v8939_v0  ;;  %v8940_v19 = vld [vmem:[#allocation34_spill] sm:$0xff]  ;;  %v8941_v10 = vld [vmem:[#allocation169_spill] sm:$0xff]  ;;  %4525 = vmatmul.mubr.msk.f32.gmra.mrb[20].mxu0 %vm1579_vm11, %v1563_v61  ;;  %v1261_v50 = vpop.permute.xlu1 %1260  ;;  %v1401_v29 = vsel %vm1376_vm5, %v1368_v46, %v8942_v57  ;;  %v8945_v24 = vld [vmem:[#allocation68_spill] sm:$0xff] }
 0x276   : > { %v1498_v6 = vsel %vm1475_vm8, %v1465_v4, %v8940_v19  ;;  %v1532_v38 = vsel %vm1508_vm9, %v1499_v34, %v8941_v10  ;;  %v1435_v30 = vsel %vm1409_vm6, %v1402_v21, %v8943_v42  ;;  %v8944_v11 = vld [vmem:[#allocation170_spill] sm:$0xff]  ;;  %v1259_v59 = vpop.permute.xlu0 %1258  ;;  %v4691_v52 = vld [vmem:[%s4786_s26 + $0x140] sm:$0xff]  ;;  %v8946_v28 = vld [vmem:[#allocation148_spill] sm:$0xff] }
 0x277   : > { %v1531_v62 = vsel %vm1508_vm9, %v1498_v6, %v8944_v11  ;;  %v1565_v51 = vsel %vm1541_vm10, %v1532_v38, %v1261_v50  ;;  %v1338_v15 = vsel %vm1310_vm3, %v4691_v52, %v8945_v24  ;;  %v1434_v20 = vsel %vm1409_vm6, %v1401_v29, %v8946_v28  ;;  %v8947_v12 = vld [vmem:[#allocation14_spill] sm:$0xff]  ;;  %v4692_v22 = vld [vmem:[%s4786_s26 + $0x138] sm:$0xff]  ;;  %v8948_v40 = vld [vmem:[#allocation69_spill] sm:$0xff] }
 0x278   : > { %v1468_v49 = vsel %vm1442_vm7, %v1435_v30, %v8947_v12  ;;  %v1564_v56 = vsel %vm1541_vm10, %v1531_v62, %v1259_v59  ;;  %v1337_v16 = vsel %vm1310_vm3, %v4692_v22, %v8948_v40  ;;  %v8949_v1 = vld [vmem:[#allocation99_spill] sm:$0xff]  ;;  %v8952_v13 = vld [vmem:[#allocation100_spill] sm:$0xff]  ;;  %v8956_v25 = vld [vmem:[#allocation129_spill] sm:$0xff] }
 0x279   : > { %v1371_v43 = vsel %vm1343_vm4, %v1338_v15, %v8949_v1  ;;  %v8950_v27 = vld [vmem:[#allocation15_spill] sm:$0xff]  ;;  %4527 = vmatprep.mubr.msk.f32.mxu0 %vm1579_vm11, %v1564_v56  ;;  %v1370_v44 = vsel %vm1343_vm4, %v1337_v16, %v8952_v13  ;;  %v8953_v53 = vld [vmem:[#allocation128_spill] sm:$0xff]  ;;  %v1265_v18 = vpop.permute.xlu1 %1264  ;;  %v8957_v58 = vld [vmem:[#allocation149_spill] sm:$0xff] }
 0x27a   : > { %v1467_v55 = vsel %vm1442_vm7, %v1434_v20, %v8950_v27  ;;  %v8951_v26 = vld [vmem:[#allocation35_spill] sm:$0xff]  ;;  %v1404_v32 = vsel %vm1376_vm5, %v1371_v43, %v8953_v53  ;;  %v8954_v9 = vld [vmem:[#allocation156_spill] sm:$0xff]  ;;  %4528 = vmatmul.mubr.msk.f32.gmra.mrb[22].mxu0 %vm1579_vm11, %v1565_v51  ;;  %v1403_v61 = vsel %vm1376_vm5, %v1370_v44, %v8956_v25  ;;  %v1263_v36 = vpop.permute.xlu0 %1262  ;;  %v8959_v39 = vld [vmem:[#allocation70_spill] sm:$0xff] }
 0x27b   : > { %v1501_v54 = vsel %vm1475_vm8, %v1468_v49, %v8951_v26  ;;  %v1500_v33 = vsel %vm1475_vm8, %v1467_v55, %v8954_v9  ;;  %v8955_v60 = vld [vmem:[#allocation171_spill] sm:$0xff]  ;;  %v1437_v63 = vsel %vm1409_vm6, %v1404_v32, %v8957_v58  ;;  %v8958_v45 = vld [vmem:[#allocation172_spill] sm:$0xff]  ;;  %v8960_v35 = vld [vmem:[#allocation150_spill] sm:$0xff] }
 0x27c   : > { %v1534_v2 = vsel %vm1508_vm9, %v1501_v54, %v8955_v60  ;;  %v1533_v41 = vsel %vm1508_vm9, %v1500_v33, %v8958_v45  ;;  %v4693_v48 = vld [vmem:[%s4786_s26 + $0x158] sm:$0xff]  ;;  %v1436_v14 = vsel %vm1409_vm6, %v1403_v61, %v8960_v35  ;;  %v4694_v5 = vld [vmem:[%s4786_s26 + $0x150] sm:$0xff]  ;;  %v8963_v34 = vld [vmem:[#allocation101_spill] sm:$0xff] }
 0x27d   : > { %v1567_v23 = vsel %vm1541_vm10, %v1534_v2, %v1265_v18  ;;  %v1340_v3 = vsel %vm1310_vm3, %v4693_v48, %v8959_v39  ;;  %v8961_v31 = vld [vmem:[#allocation16_spill] sm:$0xff]  ;;  %v1566_v8 = vsel %vm1541_vm10, %v1533_v41, %v1263_v36  ;;  %v8962_v4 = vld [vmem:[#allocation71_spill] sm:$0xff]  ;;  %v8964_v46 = vld [vmem:[#allocation17_spill] sm:$0xff]  ;;  %v1269_v11 = vpop.permute.xlu1 %1268 }
 0x27e   : > { %v1470_v37 = vsel %vm1442_vm7, %v1437_v63, %v8961_v31  ;;  %v1339_v7 = vsel %vm1310_vm3, %v4694_v5, %v8962_v4  ;;  %v1373_v17 = vsel %vm1343_vm4, %v1340_v3, %v8963_v34  ;;  %v1469_v0 = vsel %vm1442_vm7, %v1436_v14, %v8964_v46  ;;  %v8965_v21 = vld [vmem:[#allocation37_spill] sm:$0xff]  ;;  %4530 = vmatprep.mubr.msk.f32.mxu0 %vm1579_vm11, %v1566_v8  ;;  %v8966_v6 = vld [vmem:[#allocation102_spill] sm:$0xff]  ;;  %v8967_v38 = vld [vmem:[#allocation36_spill] sm:$0xff]  ;;  %v1267_v20 = vpop.permute.xlu0 %1266 }
 0x27f   : > { %v1503_v19 = vsel %vm1475_vm8, %v1470_v37, %v8965_v21  ;;  %v1372_v10 = vsel %vm1343_vm4, %v1339_v7, %v8966_v6  ;;  %v1406_v50 = vsel %vm1376_vm5, %v1373_v17, %v8967_v38  ;;  %v8968_v57 = vld [vmem:[#allocation157_spill] sm:$0xff]  ;;  %4531 = vmatmul.mubr.msk.f32.gmra.mrb[24].mxu0 %vm1579_vm11, %v1567_v23  ;;  %v8970_v62 = vld [vmem:[#allocation130_spill] sm:$0xff]  ;;  %v8971_v59 = vld [vmem:[#allocation151_spill] sm:$0xff] }
 0x280   : > { %v1502_v29 = vsel %vm1475_vm8, %v1469_v0, %v8968_v57  ;;  %v8969_v42 = vld [vmem:[#allocation173_spill] sm:$0xff]  ;;  %v1405_v51 = vsel %vm1376_vm5, %v1372_v10, %v8970_v62  ;;  %v1439_v52 = vsel %vm1409_vm6, %v1406_v50, %v8971_v59  ;;  %v8972_v24 = vld [vmem:[#allocation174_spill] sm:$0xff]  ;;  %v4695_v12 = vld [vmem:[%s4786_s26 + $0x170] sm:$0xff] }
 0x281   : > { %v1536_v30 = vsel %vm1508_vm9, %v1503_v19, %v8969_v42  ;;  %v1535_v15 = vsel %vm1508_vm9, %v1502_v29, %v8972_v24  ;;  %v8973_v49 = vld [vmem:[#allocation72_spill] sm:$0xff]  ;;  %v8975_v16 = vld [vmem:[#allocation18_spill] sm:$0xff]  ;;  %v8976_v55 = vld [vmem:[#allocation73_spill] sm:$0xff]  ;;  %v1273_v45 = vpop.permute.xlu1 %1272  ;;  %v4731_v42 = vmov 0.0  }
 0x282   : > { %v1569_v28 = vsel %vm1541_vm10, %v1536_v30, %v1269_v11  ;;  %v1342_v56 = vsel %vm1310_vm3, %v4695_v12, %v8973_v49  ;;  %v8974_v22 = vld [vmem:[#allocation152_spill] sm:$0xff]  ;;  %v1472_v1 = vsel %vm1442_vm7, %v1439_v52, %v8975_v16  ;;  %v1568_v43 = vsel %vm1541_vm10, %v1535_v15, %v1267_v20  ;;  %v4696_v27 = vld [vmem:[%s4786_s26 + $0x168] sm:$0xff]  ;;  %v8977_v54 = vld [vmem:[#allocation103_spill] sm:$0xff]  ;;  %v1271_v14 = vpop.permute.xlu0 %1270  ;;  %2022 = vst.msk [vmem:[#allocation2 + $0x20] sm:$0xff] %vm1343_vm4, %v4731_v42  ;;  %s4734_s26 = smov 56  }
 0x283   : > { %v1438_v40 = vsel %vm1409_vm6, %v1405_v51, %v8974_v22  ;;  %v1341_v26 = vsel %vm1310_vm3, %v4696_v27, %v8976_v55  ;;  %v1375_v13 = vsel %vm1343_vm4, %v1342_v56, %v8977_v54  ;;  %v8978_v44 = vld [vmem:[#allocation19_spill] sm:$0xff]  ;;  %v8979_v32 = vld [vmem:[#allocation38_spill] sm:$0xff]  ;;  %4533 = vmatprep.mubr.msk.f32.mxu0 %vm1579_vm11, %v1568_v43  ;;  %v8980_v33 = vld [vmem:[#allocation104_spill] sm:$0xff]  ;;  %2023 = vst.msk [vmem:[#allocation2 + $0x28] sm:$0x3] %vm2019_vm12, %v4731_v42 }
 0x284   : > { %v1471_v53 = vsel %vm1442_vm7, %v1438_v40, %v8978_v44  ;;  %v1505_v9 = vsel %vm1475_vm8, %v1472_v1, %v8979_v32  ;;  %v1374_v60 = vsel %vm1343_vm4, %v1341_v26, %v8980_v33  ;;  %v8981_v2 = vld [vmem:[#allocation131_spill] sm:$0xff]  ;;  %v8982_v25 = vld [vmem:[#allocation158_spill] sm:$0xff]  ;;  %4534 = vmatmul.mubr.msk.f32.gmra.mrb[26].mxu0 %vm1579_vm11, %v1569_v28  ;;  %v8984_v41 = vld [vmem:[#allocation132_spill] sm:$0xff]  ;;  %2017 = vst.msk [vmem:[#allocation2] sm:$0xff] %vm1343_vm4, %v4731_v42 }
 0x285   : > { %v1408_v18 = vsel %vm1376_vm5, %v1375_v13, %v8981_v2  ;;  %v1504_v61 = vsel %vm1475_vm8, %v1471_v53, %v8982_v25  ;;  %v8983_v58 = vld [vmem:[#allocation175_spill] sm:$0xff]  ;;  %v1407_v23 = vsel %vm1376_vm5, %v1374_v60, %v8984_v41  ;;  %v8985_v36 = vld [vmem:[#allocation153_spill] sm:$0xff]  ;;  %v8986_v39 = vld [vmem:[#allocation176_spill] sm:$0xff]  ;;  %v1277_v10 = vpop.permute.xlu1 %1276  ;;  %2018 = vst.msk [vmem:[#allocation2 + $0x8] sm:$0xff] %vm1343_vm4, %v4731_v42 }
 0x286   : > { %v1538_v63 = vsel %vm1508_vm9, %v1505_v9, %v8983_v58  ;;  %v1441_v48 = vsel %vm1409_vm6, %v1408_v18, %v8985_v36  ;;  %v1537_v3 = vsel %vm1508_vm9, %v1504_v61, %v8986_v39  ;;  %v8987_v31 = vld [vmem:[#allocation154_spill] sm:$0xff]  ;;  %v8988_v8 = vld [vmem:[#allocation20_spill] sm:$0xff]  ;;  %v8989_v7 = vld [vmem:[#allocation21_spill] sm:$0xff]  ;;  %v1275_v57 = vpop.permute.xlu0 %1274  ;;  %2020 = vst.msk [vmem:[#allocation2 + $0x10] sm:$0x3] %vm2019_vm12, %v4731_v42 }
 0x287   : > { %v1571_v35 = vsel %vm1541_vm10, %v1538_v63, %v1273_v45  ;;  %v1440_v37 = vsel %vm1409_vm6, %v1407_v23, %v8987_v31  ;;  %v1474_v5 = vsel %vm1442_vm7, %v1441_v48, %v8988_v8  ;;  %v1570_v4 = vsel %vm1541_vm10, %v1537_v3, %v1271_v14  ;;  %v8990_v17 = vld [vmem:[#allocation39_spill] sm:$0xff]  ;;  %v8992_v19 = vld [vmem:[#allocation45_spill] sm:$0xff]  ;;  %2021 = vst.msk [vmem:[#allocation2 + $0x18] sm:$0xff] %vm1343_vm4, %v4731_v42 }
 0x288   : > { %v1473_v34 = vsel %vm1442_vm7, %v1440_v37, %v8989_v7  ;;  %v1507_v46 = vsel %vm1475_vm8, %v1474_v5, %v8990_v17  ;;  %4536 = vmatprep.mubr.msk.f32.mxu0 %vm1579_vm11, %v1570_v4  ;;  %v8991_v0 = vld [vmem:[#allocation159_spill] sm:$0xff]  ;;  %2024 = vst.msk [vmem:[#allocation2 + $0x30] sm:$0xff] %vm1343_vm4, %v4731_v42  ;;  %2025 = vst.msk [vmem:[#allocation2 + $0x38] sm:$0xff] %vm1343_vm4, %v4731_v42  ;;  %v6832_v11 = vld [vmem:[%s8419_s3] ss:$0 sm:$0xff] }
 0x289   : > { %v1506_v21 = vsel %vm1475_vm8, %v1473_v34, %v8991_v0  ;;  %v1540_v6 = vsel %vm1508_vm9, %v1507_v46, %v8992_v19  ;;  %4537 = vmatmul.mubr.msk.f32.gmra.mrb[28].mxu0 %vm1579_vm11, %v1571_v35  ;;  %2026 = vst.msk [vmem:[#allocation2 + $0x40] sm:$0x3] %vm2019_vm12, %v4731_v42  ;;  %2029 = vst.msk [vmem:[#allocation2 + $0x58] sm:$0x3] %vm2019_vm12, %v4731_v42 }
 0x28a   : > { %v1539_v38 = vsel %vm1508_vm9, %v1506_v21, %v6246_v47  ;;  %v1573_v50 = vsel %vm1541_vm10, %v1540_v6, %v1277_v10  ;;  %2027 = vst.msk [vmem:[#allocation2 + $0x48] sm:$0xff] %vm1343_vm4, %v4731_v42  ;;  %2028 = vst.msk [vmem:[#allocation2 + $0x50] sm:$0xff] %vm1343_vm4, %v4731_v42 }
 0x28b   : > { %v1572_v29 = vsel %vm1541_vm10, %v1539_v38, %v1275_v57  ;;  %2030 = vst.msk [vmem:[#allocation2 + $0x60] sm:$0xff] %vm1343_vm4, %v4731_v42  ;;  %2031 = vst.msk [vmem:[#allocation2 + $0x68] sm:$0xff] %vm1343_vm4, %v4731_v42 }
 0x28c   : > { %4539 = vmatprep.mubr.msk.f32.mxu0 %vm1579_vm11, %v1572_v29  ;;  %2032 = vst.msk [vmem:[#allocation2 + $0x70] sm:$0x3] %vm2019_vm12, %v4731_v42  ;;  %2035 = vst.msk [vmem:[#allocation2 + $0x88] sm:$0x3] %vm2019_vm12, %v4731_v42  ;;  %v2137_v30 = vld [vmem:[#allocation2 + $0x1] sm:$0xff] }
 0x28d   : > { %4540 = vmatmul.mubr.msk.f32.gmra.mrb[30].mxu0 %vm1579_vm11, %v1573_v50  ;;  %2033 = vst.msk [vmem:[#allocation2 + $0x78] sm:$0xff] %vm1343_vm4, %v4731_v42  ;;  %2034 = vst.msk [vmem:[#allocation2 + $0x80] sm:$0xff] %vm1343_vm4, %v4731_v42  ;;  %v2138_v47 = vld [vmem:[#allocation2 + $0x9] sm:$0xff]  ;;  %2426 = vrot.lane.b32.xlu1 %v2137_v30, %s4724_s28 }
 0x28e   : > { %2036 = vst.msk [vmem:[#allocation2 + $0x90] sm:$0xff] %vm1343_vm4, %v4731_v42  ;;  %2037 = vst.msk [vmem:[#allocation2 + $0x98] sm:$0xff] %vm1343_vm4, %v4731_v42  ;;  %2428 = vrot.lane.b32.xlu0 %v2138_v47, %s4724_s28 }
 0x28f   : > { %2038 = vst.msk [vmem:[#allocation2 + $0xa0] sm:$0x3] %vm2019_vm12, %v4731_v42  ;;  %2041 = vst.msk [vmem:[#allocation2 + $0xb8] sm:$0x3] %vm2019_vm12, %v4731_v42 }
 0x290   : > { %2039 = vst.msk [vmem:[#allocation2 + $0xa8] sm:$0xff] %vm1343_vm4, %v4731_v42  ;;  %2040 = vst.msk [vmem:[#allocation2 + $0xb0] sm:$0xff] %vm1343_vm4, %v4731_v42 }
 0x291   : > { %2042 = vst.msk [vmem:[#allocation2 + $0xc0] sm:$0xff] %vm1343_vm4, %v4731_v42  ;;  %2043 = vst.msk [vmem:[#allocation2 + $0xc8] sm:$0xff] %vm1343_vm4, %v4731_v42 }
 0x292   : > { %2044 = vst.msk [vmem:[#allocation2 + $0xd0] sm:$0x3] %vm2019_vm12, %v4731_v42  ;;  %2047 = vst.msk [vmem:[#allocation2 + $0xe8] sm:$0x3] %vm2019_vm12, %v4731_v42 }
 0x293   : > { %2045 = vst.msk [vmem:[#allocation2 + $0xd8] sm:$0xff] %vm1343_vm4, %v4731_v42  ;;  %2046 = vst.msk [vmem:[#allocation2 + $0xe0] sm:$0xff] %vm1343_vm4, %v4731_v42 }
 0x294   : > { %2048 = vst.msk [vmem:[#allocation2 + $0xf0] sm:$0xff] %vm1343_vm4, %v4731_v42  ;;  %2049 = vst.msk [vmem:[#allocation2 + $0xf8] sm:$0xff] %vm1343_vm4, %v4731_v42 }
 0x295   : > { %2050 = vst.msk [vmem:[#allocation2 + $0x100] sm:$0x3] %vm2019_vm12, %v4731_v42  ;;  %2053 = vst.msk [vmem:[#allocation2 + $0x118] sm:$0x3] %vm2019_vm12, %v4731_v42 }
 0x296   : > { %2051 = vst.msk [vmem:[#allocation2 + $0x108] sm:$0xff] %vm1343_vm4, %v4731_v42  ;;  %2052 = vst.msk [vmem:[#allocation2 + $0x110] sm:$0xff] %vm1343_vm4, %v4731_v42 }
 0x297   : > { %2054 = vst.msk [vmem:[#allocation2 + $0x120] sm:$0xff] %vm1343_vm4, %v4731_v42  ;;  %2055 = vst.msk [vmem:[#allocation2 + $0x128] sm:$0xff] %vm1343_vm4, %v4731_v42 }
 0x298   : > { %2056 = vst.msk [vmem:[#allocation2 + $0x130] sm:$0x3] %vm2019_vm12, %v4731_v42  ;;  %2059 = vst.msk [vmem:[#allocation2 + $0x148] sm:$0x3] %vm2019_vm12, %v4731_v42 }
 0x299   : > { %2057 = vst.msk [vmem:[#allocation2 + $0x138] sm:$0xff] %vm1343_vm4, %v4731_v42  ;;  %2058 = vst.msk [vmem:[#allocation2 + $0x140] sm:$0xff] %vm1343_vm4, %v4731_v42 }
 0x29a   : > { %2060 = vst.msk [vmem:[#allocation2 + $0x150] sm:$0xff] %vm1343_vm4, %v4731_v42  ;;  %2061 = vst.msk [vmem:[#allocation2 + $0x158] sm:$0xff] %vm1343_vm4, %v4731_v42 }
 0x29b   : > { %2062 = vst.msk [vmem:[#allocation2 + $0x160] sm:$0x3] %vm2019_vm12, %v4731_v42  ;;  %2065 = vst.msk [vmem:[#allocation2 + $0x178] sm:$0x3] %vm2019_vm12, %v4731_v42 }
 0x29c   : > { %2063 = vst.msk [vmem:[#allocation2 + $0x168] sm:$0xff] %vm1343_vm4, %v4731_v42  ;;  %2064 = vst.msk [vmem:[#allocation2 + $0x170] sm:$0xff] %vm1343_vm4, %v4731_v42 }
 0x29d   : > { %2066 = vst.msk [vmem:[#allocation2 + $0x180] sm:$0xff] %vm1343_vm4, %v4731_v42  ;;  %2067 = vst.msk [vmem:[#allocation2 + $0x188] sm:$0xff] %vm1343_vm4, %v4731_v42 }
 0x29e   : > { %2068 = vst.msk [vmem:[#allocation2 + $0x190] sm:$0x3] %vm2019_vm12, %v4731_v42  ;;  %2071 = vst.msk [vmem:[#allocation2 + $0x1a8] sm:$0x3] %vm2019_vm12, %v4731_v42 }
 0x29f   : > { %2069 = vst.msk [vmem:[#allocation2 + $0x198] sm:$0xff] %vm1343_vm4, %v4731_v42  ;;  %2070 = vst.msk [vmem:[#allocation2 + $0x1a0] sm:$0xff] %vm1343_vm4, %v4731_v42 }
 0x320   : > { %v6834_v62 = vpop.f32.mrb[0].mxu0 }
 0x321   : > { %8993 = vst [vmem:[#allocation42_spill] sm:$0xff] %v6834_v62  ;;  %v1913_v51 = vadd.f32 %v6834_v62, %v6832_v11  ;;  %v6838_v59 = vpop.f32.mrb[1].mxu0 }
 0x322   : > { %8994 = vst [vmem:[#allocation74_spill] sm:$0xff] %v6838_v59  ;;  %v1912_v52 = vadd.f32 %v6832_v11, %v6838_v59 }
 0x323   : > { %v1945_v24 = vmax.f32 %v1913_v51, 0.0 }
 0x324   : > { %v1944_v15 = vmax.f32 %v1912_v52, 0.0  ;;  %v6842_v28 = vpop.f32.mrb[2].mxu0 }
 0x325   : > { %8995 = vst [vmem:[#allocation75_spill] sm:$0xff] %v6842_v28  ;;  %2074 = vst.msk [vmem:[#allocation2 + $0x21] sm:$0xff] %vm1343_vm4, %v1945_v24  ;;  %v1915_v20 = vadd.f32 %v6842_v28, %v6832_v11  ;;  %v6847_v12 = vpop.f32.mrb[3].mxu0 }
 0x326   : > { %8996 = vst [vmem:[#allocation105_spill] sm:$0xff] %v6847_v12  ;;  %2073 = vst.msk [vmem:[#allocation2 + $0x19] sm:$0xff] %vm1343_vm4, %v1944_v15  ;;  %v1914_v49 = vadd.f32 %v6832_v11, %v6847_v12 }
 0x327   : > { %v1947_v56 = vmax.f32 %v1915_v20, 0.0 }
 0x328   : > { %v1946_v22 = vmax.f32 %v1914_v49, 0.0  ;;  %v6852_v40 = vpop.f32.mrb[4].mxu0 }
 0x329   : > { %8997 = vst [vmem:[#allocation40_spill] sm:$0xff] %v6852_v40  ;;  %2076 = vst.msk [vmem:[#allocation2 + $0x39] sm:$0xff] %vm1343_vm4, %v1947_v56  ;;  %v1917_v16 = vadd.f32 %v6852_v40, %v6832_v11  ;;  %v6857_v1 = vpop.f32.mrb[5].mxu0 }
 0x32a   : > { %8998 = vst [vmem:[#allocation106_spill] sm:$0xff] %v6857_v1  ;;  %2075 = vst.msk [vmem:[#allocation2 + $0x31] sm:$0xff] %vm1343_vm4, %v1946_v22  ;;  %v1916_v43 = vadd.f32 %v6832_v11, %v6857_v1 }
 0x32b   : > { %v1949_v27 = vmax.f32 %v1917_v16, 0.0 }
 0x32c   : > { %v1948_v55 = vmax.f32 %v1916_v43, 0.0  ;;  %v6862_v26 = vpop.f32.mrb[6].mxu0  ;;  %v6864_v54 = vld [vmem:[#allocation2 + $0x21] sm:$0xff] }
 0x32d   : > { %8999 = vst [vmem:[#allocation41_spill] sm:$0xff] %v6862_v26  ;;  %2078 = vst.msk [vmem:[#allocation2 + $0x51] sm:$0xff] %vm1343_vm4, %v1949_v27  ;;  %v1919_v13 = vadd.f32 %v6862_v26, %v6832_v11  ;;  %2432 = vrot.lane.b32.xlu0 %v6864_v54, %s4724_s28  ;;  %v6871_v44 = vpop.f32.mrb[7].mxu0  ;;  %v6873_v53 = vld [vmem:[#allocation2 + $0x19] sm:$0xff] }
 0x32e   : > { %9000 = vst [vmem:[#allocation43_spill] sm:$0xff] %v6871_v44  ;;  %2077 = vst.msk [vmem:[#allocation2 + $0x49] sm:$0xff] %vm1343_vm4, %v1948_v55  ;;  %v1918_v32 = vadd.f32 %v6832_v11, %v6871_v44  ;;  %2430 = vrot.lane.b32.xlu1 %v6873_v53, %s4724_s28 }
 0x32f   : > { %v1951_v9 = vmax.f32 %v1919_v13, 0.0 }
 0x330   : > { %v1950_v33 = vmax.f32 %v1918_v32, 0.0  ;;  %v6880_v60 = vpop.f32.mrb[8].mxu0  ;;  %v6882_v2 = vld [vmem:[#allocation2 + $0x39] sm:$0xff] }
 0x331   : > { %9001 = vst [vmem:[#allocation133_spill] sm:$0xff] %v6880_v60  ;;  %2080 = vst.msk [vmem:[#allocation2 + $0x69] sm:$0xff] %vm1343_vm4, %v1951_v9  ;;  %v1921_v18 = vadd.f32 %v6880_v60, %v6832_v11  ;;  %2436 = vrot.lane.b32.xlu0 %v6882_v2, %s4724_s28  ;;  %v6889_v25 = vpop.f32.mrb[9].mxu0  ;;  %v6891_v61 = vld [vmem:[#allocation2 + $0x31] sm:$0xff] }
 0x332   : > { %9002 = vst [vmem:[#allocation76_spill] sm:$0xff] %v6889_v25  ;;  %2079 = vst.msk [vmem:[#allocation2 + $0x61] sm:$0xff] %vm1343_vm4, %v1950_v33  ;;  %v1920_v58 = vadd.f32 %v6832_v11, %v6889_v25  ;;  %2434 = vrot.lane.b32.xlu1 %v6891_v61, %s4724_s28 }
 0x333   : > { %v1953_v63 = vmax.f32 %v1921_v18, 0.0 }
 0x334   : > { %v1952_v45 = vmax.f32 %v1920_v58, 0.0  ;;  %v6898_v41 = vpop.f32.mrb[10].mxu0  ;;  %v6900_v23 = vld [vmem:[#allocation2 + $0x51] sm:$0xff] }
 0x335   : > { %9003 = vst [vmem:[#allocation77_spill] sm:$0xff] %v6898_v41  ;;  %2082 = vst.msk [vmem:[#allocation2 + $0x81] sm:$0xff] %vm1343_vm4, %v1953_v63  ;;  %v1923_v36 = vadd.f32 %v6898_v41, %v6832_v11  ;;  %2440 = vrot.lane.b32.xlu0 %v6900_v23, %s4724_s28  ;;  %v6907_v48 = vpop.f32.mrb[11].mxu0  ;;  %v6909_v39 = vld [vmem:[#allocation2 + $0x49] sm:$0xff] }
 0x336   : > { %9004 = vst [vmem:[#allocation107_spill] sm:$0xff] %v6907_v48  ;;  %2081 = vst.msk [vmem:[#allocation2 + $0x79] sm:$0xff] %vm1343_vm4, %v1952_v45  ;;  %v1922_v3 = vadd.f32 %v6832_v11, %v6907_v48  ;;  %2438 = vrot.lane.b32.xlu1 %v6909_v39, %s4724_s28  ;;  %v7211_v41 = vld [vmem:[#allocation2 + $0x48] sm:$0xff] }
 0x337   : > { %v1955_v35 = vmax.f32 %v1923_v36, 0.0 }
 0x338   : > { %v1954_v14 = vmax.f32 %v1922_v3, 0.0  ;;  %v6916_v31 = vpop.f32.mrb[12].mxu0  ;;  %v6918_v37 = vld [vmem:[#allocation2 + $0x69] sm:$0xff] }
 0x339   : > { %9005 = vst [vmem:[#allocation108_spill] sm:$0xff] %v6916_v31  ;;  %2084 = vst.msk [vmem:[#allocation2 + $0x99] sm:$0xff] %vm1343_vm4, %v1955_v35  ;;  %v1925_v8 = vadd.f32 %v6916_v31, %v6832_v11  ;;  %2444 = vrot.lane.b32.xlu0 %v6918_v37, %s4724_s28  ;;  %v6925_v5 = vpop.f32.mrb[13].mxu0  ;;  %v6927_v4 = vld [vmem:[#allocation2 + $0x61] sm:$0xff]  ;;  %v7207_v31 = vld [vmem:[#allocation2 + $0x50] sm:$0xff] }
 0x33a   : > { %9006 = vst [vmem:[#allocation134_spill] sm:$0xff] %v6925_v5  ;;  %2083 = vst.msk [vmem:[#allocation2 + $0x91] sm:$0xff] %vm1343_vm4, %v1954_v14  ;;  %v1924_v7 = vadd.f32 %v6832_v11, %v6925_v5  ;;  %2442 = vrot.lane.b32.xlu1 %v6927_v4, %s4724_s28  ;;  %v7219_v60 = vld [vmem:[#allocation2 + $0x68] sm:$0xff]  ;;  %v7223_v26 = vld [vmem:[#allocation2 + $0x60] sm:$0xff] }
 0x33b   : > { %v1957_v34 = vmax.f32 %v1925_v8, 0.0 }
 0x33c   : > { %v1956_v17 = vmax.f32 %v1924_v7, 0.0  ;;  %v6934_v46 = vpop.f32.mrb[14].mxu0  ;;  %v6936_v0 = vld [vmem:[#allocation2 + $0x81] sm:$0xff] }
 0x33d   : > { %9007 = vst [vmem:[#allocation46_spill] sm:$0xff] %v6934_v46  ;;  %2086 = vst.msk [vmem:[#allocation2 + $0xb1] sm:$0xff] %vm1343_vm4, %v1957_v34  ;;  %v1927_v21 = vadd.f32 %v6934_v46, %v6832_v11  ;;  %2448 = vrot.lane.b32.xlu0 %v6936_v0, %s4724_s28  ;;  %v6943_v19 = vpop.f32.mrb[15].mxu0  ;;  %v6945_v6 = vld [vmem:[#allocation2 + $0x79] sm:$0xff] }
 0x33e   : > { %9008 = vst [vmem:[#allocation135_spill] sm:$0xff] %v6943_v19  ;;  %2085 = vst.msk [vmem:[#allocation2 + $0xa9] sm:$0xff] %vm1343_vm4, %v1956_v17  ;;  %v1926_v10 = vadd.f32 %v6832_v11, %v6943_v19  ;;  %2446 = vrot.lane.b32.xlu1 %v6945_v6, %s4724_s28  ;;  %v7231_v40 = vld [vmem:[#allocation2 + $0x80] sm:$0xff]  ;;  %v7235_v28 = vld [vmem:[#allocation2 + $0x78] sm:$0xff] }
 0x33f   : > { %v1959_v38 = vmax.f32 %v1927_v21, 0.0 }
 0x340   : > { %v1958_v50 = vmax.f32 %v1926_v10, 0.0  ;;  %v6952_v57 = vpop.f32.mrb[16].mxu0  ;;  %v6954_v29 = vld [vmem:[#allocation2 + $0x99] sm:$0xff] }
 0x341   : > { %9009 = vst [vmem:[#allocation47_spill] sm:$0xff] %v6952_v57  ;;  %2088 = vst.msk [vmem:[#allocation2 + $0xc9] sm:$0xff] %vm1343_vm4, %v1959_v38  ;;  %v1929_v42 = vadd.f32 %v6952_v57, %v6832_v11  ;;  %2452 = vrot.lane.b32.xlu0 %v6954_v29, %s4724_s28  ;;  %v6961_v47 = vpop.f32.mrb[17].mxu0  ;;  %v6963_v30 = vld [vmem:[#allocation2 + $0x91] sm:$0xff]  ;;  %v7183_v57 = vld [vmem:[#allocation2 + $0x20] sm:$0xff] }
 0x342   : > { %9010 = vst [vmem:[#allocation78_spill] sm:$0xff] %v6961_v47  ;;  %2087 = vst.msk [vmem:[#allocation2 + $0xc1] sm:$0xff] %vm1343_vm4, %v1958_v50  ;;  %v1928_v51 = vadd.f32 %v6832_v11, %v6961_v47  ;;  %2450 = vrot.lane.b32.xlu1 %v6963_v30, %s4724_s28  ;;  %v7243_v62 = vld [vmem:[#allocation2 + $0x98] sm:$0xff] }
 0x343   : > { %v1961_v52 = vmax.f32 %v1929_v42, 0.0  ;;  %9032 = vst [vmem:[#allocation115_spill] sm:$0xff] %v7183_v57 }
 0x344   : > { %v1960_v24 = vmax.f32 %v1928_v51, 0.0  ;;  %v6970_v15 = vpop.f32.mrb[18].mxu0  ;;  %v6972_v20 = vld [vmem:[#allocation2 + $0xb1] sm:$0xff] }
 0x345   : > { %9011 = vst [vmem:[#allocation79_spill] sm:$0xff] %v6970_v15  ;;  %2090 = vst.msk [vmem:[#allocation2 + $0xe1] sm:$0xff] %vm1343_vm4, %v1961_v52  ;;  %v1931_v49 = vadd.f32 %v6970_v15, %v6832_v11  ;;  %2456 = vrot.lane.b32.xlu0 %v6972_v20, %s4724_s28  ;;  %v6979_v56 = vpop.f32.mrb[19].mxu0  ;;  %v6981_v22 = vld [vmem:[#allocation2 + $0xa9] sm:$0xff] }
 0x346   : > { %9012 = vst [vmem:[#allocation26_spill] sm:$0xff] %v6979_v56  ;;  %2089 = vst.msk [vmem:[#allocation2 + $0xd9] sm:$0xff] %vm1343_vm4, %v1960_v24  ;;  %v1930_v16 = vadd.f32 %v6832_v11, %v6979_v56  ;;  %2454 = vrot.lane.b32.xlu1 %v6981_v22, %s4724_s28 }
 0x347   : > { %v1963_v43 = vmax.f32 %v1931_v49, 0.0 }
 0x348   : > { %v1962_v27 = vmax.f32 %v1930_v16, 0.0  ;;  %v6988_v55 = vpop.f32.mrb[20].mxu0  ;;  %v6990_v13 = vld [vmem:[#allocation2 + $0xc9] sm:$0xff] }
 0x349   : > { %9013 = vst [vmem:[#allocation109_spill] sm:$0xff] %v6988_v55  ;;  %2092 = vst.msk [vmem:[#allocation2 + $0xf9] sm:$0xff] %vm1343_vm4, %v1963_v43  ;;  %v1933_v32 = vadd.f32 %v6988_v55, %v6832_v11  ;;  %2460 = vrot.lane.b32.xlu0 %v6990_v13, %s4724_s28  ;;  %v6997_v9 = vpop.f32.mrb[21].mxu0  ;;  %v6999_v33 = vld [vmem:[#allocation2 + $0xc1] sm:$0xff] }
 0x34a   : > { %9014 = vst [vmem:[#allocation48_spill] sm:$0xff] %v6997_v9  ;;  %2091 = vst.msk [vmem:[#allocation2 + $0xf1] sm:$0xff] %vm1343_vm4, %v1962_v27  ;;  %v1932_v18 = vadd.f32 %v6832_v11, %v6997_v9  ;;  %2458 = vrot.lane.b32.xlu1 %v6999_v33, %s4724_s28 }
 0x34b   : > { %v1965_v58 = vmax.f32 %v1933_v32, 0.0 }
 0x34c   : > { %v1964_v63 = vmax.f32 %v1932_v18, 0.0  ;;  %v7008_v36 = vld [vmem:[#allocation2 + $0xe1] sm:$0xff] }
 0x34d   : > { %v7006_v45 = vpop.f32.mrb[22].mxu0  ;;  %2094 = vst.msk [vmem:[#allocation2 + $0x111] sm:$0xff] %vm1343_vm4, %v1965_v58  ;;  %2464 = vrot.lane.b32.xlu0 %v7008_v36, %s4724_s28  ;;  %v7017_v14 = vld [vmem:[#allocation2 + $0xd9] sm:$0xff] }
 0x34e   : > { %9015 = vst [vmem:[#allocation49_spill] sm:$0xff] %v7006_v45  ;;  %v1935_v3 = vadd.f32 %v7006_v45, %v6832_v11  ;;  %v7015_v35 = vpop.f32.mrb[23].mxu0  ;;  %2093 = vst.msk [vmem:[#allocation2 + $0x109] sm:$0xff] %vm1343_vm4, %v1964_v63  ;;  %2462 = vrot.lane.b32.xlu1 %v7017_v14, %s4724_s28  ;;  %v7157_v45 = vpop.permute.xlu0 %1982 }
 0x34f   : > { %9016 = vst [vmem:[#allocation80_spill] sm:$0xff] %v7015_v35  ;;  %v1934_v8 = vadd.f32 %v6832_v11, %v7015_v35  ;;  %9025 = vst [vmem:[#allocation112_spill] sm:$0xff] %v7157_v45 }
 0x350   : > { %v1967_v7 = vmax.f32 %v1935_v3, 0.0  ;;  %v7026_v21 = vld [vmem:[#allocation2 + $0xf9] sm:$0xff] }
 0x351   : > { %v1966_v34 = vmax.f32 %v1934_v8, 0.0  ;;  %2468 = vrot.lane.b32.xlu0 %v7026_v21, %s4724_s28  ;;  %v7035_v50 = vld [vmem:[#allocation2 + $0xf1] sm:$0xff] }
 0x352   : > { %v7024_v17 = vpop.f32.mrb[24].mxu0  ;;  %2096 = vst.msk [vmem:[#allocation2 + $0x129] sm:$0xff] %vm1343_vm4, %v1967_v7  ;;  %2466 = vrot.lane.b32.xlu1 %v7035_v50, %s4724_s28  ;;  %v7162_v56 = vpop.permute.xlu0 %2428 }
 0x353   : > { %9017 = vst [vmem:[#allocation81_spill] sm:$0xff] %v7024_v17  ;;  %v1937_v10 = vadd.f32 %v7024_v17, %v6832_v11  ;;  %v7033_v38 = vpop.f32.mrb[25].mxu0  ;;  %2095 = vst.msk [vmem:[#allocation2 + $0x121] sm:$0xff] %vm1343_vm4, %v1966_v34  ;;  %v2189_v17 = vld [vmem:[#allocation2 + $0xf2] sm:$0xff] }
 0x354   : > { %9018 = vst [vmem:[#allocation110_spill] sm:$0xff] %v7033_v38  ;;  %v1936_v42 = vadd.f32 %v6832_v11, %v7033_v38  ;;  %v7044_v49 = vld [vmem:[#allocation2 + $0x111] sm:$0xff]  ;;  %v2190_v38 = vld [vmem:[#allocation2 + $0xfa] sm:$0xff]  ;;  %9026 = vst [vmem:[#allocation113_spill] sm:$0xff] %v7162_v56 }
 0x355   : > { %v1969_v51 = vmax.f32 %v1937_v10, 0.0  ;;  %2472 = vrot.lane.b32.xlu0 %v7044_v49, %s4724_s28  ;;  %v7053_v27 = vld [vmem:[#allocation2 + $0x109] sm:$0xff]  ;;  %v2192_v35 = vld [vmem:[#allocation2 + $0x112] sm:$0xff] }
 0x356   : > { %v1968_v52 = vmax.f32 %v1936_v42, 0.0  ;;  %2470 = vrot.lane.b32.xlu1 %v7053_v27, %s4724_s28  ;;  %v2191_v9 = vld [vmem:[#allocation2 + $0x10a] sm:$0xff] }
 0x357   : > { %v7042_v24 = vpop.f32.mrb[26].mxu0  ;;  %2098 = vst.msk [vmem:[#allocation2 + $0x141] sm:$0xff] %vm1343_vm4, %v1969_v51 }
 0x358   : > { %9019 = vst [vmem:[#allocation111_spill] sm:$0xff] %v7042_v24  ;;  %v1939_v16 = vadd.f32 %v7042_v24, %v6832_v11  ;;  %v7051_v43 = vpop.f32.mrb[27].mxu0  ;;  %2097 = vst.msk [vmem:[#allocation2 + $0x139] sm:$0xff] %vm1343_vm4, %v1968_v52  ;;  %v7151_v24 = vld [vmem:[#allocation2 + $0xda] sm:$0xff] }
 0x359   : > { %9020 = vst [vmem:[#allocation50_spill] sm:$0xff] %v7051_v43  ;;  %v1938_v32 = vadd.f32 %v6832_v11, %v7051_v43  ;;  %v2162_v3 = vld [vmem:[#allocation2 + $0x129] sm:$0xff] }
 0x35a   : > { %v1971_v18 = vmax.f32 %v1939_v16, 0.0  ;;  %2476 = vrot.lane.b32.xlu0 %v2162_v3, %s4724_s28  ;;  %v2161_v34 = vld [vmem:[#allocation2 + $0x121] sm:$0xff] }
 0x35b   : > { %v1970_v58 = vmax.f32 %v1938_v32, 0.0  ;;  %2474 = vrot.lane.b32.xlu1 %v2161_v34, %s4724_s28  ;;  %v2188_v43 = vld [vmem:[#allocation2 + $0xe2] sm:$0xff] }
 0x35c   : > { %v7060_v63 = vpop.f32.mrb[28].mxu0  ;;  %2100 = vst.msk [vmem:[#allocation2 + $0x159] sm:$0xff] %vm1343_vm4, %v1971_v18  ;;  %v2193_v55 = vld [vmem:[#allocation2 + $0x122] sm:$0xff] }
 0x35d   : > { %9021 = vst [vmem:[#allocation136_spill] sm:$0xff] %v7060_v63  ;;  %v1941_v8 = vadd.f32 %v7060_v63, %v6832_v11  ;;  %v7066_v7 = vpop.f32.mrb[29].mxu0  ;;  %2099 = vst.msk [vmem:[#allocation2 + $0x151] sm:$0xff] %vm1343_vm4, %v1970_v58  ;;  %v7146_v63 = vld [vmem:[#allocation2 + $0xc2] sm:$0xff] }
 0x35e   : > { %9022 = vst [vmem:[#allocation51_spill] sm:$0xff] %v7066_v7  ;;  %v1940_v10 = vadd.f32 %v6832_v11, %v7066_v7  ;;  %v2164_v16 = vld [vmem:[#allocation2 + $0x141] sm:$0xff]  ;;  %v7142_v7 = vld [vmem:[#allocation2 + $0xca] sm:$0xff] }
 0x35f   : > { %v1973_v42 = vmax.f32 %v1941_v8, 0.0  ;;  %2480 = vrot.lane.b32.xlu0 %v2164_v16, %s4724_s28  ;;  %v2163_v58 = vld [vmem:[#allocation2 + $0x139] sm:$0xff]  ;;  %v2196_v15 = vld [vmem:[#allocation2 + $0x142] sm:$0xff] }
 0x360   : > { %v1972_v51 = vmax.f32 %v1940_v10, 0.0  ;;  %v7072_v52 = vpop.f32.mrb[30].mxu0  ;;  %2478 = vrot.lane.b32.xlu1 %v2163_v58, %s4724_s28  ;;  %v2169_v58 = vld [vmem:[#allocation2 + $0x2] sm:$0xff] }
 0x361   : > { %9023 = vst [vmem:[#allocation82_spill] sm:$0xff] %v7072_v52  ;;  %2102 = vst.msk [vmem:[#allocation2 + $0x171] sm:$0xff] %vm1343_vm4, %v1973_v42  ;;  %v1943_v32 = vadd.f32 %v7072_v52, %v6832_v11  ;;  %v7078_v18 = vpop.f32.mrb[31].mxu0  ;;  %v7138_v52 = vld [vmem:[#allocation2 + $0xaa] sm:$0xff] }
 0x362   : > { %9024 = vst [vmem:[#allocation83_spill] sm:$0xff] %v7078_v18  ;;  %2101 = vst.msk [vmem:[#allocation2 + $0x169] sm:$0xff] %vm1343_vm4, %v1972_v51  ;;  %v1942_v3 = vadd.f32 %v6832_v11, %v7078_v18  ;;  %v2170_v11 = vld [vmem:[#allocation2 + $0xa] sm:$0xff]  ;;  %v7134_v18 = vld [vmem:[#allocation2 + $0xb2] sm:$0xff] }
 0x363   : > { %v1975_v8 = vmax.f32 %v1943_v32, 0.0  ;;  %v2166_v10 = vld [vmem:[#allocation2 + $0x159] sm:$0xff]  ;;  %v2172_v32 = vld [vmem:[#allocation2 + $0x22] sm:$0xff] }
 0x364   : > { %v1974_v34 = vmax.f32 %v1942_v3, 0.0  ;;  %2484 = vrot.lane.b32.xlu0 %v2166_v10, %s4724_s28  ;;  %v2165_v42 = vld [vmem:[#allocation2 + $0x151] sm:$0xff]  ;;  %v2171_v3 = vld [vmem:[#allocation2 + $0x1a] sm:$0xff] }
 0x365   : > { %2104 = vst.msk [vmem:[#allocation2 + $0x189] sm:$0xff] %vm1343_vm4, %v1975_v8  ;;  %2482 = vrot.lane.b32.xlu1 %v2165_v42, %s4724_s28  ;;  %v7094_v8 = vld [vmem:[#allocation2 + $0x3a] sm:$0xff]  ;;  %v7102_v10 = vld [vmem:[#allocation2 + $0x52] sm:$0xff]  ;;  %v7106_v42 = vld [vmem:[#allocation2 + $0x4a] sm:$0xff] }
 0x366   : > { %2103 = vst.msk [vmem:[#allocation2 + $0x181] sm:$0xff] %vm1343_vm4, %v1974_v34  ;;  %v7098_v34 = vld [vmem:[#allocation2 + $0x32] sm:$0xff] }
 0x368   : > { %v2168_v16 = vld [vmem:[#allocation2 + $0x171] sm:$0xff] }
 0x369   : > { %2488 = vrot.lane.b32.xlu0 %v2168_v16, %s4724_s28  ;;  %v2167_v51 = vld [vmem:[#allocation2 + $0x169] sm:$0xff] }
 0x36a   : > { %2486 = vrot.lane.b32.xlu1 %v2167_v51, %s4724_s28  ;;  %v7110_v16 = vld [vmem:[#allocation2 + $0x6a] sm:$0xff]  ;;  %v7114_v51 = vld [vmem:[#allocation2 + $0x62] sm:$0xff] }
 0x36d   : > { %2556 = vrot.lane.b32.xlu0 %v2170_v11, %s4726_s30  ;;  %v7118_v11 = vld [vmem:[#allocation2 + $0x82] sm:$0xff] }
 0x36e   : > { %2554 = vrot.lane.b32.xlu1 %v2169_v58, %s4726_s30  ;;  %v7122_v58 = vld [vmem:[#allocation2 + $0x7a] sm:$0xff] }
 0x371   : > { %2560 = vrot.lane.b32.xlu0 %v2172_v32, %s4726_s30  ;;  %v7126_v32 = vld [vmem:[#allocation2 + $0x9a] sm:$0xff] }
 0x372   : > { %2558 = vrot.lane.b32.xlu1 %v2171_v3, %s4726_s30  ;;  %v7130_v3 = vld [vmem:[#allocation2 + $0x92] sm:$0xff] }
 0x375   : > { %2564 = vrot.lane.b32.xlu0 %v7094_v8, %s4726_s30 }
 0x376   : > { %2562 = vrot.lane.b32.xlu1 %v7098_v34, %s4726_s30 }
 0x379   : > { %2568 = vrot.lane.b32.xlu0 %v7102_v10, %s4726_s30 }
 0x37a   : > { %2566 = vrot.lane.b32.xlu1 %v7106_v42, %s4726_s30 }
 0x37d   : > { %2572 = vrot.lane.b32.xlu0 %v7110_v16, %s4726_s30 }
 0x37e   : > { %2570 = vrot.lane.b32.xlu1 %v7114_v51, %s4726_s30 }
 0x381   : > { %2576 = vrot.lane.b32.xlu0 %v7118_v11, %s4726_s30 }
 0x382   : > { %2574 = vrot.lane.b32.xlu1 %v7122_v58, %s4726_s30 }
 0x385   : > { %2580 = vrot.lane.b32.xlu0 %v7126_v32, %s4726_s30 }
 0x386   : > { %2578 = vrot.lane.b32.xlu1 %v7130_v3, %s4726_s30 }
 0x389   : > { %2584 = vrot.lane.b32.xlu0 %v7134_v18, %s4726_s30 }
 0x38a   : > { %2582 = vrot.lane.b32.xlu1 %v7138_v52, %s4726_s30 }
 0x38d   : > { %2588 = vrot.lane.b32.xlu0 %v7142_v7, %s4726_s30 }
 0x38e   : > { %2586 = vrot.lane.b32.xlu1 %v7146_v63, %s4726_s30 }
 0x391   : > { %2592 = vrot.lane.b32.xlu0 %v2188_v43, %s4726_s30  ;;  %v2194_v43 = vld [vmem:[#allocation2 + $0x12a] sm:$0xff] }
 0x392   : > { %2590 = vrot.lane.b32.xlu1 %v7151_v24, %s4726_s30 }
 0x395   : > { %2596 = vrot.lane.b32.xlu0 %v2190_v38, %s4726_s30  ;;  %v7165_v38 = vpop.permute.xlu1 %2426 }
 0x396   : > { %2594 = vrot.lane.b32.xlu1 %v2189_v17, %s4726_s30  ;;  %9027 = vst [vmem:[#allocation52_spill] sm:$0xff] %v7165_v38  ;;  %v2195_v17 = vld [vmem:[#allocation2 + $0x13a] sm:$0xff]  ;;  %v2200_v38 = vld [vmem:[#allocation2 + $0x172] sm:$0xff] }
 0x399   : > { %2600 = vrot.lane.b32.xlu0 %v2192_v35, %s4726_s30 }
 0x39a   : > { %2598 = vrot.lane.b32.xlu1 %v2191_v9, %s4726_s30  ;;  %v2198_v9 = vld [vmem:[#allocation2 + $0x15a] sm:$0xff] }
 0x39d   : > { %2604 = vrot.lane.b32.xlu0 %v2194_v43, %s4726_s30  ;;  %v2197_v43 = vld [vmem:[#allocation2 + $0x152] sm:$0xff] }
 0x39e   : > { %2602 = vrot.lane.b32.xlu1 %v2193_v55, %s4726_s30 }
 0x39f   : > { %v7169_v35 = vpop.permute.xlu0 %2432 }
 0x3a0   : > { %9028 = vst [vmem:[#allocation53_spill] sm:$0xff] %v7169_v35  ;;  %v7171_v47 = vpop.permute.xlu1 %2430 }
 0x3a1   : > { %2608 = vrot.lane.b32.xlu0 %v2196_v15, %s4726_s30  ;;  %v2199_v15 = vld [vmem:[#allocation2 + $0x16a] sm:$0xff] }
 0x3a2   : > { %2606 = vrot.lane.b32.xlu1 %v2195_v17, %s4726_s30 }
 0x3a3   : > { %v7175_v56 = vpop.permute.xlu0 %2436 }
 0x3a4   : > { %9029 = vst [vmem:[#allocation84_spill] sm:$0xff] %v7175_v56  ;;  %v7177_v55 = vpop.permute.xlu1 %2434 }
 0x3a5   : > { %2612 = vrot.lane.b32.xlu0 %v2198_v9, %s4726_s30  ;;  %9030 = vst [vmem:[#allocation85_spill] sm:$0xff] %v7177_v55  ;;  %v7187_v9 = vld [vmem:[#allocation2 + $0x18] sm:$0xff] }
 0x3a6   : > { %2610 = vrot.lane.b32.xlu1 %v2197_v43, %s4726_s30  ;;  %9034 = vst [vmem:[#allocation55_spill] sm:$0xff] %v7187_v9 }
 0x3a7   : > { %v7181_v17 = vpop.permute.xlu0 %2440 }
 0x3a8   : > { %9031 = vst [vmem:[#allocation114_spill] sm:$0xff] %v7181_v17  ;;  %v7185_v19 = vpop.permute.xlu1 %2438  ;;  %v7283_v17 = vld [vmem:[#allocation2 + $0xd8] sm:$0xff] }
 0x3a9   : > { %2616 = vrot.lane.b32.xlu0 %v2200_v38, %s4726_s30  ;;  %9033 = vst [vmem:[#allocation54_spill] sm:$0xff] %v7185_v19  ;;  %v7195_v38 = vld [vmem:[#allocation2 + $0x38] sm:$0xff] }
 0x3aa   : > { %2614 = vrot.lane.b32.xlu1 %v2199_v15, %s4726_s30  ;;  %9036 = vst [vmem:[#allocation86_spill] sm:$0xff] %v7195_v38  ;;  %v7199_v15 = vld [vmem:[#allocation2 + $0x30] sm:$0xff]  ;;  %s4405_s30 = sshll.u32 %s9230_s22, 8 }
 0x3ab   : > { %v7193_v43 = vpop.permute.xlu0 %2444  ;;  %9038 = vst [vmem:[#allocation116_spill] sm:$0xff] %v7199_v15  ;;  %s8315_s9 = scalar_lea.vmem %s8422_s6, %s4405_s30 }
 0x3ac   : > { %9035 = vst [vmem:[#allocation3_spill] sm:$0xff] %v7193_v43  ;;  %v7197_v46 = vpop.permute.xlu1 %2442  ;;  %v7271_v43 = vld [vmem:[#allocation2 + $0xc0] sm:$0xff] }
 0x3ad   : > { %2684 = vrot.lane.b32.xlu0 %v7183_v57, %s4728_s8  ;;  %9037 = vst [vmem:[#allocation27_spill] sm:$0xff] %v7197_v46  ;;  %v7319_v57 = vld [vmem:[#allocation2 + $0x120] sm:$0xff] }
 0x3ae   : > { %2682 = vrot.lane.b32.xlu1 %v7187_v9, %s4728_s8  ;;  %9062 = vst [vmem:[#allocation162_spill] sm:$0xff] %v7319_v57  ;;  %v2133_v9 = vld [vmem:[#allocation2 + $0x150] sm:$0xff] }
 0x3af   : > { %v7205_v5 = vpop.permute.xlu0 %2448 }
 0x3b0   : > { %9039 = vst [vmem:[#allocation56_spill] sm:$0xff] %v7205_v5  ;;  %v7209_v48 = vpop.permute.xlu1 %2446  ;;  %v7259_v5 = vld [vmem:[#allocation2 + $0xa8] sm:$0xff] }
 0x3b1   : > { %2688 = vrot.lane.b32.xlu0 %v7195_v38, %s4728_s8  ;;  %9040 = vst [vmem:[#allocation57_spill] sm:$0xff] %v7209_v48  ;;  %v7295_v38 = vld [vmem:[#allocation2 + $0xf0] sm:$0xff] }
 0x3b2   : > { %2686 = vrot.lane.b32.xlu1 %v7199_v15, %s4728_s8  ;;  %v7307_v15 = vld [vmem:[#allocation2 + $0x108] sm:$0xff] }
 0x3b3   : > { %v7217_v25 = vpop.permute.xlu0 %2452  ;;  %9058 = vst [vmem:[#allocation24_spill] sm:$0xff] %v7307_v15 }
 0x3b4   : > { %9041 = vst [vmem:[#allocation87_spill] sm:$0xff] %v7217_v25  ;;  %v7221_v44 = vpop.permute.xlu1 %2450  ;;  %v7247_v25 = vld [vmem:[#allocation2 + $0x90] sm:$0xff] }
 0x3b5   : > { %2692 = vrot.lane.b32.xlu0 %v7207_v31, %s4728_s8  ;;  %9042 = vst [vmem:[#allocation88_spill] sm:$0xff] %v7221_v44 }
 0x3b6   : > { %2690 = vrot.lane.b32.xlu1 %v7211_v41, %s4728_s8 }
 0x3b7   : > { %v7229_v1 = vpop.permute.xlu0 %2456 }
 0x3b8   : > { %9043 = vst [vmem:[#allocation28_spill] sm:$0xff] %v7229_v1  ;;  %v7233_v12 = vpop.permute.xlu1 %2454 }
 0x3b9   : > { %2696 = vrot.lane.b32.xlu0 %v7219_v60, %s4728_s8  ;;  %9044 = vst [vmem:[#allocation22_spill] sm:$0xff] %v7233_v12  ;;  %v7255_v12 = vld [vmem:[#allocation2 + $0xb0] sm:$0xff] }
 0x3ba   : > { %2694 = vrot.lane.b32.xlu1 %v7223_v26, %s4728_s8 }
 0x3bb   : > { %v7241_v59 = vpop.permute.xlu0 %2460 }
 0x3bc   : > { %9045 = vst [vmem:[#allocation44_spill] sm:$0xff] %v7241_v59  ;;  %v7245_v45 = vpop.permute.xlu1 %2458 }
 0x3bd   : > { %2700 = vrot.lane.b32.xlu0 %v7231_v40, %s4728_s8  ;;  %9046 = vst [vmem:[#allocation117_spill] sm:$0xff] %v7245_v45  ;;  %v7267_v45 = vld [vmem:[#allocation2 + $0xc8] sm:$0xff] }
 0x3be   : > { %2698 = vrot.lane.b32.xlu1 %v7235_v28, %s4728_s8 }
 0x3bf   : > { %v7253_v1 = vpop.permute.xlu0 %2464 }
 0x3c0   : > { %9047 = vst [vmem:[#allocation137_spill] sm:$0xff] %v7253_v1  ;;  %v7257_v44 = vpop.permute.xlu1 %2462 }
 0x3c1   : > { %2704 = vrot.lane.b32.xlu0 %v7243_v62, %s4728_s8  ;;  %9048 = vst [vmem:[#allocation160_spill] sm:$0xff] %v7257_v44  ;;  %v7279_v44 = vld [vmem:[#allocation2 + $0xe0] sm:$0xff] }
 0x3c2   : > { %2702 = vrot.lane.b32.xlu1 %v7247_v25, %s4728_s8 }
 0x3c3   : > { %v7265_v59 = vpop.permute.xlu0 %2468 }
 0x3c4   : > { %9049 = vst [vmem:[#allocation58_spill] sm:$0xff] %v7265_v59  ;;  %v7269_v48 = vpop.permute.xlu1 %2466 }
 0x3c5   : > { %2708 = vrot.lane.b32.xlu0 %v7255_v12, %s4728_s8  ;;  %9050 = vst [vmem:[#allocation138_spill] sm:$0xff] %v7269_v48  ;;  %v7291_v48 = vld [vmem:[#allocation2 + $0xf8] sm:$0xff] }
 0x3c6   : > { %2706 = vrot.lane.b32.xlu1 %v7259_v5, %s4728_s8 }
 0x3c7   : > { %v7277_v1 = vpop.permute.xlu0 %2472 }
 0x3c8   : > { %9051 = vst [vmem:[#allocation4_spill] sm:$0xff] %v7277_v1  ;;  %v7281_v46 = vpop.permute.xlu1 %2470 }
 0x3c9   : > { %2712 = vrot.lane.b32.xlu0 %v7267_v45, %s4728_s8  ;;  %9052 = vst [vmem:[#allocation59_spill] sm:$0xff] %v7281_v46  ;;  %v7303_v46 = vld [vmem:[#allocation2 + $0x110] sm:$0xff] }
 0x3ca   : > { %2710 = vrot.lane.b32.xlu1 %v7271_v43, %s4728_s8  ;;  %9056 = vst [vmem:[#allocation90_spill] sm:$0xff] %v7303_v46 }
 0x3cc   : > { %v7289_v59 = vpop.permute.xlu0 %2476 }
 0x3cd   : > { %2716 = vrot.lane.b32.xlu0 %v7279_v44, %s4728_s8  ;;  %9053 = vst [vmem:[#allocation89_spill] sm:$0xff] %v7289_v59  ;;  %v7293_v19 = vpop.permute.xlu1 %2474 }
 0x3ce   : > { %2714 = vrot.lane.b32.xlu1 %v7283_v17, %s4728_s8  ;;  %9054 = vst [vmem:[#allocation5_spill] sm:$0xff] %v7293_v19  ;;  %v7315_v19 = vld [vmem:[#allocation2 + $0x128] sm:$0xff] }
 0x3cf   : > { %9060 = vst [vmem:[#allocation119_spill] sm:$0xff] %v7315_v19 }
 0x3d1   : > { %2720 = vrot.lane.b32.xlu0 %v7291_v48, %s4728_s8  ;;  %v7301_v1 = vpop.permute.xlu0 %2480 }
 0x3d2   : > { %2718 = vrot.lane.b32.xlu1 %v7295_v38, %s4728_s8  ;;  %9055 = vst [vmem:[#allocation23_spill] sm:$0xff] %v7301_v1  ;;  %v7305_v56 = vpop.permute.xlu1 %2478 }
 0x3d3   : > { %9057 = vst [vmem:[#allocation118_spill] sm:$0xff] %v7305_v56  ;;  %v2132_v56 = vld [vmem:[#allocation2 + $0x140] sm:$0xff] }
 0x3d5   : > { %2724 = vrot.lane.b32.xlu0 %v7303_v46, %s4728_s8 }
 0x3d6   : > { %2722 = vrot.lane.b32.xlu1 %v7307_v15, %s4728_s8  ;;  %v7313_v59 = vpop.permute.xlu0 %2484  ;;  %v2131_v15 = vld [vmem:[#allocation2 + $0x138] sm:$0xff] }
 0x3d7   : > { %9059 = vst [vmem:[#allocation161_spill] sm:$0xff] %v7313_v59  ;;  %v7317_v55 = vpop.permute.xlu1 %2482 }
 0x3d8   : > { %9061 = vst [vmem:[#allocation139_spill] sm:$0xff] %v7317_v55  ;;  %v2134_v55 = vld [vmem:[#allocation2 + $0x158] sm:$0xff] }
 0x3d9   : > { %2728 = vrot.lane.b32.xlu0 %v7315_v19, %s4728_s8 }
 0x3da   : > { %2726 = vrot.lane.b32.xlu1 %v7319_v57, %s4728_s8 }
 0x3db   : > { %v7325_v1 = vpop.permute.xlu0 %2488 }
 0x3dc   : > { %9063 = vst [vmem:[#allocation60_spill] sm:$0xff] %v7325_v1  ;;  %v7327_v46 = vpop.permute.xlu1 %2486  ;;  %v2136_v1 = vld [vmem:[#allocation2 + $0x170] sm:$0xff] }
 0x3dd   : > { %9064 = vst [vmem:[#allocation140_spill] sm:$0xff] %v7327_v46  ;;  %2732 = vrot.lane.b32.xlu0 %v2132_v56, %s4728_s8  ;;  %v2135_v46 = vld [vmem:[#allocation2 + $0x168] sm:$0xff] }
 0x3de   : > { %2730 = vrot.lane.b32.xlu1 %v2131_v15, %s4728_s8 }
 0x3df   : > { %v7331_v59 = vpop.permute.xlu0 %2556 }
 0x3e0   : > { %9065 = vst [vmem:[#allocation6_spill] sm:$0xff] %v7331_v59  ;;  %v7333_v35 = vpop.permute.xlu1 %2554  ;;  %v2232_v59 = vld [vmem:[#allocation2 + $0x188] sm:$0xff] }
 0x3e1   : > { %9066 = vst [vmem:[#allocation61_spill] sm:$0xff] %v7333_v35  ;;  %2736 = vrot.lane.b32.xlu0 %v2134_v55, %s4728_s8  ;;  %v2231_v55 = vld [vmem:[#allocation2 + $0x180] sm:$0xff] }
 0x3e2   : > { %2734 = vrot.lane.b32.xlu1 %v2133_v9, %s4728_s8 }
 0x3e3   : > { %v7337_v57 = vpop.permute.xlu0 %2560 }
 0x3e4   : > { %v7339_v19 = vpop.permute.xlu1 %2558 }
 0x3e5   : > { %2740 = vrot.lane.b32.xlu0 %v2136_v1, %s4728_s8 }
 0x3e6   : > { %2738 = vrot.lane.b32.xlu1 %v2135_v46, %s4728_s8 }
 0x3e7   : > { %v7343_v56 = vpop.permute.xlu0 %2564 }
 0x3e8   : > { %v7345_v15 = vpop.permute.xlu1 %2562 }
 0x3e9   : > { %2744 = vrot.lane.b32.xlu0 %v2232_v59, %s4728_s8 }
 0x3ea   : > { %2742 = vrot.lane.b32.xlu1 %v2231_v55, %s4728_s8 }
 0x3eb   : > { %v7349_v9 = vpop.permute.xlu0 %2568 }
 0x3ec   : > { %v7351_v35 = vpop.permute.xlu1 %2566 }
 0x3ed   : > { %2812 = vrot.lane.b32.xlu0 %v6864_v54, %s4730_s20 }
 0x3ee   : > { %2810 = vrot.lane.b32.xlu1 %v6873_v53, %s4730_s20 }
 0x3ef   : > { %v7357_v1 = vpop.permute.xlu0 %2572 }
 0x3f0   : > { %v7359_v46 = vpop.permute.xlu1 %2570 }
 0x3f1   : > { %2816 = vrot.lane.b32.xlu0 %v6882_v2, %s4730_s20 }
 0x3f2   : > { %2814 = vrot.lane.b32.xlu1 %v6891_v61, %s4730_s20 }
 0x3f3   : > { %v7365_v59 = vpop.permute.xlu0 %2576 }
 0x3f4   : > { %9067 = vst [vmem:[#allocation91_spill] sm:$0xff] %v7365_v59  ;;  %v7367_v55 = vpop.permute.xlu1 %2574 }
 0x3f5   : > { %2820 = vrot.lane.b32.xlu0 %v6900_v23, %s4730_s20 }
 0x3f6   : > { %2818 = vrot.lane.b32.xlu1 %v6909_v39, %s4730_s20 }
 0x3f7   : > { %v7373_v54 = vpop.permute.xlu0 %2580 }
 0x3f8   : > { %9068 = vst [vmem:[#allocation7_spill] sm:$0xff] %v7373_v54  ;;  %v7375_v53 = vpop.permute.xlu1 %2578 }
 0x3f9   : > { %2824 = vrot.lane.b32.xlu0 %v6918_v37, %s4730_s20 }
 0x3fa   : > { %2822 = vrot.lane.b32.xlu1 %v6927_v4, %s4730_s20 }
 0x3fb   : > { %v7381_v2 = vpop.permute.xlu0 %2584 }
 0x3fc   : > { %v7383_v61 = vpop.permute.xlu1 %2582 }
 0x3fd   : > { %2828 = vrot.lane.b32.xlu0 %v6936_v0, %s4730_s20 }
 0x3fe   : > { %2826 = vrot.lane.b32.xlu1 %v6945_v6, %s4730_s20 }
 0x3ff   : > { %v7389_v59 = vpop.permute.xlu0 %2588 }
 0x400   : > { %9069 = vst [vmem:[#allocation25_spill] sm:$0xff] %v7389_v59  ;;  %v7391_v54 = vpop.permute.xlu1 %2586 }
 0x401   : > { %9070 = vst [vmem:[#allocation92_spill] sm:$0xff] %v7391_v54  ;;  %2832 = vrot.lane.b32.xlu0 %v6954_v29, %s4730_s20  ;;  %v2284_v54 = vld [vmem:[#allocation2 + $0xfa] sm:$0xff] }
 0x402   : > { %2830 = vrot.lane.b32.xlu1 %v6963_v30, %s4730_s20  ;;  %v3678_v30 = vld [vmem:[%s8418_s2] sm:$0xff] }
 0x403   : > { %v7397_v37 = vpop.permute.xlu0 %2592 }
 0x404   : > { %9071 = vst [vmem:[#allocation120_spill] sm:$0xff] %v7397_v37  ;;  %v7399_v4 = vpop.permute.xlu1 %2590  ;;  %v2345_v37 = vld [vmem:[#allocation2 + $0xe1] sm:$0xff] }
 0x405   : > { %9072 = vst [vmem:[#allocation29_spill] sm:$0xff] %v7399_v4  ;;  %2836 = vrot.lane.b32.xlu0 %v6972_v20, %s4730_s20  ;;  %v3679_v20 = vld [vmem:[%s8418_s2 + $0x8] sm:$0xff] }
 0x406   : > { %2834 = vrot.lane.b32.xlu1 %v6981_v22, %s4730_s20 }
 0x407   : > { %v7405_v0 = vpop.permute.xlu0 %2596 }
 0x408   : > { %9073 = vst [vmem:[#allocation163_spill] sm:$0xff] %v7405_v0  ;;  %v7407_v6 = vpop.permute.xlu1 %2594  ;;  %v4616_v0 = vpack.c.bf16 %v3679_v20, %v3678_v30 }
 0x409   : > { %9074 = vst [vmem:[#allocation121_spill] sm:$0xff] %v7407_v6  ;;  %2840 = vrot.lane.b32.xlu0 %v6990_v13, %s4730_s20 }
 0x40a   : > { %2838 = vrot.lane.b32.xlu1 %v6999_v33, %s4730_s20  ;;  %4632 = vmatprep.subr.bf16.mxu1 %v4616_v0  ;;  %v3680_v33 = vld [vmem:[%s8418_s2 + $0x10] sm:$0xff] }
 0x40b   : > { %v7413_v29 = vpop.permute.xlu0 %2600  ;;  %4637 = vmatpush3.bf16.msra.mxu1 %v4616_v0  ;;  %4617 = vmatprep.subr.bf16.mxu0 %v4616_v0 }
 0x40c   : > { %9075 = vst [vmem:[#allocation141_spill] sm:$0xff] %v7413_v29  ;;  %v7421_v22 = vpop.permute.xlu1 %2598  ;;  %v3681_v29 = vld [vmem:[%s8418_s2 + $0x18] sm:$0xff]  ;;  %4619 = vmatpush3.bf16.msra.mxu0 %v4616_v0 }
 0x40d   : > { %9076 = vst [vmem:[#allocation164_spill] sm:$0xff] %v7421_v22  ;;  %2844 = vrot.lane.b32.xlu0 %v7008_v36, %s4730_s20  ;;  %v4620_v20 = vpack.c.bf16 %v3681_v29, %v3680_v33  ;;  %v3685_v33 = vld [vmem:[%s8418_s2 + $0x38] sm:$0xff] }
 0x40e   : > { %2842 = vrot.lane.b32.xlu1 %v7017_v14, %s4730_s20  ;;  %v3682_v14 = vld [vmem:[%s8418_s2 + $0x20] sm:$0xff] }
 0x40f   : > { %v7427_v13 = vpop.permute.xlu0 %2604  ;;  %4633 = vmatprep.subr.bf16.mxu1 %v4620_v20  ;;  %4621 = vmatprep.subr.bf16.mxu0 %v4620_v20 }
 0x410   : > { %9077 = vst [vmem:[#allocation62_spill] sm:$0xff] %v7427_v13  ;;  %v7435_v30 = vpop.permute.xlu1 %2602  ;;  %4638 = vmatpush3.bf16.msra.mxu1 %v4620_v20  ;;  %v3683_v13 = vld [vmem:[%s8418_s2 + $0x28] sm:$0xff]  ;;  %4623 = vmatpush3.bf16.msra.mxu0 %v4620_v20 }
 0x411   : > { %9078 = vst [vmem:[#allocation142_spill] sm:$0xff] %v7435_v30  ;;  %2848 = vrot.lane.b32.xlu0 %v7026_v21, %s4730_s20  ;;  %v4624_v29 = vpack.c.bf16 %v3683_v13, %v3682_v14  ;;  %v3686_v14 = vld [vmem:[%s8418_s2 + $0x40] sm:$0xff] }
 0x412   : > { %2846 = vrot.lane.b32.xlu1 %v7035_v50, %s4730_s20  ;;  %v3684_v50 = vld [vmem:[%s8418_s2 + $0x30] sm:$0xff] }
 0x413   : > { %v7441_v36 = vpop.permute.xlu0 %2608  ;;  %4634 = vmatprep.subr.bf16.mxu1 %v4624_v29  ;;  %4625 = vmatprep.subr.bf16.mxu0 %v4624_v29  ;;  %v4628_v20 = vpack.c.bf16 %v3685_v33, %v3684_v50 }
 0x414   : > { %9079 = vst [vmem:[#allocation8_spill] sm:$0xff] %v7441_v36  ;;  %v7449_v0 = vpop.permute.xlu1 %2606  ;;  %4639 = vmatpush3.bf16.msra.mxu1 %v4624_v29  ;;  %4627 = vmatpush3.bf16.msra.mxu0 %v4624_v29  ;;  %v2337_v36 = vld [vmem:[#allocation2 + $0x81] sm:$0xff] }
 0x415   : > { %9080 = vst [vmem:[#allocation63_spill] sm:$0xff] %v7449_v0  ;;  %2852 = vrot.lane.b32.xlu0 %v7044_v49, %s4730_s20  ;;  %4635 = vmatprep.subr.bf16.mxu1 %v4628_v20  ;;  %v2336_v0 = vld [vmem:[#allocation2 + $0x79] sm:$0xff] }
 0x416   : > { %2850 = vrot.lane.b32.xlu1 %v7053_v27, %s4730_s20  ;;  %4629 = vmatprep.subr.bf16.mxu0 %v4628_v20 }
 0x417   : > { %v7455_v21 = vpop.permute.xlu0 %2612 }
 0x418   : > { %9081 = vst [vmem:[#allocation93_spill] sm:$0xff] %v7455_v21  ;;  %v7463_v13 = vpop.permute.xlu1 %2610  ;;  %4640 = vmatpush3.bf16.msra.mxu1 %v4628_v20  ;;  %4631 = vmatpush3.bf16.msra.mxu0 %v4628_v20 }
 0x419   : > { %9082 = vst [vmem:[#allocation9_spill] sm:$0xff] %v7463_v13  ;;  %2944 = vrot.lane.b32.xlu0 %v7094_v8, %s4732_s19  ;;  %4636 = vmatprep.subr.mxu1 %v3686_v14 }
 0x41a   : > { %2942 = vrot.lane.b32.xlu1 %v7098_v34, %s4732_s19  ;;  %4558 = vmatprep.subr.mxu0 %v3686_v14 }
 0x41b   : > { %v7469_v49 = vpop.permute.xlu0 %2616 }
 0x41c   : > { %9083 = vst [vmem:[#allocation30_spill] sm:$0xff] %v7469_v49  ;;  %v7471_v27 = vpop.permute.xlu1 %2614  ;;  %4641 = vmatpush3.msra.mxu1 %v3686_v14  ;;  %4559 = vmatpush3.msra.mxu0 %v3686_v14  ;;  %v2334_v49 = vld [vmem:[#allocation2 + $0x61] sm:$0xff] }
 0x41d   : > { %9084 = vst [vmem:[#allocation94_spill] sm:$0xff] %v7471_v27  ;;  %3072 = vrot.lane.b32.xlu0 %v7207_v31, %s4733_s25 }
 0x41e   : > { %3070 = vrot.lane.b32.xlu1 %v7211_v41, %s4733_s25 }
 0x41f   : > { %v7480_v8 = vpop.permute.xlu0 %2684 }
 0x420   : > { %9085 = vst [vmem:[#allocation122_spill] sm:$0xff] %v7480_v8  ;;  %v7482_v34 = vpop.permute.xlu1 %2682  ;;  %v2335_v8 = vld [vmem:[#allocation2 + $0x69] sm:$0xff] }
 0x421   : > { %9086 = vst [vmem:[#allocation31_spill] sm:$0xff] %v7482_v34  ;;  %3200 = vrot.lane.b32.xlu0 %v6900_v23, %s4734_s26 }
 0x422   : > { %3198 = vrot.lane.b32.xlu1 %v6909_v39, %s4734_s26 }
 0x423   : > { %v7488_v29 = vpop.permute.xlu0 %2688 }
 0x424   : > { %v7490_v50 = vpop.permute.xlu1 %2686 }
 0x425   : > { %2946 = vrot.lane.b32.xlu0 %v7106_v42, %s4732_s19 }
 0x426   : > { %3326 = vrot.lane.b32.xlu1 %v7106_v42, %s4735_s27 }
 0x427   : > { %v7496_v33 = vpop.permute.xlu0 %2692 }
 0x428   : > { %v7498_v20 = vpop.permute.xlu1 %2690 }
 0x429   : > { %2948 = vrot.lane.b32.xlu0 %v7102_v10, %s4732_s19 }
 0x42a   : > { %3328 = vrot.lane.b32.xlu1 %v7102_v10, %s4735_s27 }
 0x42b   : > { %v7504_v23 = vpop.permute.xlu0 %2696 }
 0x42c   : > { %v7506_v39 = vpop.permute.xlu1 %2694 }
 0x42d   : > { %3076 = vrot.lane.b32.xlu0 %v7219_v60, %s4733_s25 }
 0x42e   : > { %3074 = vrot.lane.b32.xlu1 %v7223_v26, %s4733_s25 }
 0x42f   : > { %v7512_v42 = vpop.permute.xlu0 %2700 }
 0x430   : > { %v7514_v14 = vpop.permute.xlu1 %2698 }
 0x431   : > { %3204 = vrot.lane.b32.xlu0 %v2335_v8, %s4734_s26 }
 0x432   : > { %3202 = vrot.lane.b32.xlu1 %v2334_v49, %s4734_s26 }
 0x433   : > { %v7518_v10 = vpop.permute.xlu0 %2704 }
 0x434   : > { %v7520_v34 = vpop.permute.xlu1 %2702 }
 0x435   : > { %2950 = vrot.lane.b32.xlu0 %v7114_v51, %s4732_s19 }
 0x436   : > { %3330 = vrot.lane.b32.xlu1 %v7114_v51, %s4735_s27 }
 0x437   : > { %v7526_v27 = vpop.permute.xlu0 %2708 }
 0x438   : > { %v7528_v21 = vpop.permute.xlu1 %2706 }
 0x439   : > { %2952 = vrot.lane.b32.xlu0 %v7110_v16, %s4732_s19 }
 0x43a   : > { %3332 = vrot.lane.b32.xlu1 %v7110_v16, %s4735_s27 }
 0x43b   : > { %v7534_v49 = vpop.permute.xlu0 %2712 }
 0x43c   : > { %v7536_v8 = vpop.permute.xlu1 %2710 }
 0x43d   : > { %3080 = vrot.lane.b32.xlu0 %v7231_v40, %s4733_s25 }
 0x43e   : > { %3078 = vrot.lane.b32.xlu1 %v7235_v28, %s4733_s25 }
 0x43f   : > { %v7542_v51 = vpop.permute.xlu0 %2716 }
 0x440   : > { %9087 = vst [vmem:[#allocation165_spill] sm:$0xff] %v7542_v51  ;;  %v7544_v13 = vpop.permute.xlu1 %2714 }
 0x441   : > { %9088 = vst [vmem:[#allocation123_spill] sm:$0xff] %v7544_v13  ;;  %3208 = vrot.lane.b32.xlu0 %v2337_v36, %s4734_s26 }
 0x442   : > { %3206 = vrot.lane.b32.xlu1 %v2336_v0, %s4734_s26 }
 0x443   : > { %v7548_v16 = vpop.permute.xlu0 %2720 }
 0x444   : > { %9089 = vst [vmem:[#allocation143_spill] sm:$0xff] %v7548_v16  ;;  %v7550_v30 = vpop.permute.xlu1 %2718  ;;  %v2338_v16 = vld [vmem:[#allocation2 + $0x91] sm:$0xff] }
 0x445   : > { %9090 = vst [vmem:[#allocation166_spill] sm:$0xff] %v7550_v30  ;;  %2954 = vrot.lane.b32.xlu0 %v7122_v58, %s4732_s19  ;;  %v2344_v30 = vld [vmem:[#allocation2 + $0xd9] sm:$0xff] }
 0x446   : > { %3334 = vrot.lane.b32.xlu1 %v7122_v58, %s4735_s27 }
 0x447   : > { %v7556_v22 = vpop.permute.xlu0 %2724 }
 0x448   : > { %9091 = vst [vmem:[#allocation64_spill] sm:$0xff] %v7556_v22  ;;  %v7558_v6 = vpop.permute.xlu1 %2722 }
 0x449   : > { %9092 = vst [vmem:[#allocation144_spill] sm:$0xff] %v7558_v6  ;;  %2956 = vrot.lane.b32.xlu0 %v7118_v11, %s4732_s19  ;;  %v2339_v6 = vld [vmem:[#allocation2 + $0x99] sm:$0xff] }
 0x44a   : > { %3336 = vrot.lane.b32.xlu1 %v7118_v11, %s4735_s27 }
 0x44b   : > { %v7564_v36 = vpop.permute.xlu0 %2728 }
 0x44c   : > { %9093 = vst [vmem:[#allocation10_spill] sm:$0xff] %v7564_v36  ;;  %v7566_v0 = vpop.permute.xlu1 %2726 }
 0x44d   : > { %9094 = vst [vmem:[#allocation65_spill] sm:$0xff] %v7566_v0  ;;  %3084 = vrot.lane.b32.xlu0 %v7243_v62, %s4733_s25 }
 0x44e   : > { %3082 = vrot.lane.b32.xlu1 %v7247_v25, %s4733_s25 }
 0x44f   : > { %v7572_v58 = vpop.permute.xlu0 %2732 }
 0x450   : > { %9095 = vst [vmem:[#allocation95_spill] sm:$0xff] %v7572_v58  ;;  %v7574_v22 = vpop.permute.xlu1 %2730 }
 0x451   : > { %9096 = vst [vmem:[#allocation11_spill] sm:$0xff] %v7574_v22  ;;  %3212 = vrot.lane.b32.xlu0 %v2339_v6, %s4734_s26 }
 0x452   : > { %3210 = vrot.lane.b32.xlu1 %v2338_v16, %s4734_s26 }
 0x453   : > { %v7578_v11 = vpop.permute.xlu0 %2736 }
 0x454   : > { %9097 = vst [vmem:[#allocation32_spill] sm:$0xff] %v7578_v11  ;;  %v7580_v36 = vpop.permute.xlu1 %2734  ;;  %v2340_v11 = vld [vmem:[#allocation2 + $0xa9] sm:$0xff] }
 0x455   : > { %9098 = vst [vmem:[#allocation96_spill] sm:$0xff] %v7580_v36  ;;  %2958 = vrot.lane.b32.xlu0 %v7130_v3, %s4732_s19 }
 0x456   : > { %3338 = vrot.lane.b32.xlu1 %v7130_v3, %s4735_s27 }
 0x457   : > { %v7586_v0 = vpop.permute.xlu0 %2740 }
 0x458   : > { %9099 = vst [vmem:[#allocation124_spill] sm:$0xff] %v7586_v0  ;;  %v7588_v58 = vpop.permute.xlu1 %2738 }
 0x459   : > { %9100 = vst [vmem:[#allocation155_spill] sm:$0xff] %v7588_v58  ;;  %2960 = vrot.lane.b32.xlu0 %v7126_v32, %s4732_s19  ;;  %v2341_v58 = vld [vmem:[#allocation2 + $0xb1] sm:$0xff] }
 0x45a   : > { %3340 = vrot.lane.b32.xlu1 %v7126_v32, %s4735_s27 }
 0x45b   : > { %v7594_v6 = vpop.permute.xlu0 %2744 }
 0x45c   : > { %9101 = vst [vmem:[#allocation167_spill] sm:$0xff] %v7594_v6  ;;  %v7596_v16 = vpop.permute.xlu1 %2742 }
 0x45d   : > { %9102 = vst [vmem:[#allocation125_spill] sm:$0xff] %v7596_v16  ;;  %3088 = vrot.lane.b32.xlu0 %v7255_v12, %s4733_s25  ;;  %v2342_v16 = vld [vmem:[#allocation2 + $0xc1] sm:$0xff] }
 0x45e   : > { %3086 = vrot.lane.b32.xlu1 %v7259_v5, %s4733_s25 }
 0x45f   : > { %v7602_v3 = vpop.permute.xlu0 %2812 }
 0x460   : > { %9103 = vst [vmem:[#allocation145_spill] sm:$0xff] %v7602_v3  ;;  %v7604_v0 = vpop.permute.xlu1 %2810 }
 0x461   : > { %9104 = vst [vmem:[#allocation168_spill] sm:$0xff] %v7604_v0  ;;  %3216 = vrot.lane.b32.xlu0 %v2341_v58, %s4734_s26  ;;  %v2343_v0 = vld [vmem:[#allocation2 + $0xc9] sm:$0xff] }
 0x462   : > { %3214 = vrot.lane.b32.xlu1 %v2340_v11, %s4734_s26 }
 0x463   : > { %v7608_v32 = vpop.permute.xlu0 %2816 }
 0x464   : > { %v7610_v6 = vpop.permute.xlu1 %2814 }
 0x465   : > { %2962 = vrot.lane.b32.xlu0 %v7138_v52, %s4732_s19 }
 0x466   : > { %3342 = vrot.lane.b32.xlu1 %v7138_v52, %s4735_s27 }
 0x467   : > { %v7616_v12 = vpop.permute.xlu0 %2820 }
 0x468   : > { %v7618_v5 = vpop.permute.xlu1 %2818 }
 0x469   : > { %2964 = vrot.lane.b32.xlu0 %v7134_v18, %s4732_s19 }
 0x46a   : > { %3344 = vrot.lane.b32.xlu1 %v7134_v18, %s4735_s27 }
 0x46b   : > { %v7624_v58 = vpop.permute.xlu0 %2824 }
 0x46c   : > { %v7626_v11 = vpop.permute.xlu1 %2822 }
 0x46d   : > { %3092 = vrot.lane.b32.xlu0 %v7267_v45, %s4733_s25 }
 0x46e   : > { %3090 = vrot.lane.b32.xlu1 %v7271_v43, %s4733_s25 }
 0x46f   : > { %v7632_v52 = vpop.permute.xlu0 %2828 }
 0x470   : > { %v7634_v3 = vpop.permute.xlu1 %2826 }
 0x471   : > { %3220 = vrot.lane.b32.xlu0 %v2343_v0, %s4734_s26 }
 0x472   : > { %3218 = vrot.lane.b32.xlu1 %v2342_v16, %s4734_s26 }
 0x473   : > { %v7638_v18 = vpop.permute.xlu0 %2832 }
 0x474   : > { %v7640_v36 = vpop.permute.xlu1 %2830 }
 0x475   : > { %2966 = vrot.lane.b32.xlu0 %v7146_v63, %s4732_s19 }
 0x476   : > { %3346 = vrot.lane.b32.xlu1 %v7146_v63, %s4735_s27 }
 0x477   : > { %v7646_v45 = vpop.permute.xlu0 %2836 }
 0x478   : > { %v7648_v43 = vpop.permute.xlu1 %2834 }
 0x479   : > { %2968 = vrot.lane.b32.xlu0 %v7142_v7, %s4732_s19 }
 0x47a   : > { %3348 = vrot.lane.b32.xlu1 %v7142_v7, %s4735_s27 }
 0x47b   : > { %v7654_v0 = vpop.permute.xlu0 %2840 }
 0x47c   : > { %v7656_v16 = vpop.permute.xlu1 %2838 }
 0x47d   : > { %3096 = vrot.lane.b32.xlu0 %v7279_v44, %s4733_s25 }
 0x47e   : > { %3094 = vrot.lane.b32.xlu1 %v7283_v17, %s4733_s25 }
 0x47f   : > { %v7662_v63 = vpop.permute.xlu0 %2844 }
 0x480   : > { %9105 = vst [vmem:[#allocation66_spill] sm:$0xff] %v7662_v63  ;;  %v7664_v22 = vpop.permute.xlu1 %2842  ;;  %v2282_v63 = vld [vmem:[#allocation2 + $0xe2] sm:$0xff] }
 0x481   : > { %9106 = vst [vmem:[#allocation146_spill] sm:$0xff] %v7664_v22  ;;  %3224 = vrot.lane.b32.xlu0 %v2345_v37, %s4734_s26  ;;  %v2283_v22 = vld [vmem:[#allocation2 + $0xf2] sm:$0xff] }
 0x482   : > { %3222 = vrot.lane.b32.xlu1 %v2344_v30, %s4734_s26 }
 0x483   : > { %v7668_v7 = vpop.permute.xlu0 %2848 }
 0x484   : > { %9107 = vst [vmem:[#allocation12_spill] sm:$0xff] %v7668_v7  ;;  %v7670_v4 = vpop.permute.xlu1 %2846 }
 0x485   : > { %9108 = vst [vmem:[#allocation67_spill] sm:$0xff] %v7670_v4  ;;  %2970 = vrot.lane.b32.xlu0 %v7151_v24, %s4732_s19 }
 0x486   : > { %3350 = vrot.lane.b32.xlu1 %v7151_v24, %s4735_s27  ;;  %v2347_v24 = vld [vmem:[#allocation2 + $0xf9] sm:$0xff] }
 0x487   : > { %v7676_v44 = vpop.permute.xlu0 %2852 }
 0x488   : > { %9109 = vst [vmem:[#allocation97_spill] sm:$0xff] %v7676_v44  ;;  %v7678_v17 = vpop.permute.xlu1 %2850  ;;  %v2346_v44 = vld [vmem:[#allocation2 + $0xf1] sm:$0xff] }
 0x489   : > { %9110 = vst [vmem:[#allocation13_spill] sm:$0xff] %v7678_v17  ;;  %2972 = vrot.lane.b32.xlu0 %v2282_v63, %s4732_s19  ;;  %v9111_v17 = vld [vmem:[#allocation55_spill] sm:$0xff] }
 0x48a   : > { %3352 = vrot.lane.b32.xlu1 %v2282_v63, %s4735_s27  ;;  %v3420_v51 = vsel %vm1343_vm4, %v9111_v17, %v7171_v47  ;;  %v9112_v47 = vld [vmem:[#allocation53_spill] sm:$0xff]  ;;  %v9113_v17 = vld [vmem:[#allocation115_spill] sm:$0xff] }
 0x48b   : > { %v2945_v37 = vpop.permute.xlu0 %2944  ;;  %v3452_v63 = vsel %vm1409_vm6, %v3420_v51, %v7339_v19 }
 0x48c   : > { %v2943_v30 = vpop.permute.xlu1 %2942 }
 0x48d   : > { %3100 = vrot.lane.b32.xlu0 %v7291_v48, %s4733_s25 }
 0x48e   : > { %3098 = vrot.lane.b32.xlu1 %v7295_v38, %s4733_s25  ;;  %v3484_v38 = vsel %vm1475_vm8, %v3452_v63, %v7490_v50 }
 0x48f   : > { %v3073_v7 = vpop.permute.xlu0 %3072 }
 0x490   : > { %v3071_v4 = vpop.permute.xlu1 %3070 }
 0x491   : > { %3228 = vrot.lane.b32.xlu0 %v2347_v24, %s4734_s26  ;;  %v3516_v24 = vsel %vm1541_vm10, %v3484_v38, %v7610_v6 }
 0x492   : > { %3226 = vrot.lane.b32.xlu1 %v2346_v44, %s4734_s26  ;;  %v3421_v44 = vsel %vm1343_vm4, %v9113_v17, %v9112_v47  ;;  %v3549_v19 = vsel %vm3546_vm13, %v3516_v24, %v2943_v30  ;;  %v9115_v17 = vld [vmem:[#allocation24_spill] sm:$0xff] }
 0x493   : > { %v3201_v48 = vpop.permute.xlu0 %3200  ;;  %v3453_v50 = vsel %vm1409_vm6, %v3421_v44, %v7337_v57  ;;  %v3582_v51 = vsel %vm3579_vm14, %v3549_v19, %v3071_v4  ;;  %v9116_v44 = vld [vmem:[#allocation85_spill] sm:$0xff]  ;;  %v9117_v19 = vld [vmem:[#allocation116_spill] sm:$0xff] }
 0x494   : > { %v3199_v59 = vpop.permute.xlu1 %3198  ;;  %v3485_v6 = vsel %vm1475_vm8, %v3453_v50, %v7488_v29 }
 0x495   : > { %2974 = vrot.lane.b32.xlu0 %v2283_v22, %s4732_s19  ;;  %v3615_v38 = vsel %vm3612_vm15, %v3582_v51, %v3199_v59  ;;  %v3517_v30 = vsel %vm1541_vm10, %v3485_v6, %v7608_v32  ;;  %v9114_v32 = vld [vmem:[#allocation90_spill] sm:$0xff] }
 0x496   : > { %3354 = vrot.lane.b32.xlu1 %v2283_v22, %s4735_s27  ;;  %v3550_v57 = vsel %vm3546_vm13, %v3517_v30, %v2945_v37  ;;  %v2349_v37 = vld [vmem:[#allocation2 + $0x111] sm:$0xff] }
 0x497   : > { %v2947_v63 = vpop.permute.xlu0 %2946  ;;  %v3583_v4 = vsel %vm3579_vm14, %v3550_v57, %v3073_v7  ;;  %v2348_v7 = vld [vmem:[#allocation2 + $0x109] sm:$0xff]  ;;  %v9118_v57 = vld [vmem:[#allocation84_spill] sm:$0xff] }
 0x498   : > { %v3327_v13 = vpop.permute.xlu1 %3326  ;;  %v3616_v59 = vsel %vm3612_vm15, %v3583_v4, %v3201_v48  ;;  %v3422_v48 = vsel %vm1343_vm4, %v9117_v19, %v9116_v44  ;;  %v2285_v30 = vld [vmem:[#allocation2 + $0x10a] sm:$0xff] }
 0x499   : > { %2976 = vrot.lane.b32.xlu0 %v2284_v54, %s4732_s19  ;;  %v3648_v22 = vsel %vm3645_vm0, %v3615_v38, %v3327_v13  ;;  %v3454_v50 = vsel %vm1409_vm6, %v3422_v48, %v7345_v15  ;;  %v9119_v4 = vld [vmem:[#allocation86_spill] sm:$0xff] }
 0x49a   : > { %3356 = vrot.lane.b32.xlu1 %v2284_v54, %s4735_s27  ;;  %4563 = vmatprep.mubr.msk.f32.mxu1 %vm3694_vm1, %v3648_v22  ;;  %v3486_v6 = vsel %vm1475_vm8, %v3454_v50, %v7498_v20  ;;  %v9121_v50 = vld [vmem:[#allocation162_spill] sm:$0xff] }
 0x49b   : > { %v2949_v29 = vpop.permute.xlu0 %2948  ;;  %v3518_v22 = vsel %vm1541_vm10, %v3486_v6, %v7618_v5 }
 0x49c   : > { %v3329_v24 = vpop.permute.xlu1 %3328 }
 0x49d   : > { %v3649_v47 = vsel %vm3645_vm0, %v3616_v59, %v3329_v24  ;;  %3104 = vrot.lane.b32.xlu0 %v9114_v32, %s4733_s25  ;;  %v3423_v59 = vsel %vm1343_vm4, %v9119_v4, %v9118_v57  ;;  %v3551_v24 = vsel %vm3546_vm13, %v3518_v22, %v2947_v63 }
 0x49e   : > { %3102 = vrot.lane.b32.xlu1 %v9115_v17, %s4733_s25  ;;  %4564 = vmatmul.mubr.msk.f32.vlgmr.msra.gmra.mrb[0].mxu1 %vm3694_vm1, %v3649_v47  ;;  %v3455_v15 = vsel %vm1409_vm6, %v3423_v59, %v7343_v56  ;;  %v2382_v59 = vld [vmem:[#allocation2 + $0x122] sm:$0xff] }
 0x49f   : > { %v3077_v13 = vpop.permute.xlu0 %3076  ;;  %v3487_v32 = vsel %vm1475_vm8, %v3455_v15, %v7496_v33  ;;  %v2351_v15 = vld [vmem:[#allocation2 + $0x129] sm:$0xff] }
 0x4a0   : > { %v3075_v54 = vpop.permute.xlu1 %3074 }
 0x4a1   : > { %3232 = vrot.lane.b32.xlu0 %v2349_v37, %s4734_s26  ;;  %v3584_v20 = vsel %vm3579_vm14, %v3551_v24, %v3075_v54  ;;  %v2286_v37 = vld [vmem:[#allocation2 + $0x112] sm:$0xff] }
 0x4a2   : > { %3230 = vrot.lane.b32.xlu1 %v2348_v7, %s4734_s26  ;;  %v3519_v7 = vsel %vm1541_vm10, %v3487_v32, %v7616_v12  ;;  %v9120_v12 = vld [vmem:[#allocation119_spill] sm:$0xff] }
 0x4a3   : > { %v3205_v51 = vpop.permute.xlu0 %3204  ;;  %v3552_v44 = vsel %vm3546_vm13, %v3519_v7, %v2949_v29 }
 0x4a4   : > { %v3203_v38 = vpop.permute.xlu1 %3202  ;;  %v3585_v56 = vsel %vm3579_vm14, %v3552_v44, %v3077_v13  ;;  %v9122_v13 = vld [vmem:[#allocation54_spill] sm:$0xff] }
 0x4a5   : > { %2978 = vrot.lane.b32.xlu0 %v2285_v30, %s4732_s19  ;;  %v3617_v5 = vsel %vm3612_vm15, %v3584_v20, %v3203_v38  ;;  %v3618_v54 = vsel %vm3612_vm15, %v3585_v56, %v3205_v51  ;;  %v2255_v38 = vld [vmem:[#allocation2 + $0x121] sm:$0xff]  ;;  %v3424_v51 = vsel %vm1343_vm4, %v7211_v41, %v9122_v13  ;;  %v2288_v56 = vld [vmem:[#allocation2 + $0x12a] sm:$0xff] }
 0x4a6   : > { %3358 = vrot.lane.b32.xlu1 %v2285_v30, %s4735_s27  ;;  %v3456_v30 = vsel %vm1409_vm6, %v3424_v51, %v7351_v35  ;;  %v9123_v20 = vld [vmem:[#allocation114_spill] sm:$0xff]  ;;  %v2257_v51 = vld [vmem:[#allocation2 + $0x139] sm:$0xff] }
 0x4a7   : > { %v2951_v47 = vpop.permute.xlu0 %2950  ;;  %v3488_v57 = vsel %vm1475_vm8, %v3456_v30, %v7506_v39  ;;  %v3425_v41 = vsel %vm1343_vm4, %v7207_v31, %v9123_v20 }
 0x4a8   : > { %v3331_v17 = vpop.permute.xlu1 %3330  ;;  %v3520_v24 = vsel %vm1541_vm10, %v3488_v57, %v7626_v11  ;;  %v3457_v35 = vsel %vm1409_vm6, %v3425_v41, %v7349_v9  ;;  %v2353_v41 = vld [vmem:[#allocation2 + $0x141] sm:$0xff] }
 0x4a9   : > { %v3650_v63 = vsel %vm3645_vm0, %v3617_v5, %v3331_v17  ;;  %2980 = vrot.lane.b32.xlu0 %v2286_v37, %s4732_s19  ;;  %v3553_v32 = vsel %vm3546_vm13, %v3520_v24, %v2951_v47  ;;  %v3489_v11 = vsel %vm1475_vm8, %v3457_v35, %v7504_v23 }
 0x4aa   : > { %3360 = vrot.lane.b32.xlu1 %v2286_v37, %s4735_s27  ;;  %4566 = vmatprep.mubr.msk.f32.mxu1 %vm3694_vm1, %v3650_v63  ;;  %v3521_v7 = vsel %vm1541_vm10, %v3489_v11, %v7624_v58 }
 0x4ab   : > { %v2953_v33 = vpop.permute.xlu0 %2952 }
 0x4ac   : > { %v3333_v19 = vpop.permute.xlu1 %3332  ;;  %v3554_v47 = vsel %vm3546_vm13, %v3521_v7, %v2953_v33 }
 0x4ad   : > { %v3651_v48 = vsel %vm3645_vm0, %v3618_v54, %v3333_v19  ;;  %3108 = vrot.lane.b32.xlu0 %v9120_v12, %s4733_s25  ;;  %v2321_v19 = vld [vmem:[#allocation2 + $0x140] sm:$0xff]  ;;  %v9124_v12 = vld [vmem:[#allocation27_spill] sm:$0xff] }
 0x4ae   : > { %3106 = vrot.lane.b32.xlu1 %v9121_v50, %s4733_s25  ;;  %4567 = vmatmul.mubr.msk.f32.gmra.mrb[2].mxu1 %vm3694_vm1, %v3651_v48  ;;  %v2320_v48 = vld [vmem:[#allocation2 + $0x138] sm:$0xff]  ;;  %v3426_v50 = vsel %vm1343_vm4, %v7223_v26, %v9124_v12 }
 0x4af   : > { %v3081_v29 = vpop.permute.xlu0 %3080 }
 0x4b0   : > { %v3079_v6 = vpop.permute.xlu1 %3078  ;;  %v3587_v9 = vsel %vm3579_vm14, %v3554_v47, %v3081_v29  ;;  %v3458_v29 = vsel %vm1409_vm6, %v3426_v50, %v7359_v46  ;;  %v2259_v50 = vld [vmem:[#allocation2 + $0x151] sm:$0xff] }
 0x4b1   : > { %2854 = vrot.lane.b32.xlu0 %v2255_v38, %s4730_s20  ;;  %v3586_v39 = vsel %vm3579_vm14, %v3553_v32, %v3079_v6 }
 0x4b2   : > { %3234 = vrot.lane.b32.xlu1 %v2255_v38, %s4734_s26  ;;  %v3490_v38 = vsel %vm1475_vm8, %v3458_v29, %v7514_v14 }
 0x4b3   : > { %v3209_v22 = vpop.permute.xlu0 %3208  ;;  %v3522_v30 = vsel %vm1541_vm10, %v3490_v38, %v7634_v3 }
 0x4b4   : > { %v3207_v4 = vpop.permute.xlu1 %3206  ;;  %v3620_v23 = vsel %vm3612_vm15, %v3587_v9, %v3209_v22  ;;  %v9125_v22 = vld [vmem:[#allocation3_spill] sm:$0xff] }
 0x4b5   : > { %3362 = vrot.lane.b32.xlu0 %v2382_v59, %s4735_s27  ;;  %v3619_v17 = vsel %vm3612_vm15, %v3586_v39, %v3207_v4  ;;  %v3427_v26 = vsel %vm1343_vm4, %v7219_v60, %v9125_v22 }
 0x4b6   : > { %3236 = vrot.lane.b32.xlu1 %v2351_v15, %s4734_s26  ;;  %v3459_v46 = vsel %vm1409_vm6, %v3427_v26, %v7357_v1 }
 0x4b7   : > { %v2955_v5 = vpop.permute.xlu0 %2954 }
 0x4b8   : > { %v3335_v37 = vpop.permute.xlu1 %3334  ;;  %v3555_v57 = vsel %vm3546_vm13, %v3522_v30, %v2955_v5  ;;  %v2386_v30 = vld [vmem:[#allocation2 + $0x152] sm:$0xff] }
 0x4b9   : > { %v3652_v31 = vsel %vm3645_vm0, %v3619_v17, %v3335_v37  ;;  %2982 = vrot.lane.b32.xlu0 %v2382_v59, %s4732_s19  ;;  %v3491_v59 = vsel %vm1475_vm8, %v3459_v46, %v7512_v42  ;;  %v2290_v17 = vld [vmem:[#allocation2 + $0x142] sm:$0xff]  ;;  %v9129_v46 = vld [vmem:[#allocation88_spill] sm:$0xff] }
 0x4ba   : > { %2856 = vrot.lane.b32.xlu1 %v2351_v15, %s4730_s20  ;;  %4569 = vmatprep.mubr.msk.f32.mxu1 %vm3694_vm1, %v3652_v31  ;;  %v2384_v15 = vld [vmem:[#allocation2 + $0x13a] sm:$0xff]  ;;  %v3523_v60 = vsel %vm1541_vm10, %v3491_v59, %v7632_v52 }
 0x4bb   : > { %v2957_v63 = vpop.permute.xlu0 %2956  ;;  %v9126_v37 = vld [vmem:[#allocation57_spill] sm:$0xff] }
 0x4bc   : > { %v3337_v44 = vpop.permute.xlu1 %3336  ;;  %v3556_v1 = vsel %vm3546_vm13, %v3523_v60, %v2957_v63  ;;  %v3428_v7 = vsel %vm1343_vm4, %v7235_v28, %v9126_v37 }
 0x4bd   : > { %v3653_v54 = vsel %vm3645_vm0, %v3620_v23, %v3337_v44  ;;  %2984 = vrot.lane.b32.xlu0 %v2288_v56, %s4732_s19  ;;  %v3460_v31 = vsel %vm1409_vm6, %v3428_v7, %v7367_v55  ;;  %v2323_v23 = vld [vmem:[#allocation2 + $0x158] sm:$0xff]  ;;  %v9128_v55 = vld [vmem:[#allocation91_spill] sm:$0xff] }
 0x4be   : > { %3364 = vrot.lane.b32.xlu1 %v2288_v56, %s4735_s27  ;;  %4570 = vmatmul.mubr.msk.f32.gmra.mrb[4].mxu1 %vm3694_vm1, %v3653_v54  ;;  %v3492_v9 = vsel %vm1475_vm8, %v3460_v31, %v7520_v34  ;;  %v2322_v56 = vld [vmem:[#allocation2 + $0x150] sm:$0xff]  ;;  %v9127_v54 = vld [vmem:[#allocation56_spill] sm:$0xff] }
 0x4bf   : > { %v3085_v58 = vpop.permute.xlu0 %3084  ;;  %v3524_v44 = vsel %vm1541_vm10, %v3492_v9, %v7640_v36  ;;  %v3429_v28 = vsel %vm1343_vm4, %v7231_v40, %v9127_v54  ;;  %v2261_v31 = vld [vmem:[#allocation2 + $0x169] sm:$0xff] }
 0x4c0   : > { %v3083_v33 = vpop.permute.xlu1 %3082  ;;  %v3589_v42 = vsel %vm3579_vm14, %v3556_v1, %v3085_v58 }
 0x4c1   : > { %3112 = vrot.lane.b32.xlu0 %v2321_v19, %s4733_s25  ;;  %v3588_v14 = vsel %vm3579_vm14, %v3555_v57, %v3083_v33  ;;  %v3461_v33 = vsel %vm1409_vm6, %v3429_v28, %v9128_v55 }
 0x4c2   : > { %3110 = vrot.lane.b32.xlu1 %v2320_v48, %s4733_s25  ;;  %v3493_v36 = vsel %vm1475_vm8, %v3461_v33, %v7518_v10 }
 0x4c3   : > { %v3213_v6 = vpop.permute.xlu0 %3212  ;;  %v3525_v40 = vsel %vm1541_vm10, %v3493_v36, %v7638_v18  ;;  %v2355_v18 = vld [vmem:[#allocation2 + $0x159] sm:$0xff] }
 0x4c4   : > { %v3211_v13 = vpop.permute.xlu1 %3210  ;;  %v3622_v35 = vsel %vm3612_vm15, %v3589_v42, %v3213_v6  ;;  %v9133_v36 = vld [vmem:[#allocation28_spill] sm:$0xff] }
 0x4c5   : > { %2858 = vrot.lane.b32.xlu0 %v2257_v51, %s4730_s20  ;;  %v3621_v3 = vsel %vm3612_vm15, %v3588_v14, %v3211_v13  ;;  %v3430_v14 = vsel %vm1343_vm4, %v7247_v25, %v9129_v46  ;;  %v2263_v46 = vld [vmem:[#allocation2 + $0x181] sm:$0xff] }
 0x4c6   : > { %3238 = vrot.lane.b32.xlu1 %v2257_v51, %s4734_s26 }
 0x4c7   : > { %v2959_v4 = vpop.permute.xlu0 %2958 }
 0x4c8   : > { %v3339_v24 = vpop.permute.xlu1 %3338  ;;  %v3557_v58 = vsel %vm3546_vm13, %v3524_v44, %v2959_v4  ;;  %v3462_v4 = vsel %vm1409_vm6, %v3430_v14, %v7375_v53  ;;  %v9131_v53 = vld [vmem:[#allocation7_spill] sm:$0xff]  ;;  %v4697_v44 = vld [vmem:[#allocation2 + $0xa8] sm:$0xff]  ;;  %v4699_v14 = vld [vmem:[#allocation2 + $0xc0] sm:$0xff] }
 0x4c9   : > { %v3654_v20 = vsel %vm3645_vm0, %v3621_v3, %v3339_v24  ;;  %3366 = vrot.lane.b32.xlu0 %v2384_v15, %s4735_s27  ;;  %v3494_v3 = vsel %vm1475_vm8, %v3462_v4, %v7528_v21  ;;  %v9134_v4 = vld [vmem:[#allocation117_spill] sm:$0xff] }
 0x4ca   : > { %3240 = vrot.lane.b32.xlu1 %v2353_v41, %s4734_s26  ;;  %4572 = vmatprep.mubr.msk.f32.mxu1 %vm3694_vm1, %v3654_v20  ;;  %v3526_v60 = vsel %vm1541_vm10, %v3494_v3, %v7648_v43  ;;  %v9130_v20 = vld [vmem:[#allocation87_spill] sm:$0xff]  ;;  %v9135_v3 = vld [vmem:[#allocation92_spill] sm:$0xff] }
 0x4cb   : > { %v2961_v32 = vpop.permute.xlu0 %2960  ;;  %v3431_v25 = vsel %vm1343_vm4, %v7243_v62, %v9130_v20 }
 0x4cc   : > { %v3341_v39 = vpop.permute.xlu1 %3340  ;;  %v3558_v6 = vsel %vm3546_vm13, %v3525_v40, %v2961_v32  ;;  %v3463_v1 = vsel %vm1409_vm6, %v3431_v25, %v9131_v53  ;;  %v9137_v53 = vld [vmem:[#allocation146_spill] sm:$0xff] }
 0x4cd   : > { %v3655_v5 = vsel %vm3645_vm0, %v3622_v35, %v3341_v39  ;;  %2986 = vrot.lane.b32.xlu0 %v2384_v15, %s4732_s19  ;;  %v2292_v15 = vld [vmem:[#allocation2 + $0x15a] sm:$0xff]  ;;  %v3495_v32 = vsel %vm1475_vm8, %v3463_v1, %v7526_v27  ;;  %v2325_v39 = vld [vmem:[#allocation2 + $0x170] sm:$0xff] }
 0x4ce   : > { %2860 = vrot.lane.b32.xlu1 %v2353_v41, %s4730_s20  ;;  %4573 = vmatmul.mubr.msk.f32.gmra.mrb[6].mxu1 %vm3694_vm1, %v3655_v5  ;;  %v3527_v62 = vsel %vm1541_vm10, %v3495_v32, %v7646_v45  ;;  %v9138_v32 = vld [vmem:[#allocation44_spill] sm:$0xff] }
 0x4cf   : > { %v3089_v52 = vpop.permute.xlu0 %3088 }
 0x4d0   : > { %v3087_v11 = vpop.permute.xlu1 %3086  ;;  %v3591_v38 = vsel %vm3579_vm14, %v3558_v6, %v3089_v52  ;;  %v2324_v52 = vld [vmem:[#allocation2 + $0x168] sm:$0xff]  ;;  %v2294_v6 = vld [vmem:[#allocation2 + $0x172] sm:$0xff] }
 0x4d1   : > { %2988 = vrot.lane.b32.xlu0 %v2290_v17, %s4732_s19  ;;  %v3590_v34 = vsel %vm3579_vm14, %v3557_v58, %v3087_v11 }
 0x4d2   : > { %3368 = vrot.lane.b32.xlu1 %v2290_v17, %s4735_s27 }
 0x4d3   : > { %v3217_v47 = vpop.permute.xlu0 %3216 }
 0x4d4   : > { %v3215_v63 = vpop.permute.xlu1 %3214  ;;  %v3624_v13 = vsel %vm3612_vm15, %v3591_v38, %v3217_v47 }
 0x4d5   : > { %3116 = vrot.lane.b32.xlu0 %v2323_v23, %s4733_s25  ;;  %v3623_v48 = vsel %vm3612_vm15, %v3590_v34, %v3215_v63  ;;  %v2388_v63 = vld [vmem:[#allocation2 + $0x16a] sm:$0xff] }
 0x4d6   : > { %3114 = vrot.lane.b32.xlu1 %v2322_v56, %s4733_s25  ;;  %v2357_v23 = vld [vmem:[#allocation2 + $0x171] sm:$0xff]  ;;  %v9132_v56 = vld [vmem:[#allocation22_spill] sm:$0xff] }
 0x4d7   : > { %v2963_v19 = vpop.permute.xlu0 %2962  ;;  %v3432_v54 = vsel %vm1343_vm4, %v4697_v44, %v9132_v56 }
 0x4d8   : > { %v3343_v12 = vpop.permute.xlu1 %3342  ;;  %v3559_v41 = vsel %vm3546_vm13, %v3526_v60, %v2963_v19  ;;  %v3464_v28 = vsel %vm1409_vm6, %v3432_v54, %v7383_v61  ;;  %v4698_v19 = vld [vmem:[#allocation2 + $0xb0] sm:$0xff] }
 0x4d9   : > { %v3656_v29 = vsel %vm3645_vm0, %v3623_v48, %v3343_v12  ;;  %2862 = vrot.lane.b32.xlu0 %v2259_v50, %s4730_s20  ;;  %v3496_v55 = vsel %vm1475_vm8, %v3464_v28, %v7536_v8  ;;  %v3433_v48 = vsel %vm1343_vm4, %v4698_v19, %v9133_v36  ;;  %v9136_v60 = vld [vmem:[#allocation123_spill] sm:$0xff]  ;;  %v9142_v19 = vld [vmem:[#allocation160_spill] sm:$0xff] }
 0x4da   : > { %3242 = vrot.lane.b32.xlu1 %v2259_v50, %s4734_s26  ;;  %4575 = vmatprep.mubr.msk.f32.mxu1 %vm3694_vm1, %v3656_v29  ;;  %v3528_v34 = vsel %vm1541_vm10, %v3496_v55, %v7656_v16  ;;  %v3465_v61 = vsel %vm1409_vm6, %v3433_v48, %v7381_v2  ;;  %v2391_v54 = vld [vmem:[#allocation2 + $0x18a] sm:$0xff]  ;;  %v2328_v48 = vld [vmem:[#allocation2 + $0x198] sm:$0xff] }
 0x4db   : > { %v2965_v10 = vpop.permute.xlu0 %2964  ;;  %v3497_v40 = vsel %vm1475_vm8, %v3465_v61, %v7534_v49 }
 0x4dc   : > { %v3345_v51 = vpop.permute.xlu1 %3344  ;;  %v3560_v11 = vsel %vm3546_vm13, %v3527_v62, %v2965_v10  ;;  %v3529_v38 = vsel %vm1541_vm10, %v3497_v40, %v7654_v0  ;;  %v2326_v0 = vld [vmem:[#allocation2 + $0x180] sm:$0xff] }
 0x4dd   : > { %v3657_v22 = vsel %vm3645_vm0, %v3624_v13, %v3345_v51  ;;  %3370 = vrot.lane.b32.xlu0 %v2386_v30, %s4735_s27 }
 0x4de   : > { %3244 = vrot.lane.b32.xlu1 %v2355_v18, %s4734_s26  ;;  %4576 = vmatmul.mubr.msk.f32.gmra.mrb[8].mxu1 %vm3694_vm1, %v3657_v22  ;;  %v2327_v22 = vld [vmem:[#allocation2 + $0x188] sm:$0xff] }
 0x4df   : > { %v3093_v26 = vpop.permute.xlu0 %3092 }
 0x4e0   : > { %v3091_v57 = vpop.permute.xlu1 %3090  ;;  %v3593_v27 = vsel %vm3579_vm14, %v3560_v11, %v3093_v26  ;;  %v9140_v11 = vld [vmem:[#allocation165_spill] sm:$0xff] }
 0x4e1   : > { %2990 = vrot.lane.b32.xlu0 %v2386_v30, %s4732_s19  ;;  %v3592_v21 = vsel %vm3579_vm14, %v3559_v41, %v3091_v57  ;;  %v2390_v41 = vld [vmem:[#allocation2 + $0x182] sm:$0xff] }
 0x4e2   : > { %2864 = vrot.lane.b32.xlu1 %v2355_v18, %s4730_s20 }
 0x4e3   : > { %v3221_v59 = vpop.permute.xlu0 %3220 }
 0x4e4   : > { %v3219_v24 = vpop.permute.xlu1 %3218  ;;  %v3626_v37 = vsel %vm3612_vm15, %v3593_v27, %v3221_v59  ;;  %v3434_v59 = vsel %vm1343_vm4, %v4699_v14, %v9134_v4  ;;  %v9149_v4 = vld [vmem:[#allocation12_spill] sm:$0xff] }
 0x4e5   : > { %2992 = vrot.lane.b32.xlu0 %v2292_v15, %s4732_s19  ;;  %v3625_v43 = vsel %vm3612_vm15, %v3592_v21, %v3219_v24  ;;  %v3466_v24 = vsel %vm1409_vm6, %v3434_v59, %v9135_v3  ;;  %v2359_v21 = vld [vmem:[#allocation2 + $0x189] sm:$0xff] }
 0x4e6   : > { %3372 = vrot.lane.b32.xlu1 %v2292_v15, %s4735_s27  ;;  %v3498_v20 = vsel %vm1475_vm8, %v3466_v24, %v9136_v60  ;;  %v2299_v24 = vld [vmem:[#allocation2 + $0x38] sm:$0xff] }
 0x4e7   : > { %v2967_v42 = vpop.permute.xlu0 %2966  ;;  %v3530_v1 = vsel %vm1541_vm10, %v3498_v20, %v9137_v53  ;;  %v2360_v60 = vld [vmem:[#allocation2 + $0x199] sm:$0xff] }
 0x4e8   : > { %v3347_v35 = vpop.permute.xlu1 %3346  ;;  %v3561_v12 = vsel %vm3546_vm13, %v3528_v34, %v2967_v42  ;;  %v4700_v42 = vld [vmem:[#allocation2 + $0xc8] sm:$0xff]  ;;  %v4701_v34 = vld [vmem:[#allocation2 + $0xd8] sm:$0xff] }
 0x4e9   : > { %v3658_v5 = vsel %vm3645_vm0, %v3625_v43, %v3347_v35  ;;  %3120 = vrot.lane.b32.xlu0 %v2325_v39, %s4733_s25  ;;  %v3435_v43 = vsel %vm1343_vm4, %v4700_v42, %v9138_v32  ;;  %v9139_v39 = vld [vmem:[#allocation25_spill] sm:$0xff]  ;;  %v3436_v36 = vsel %vm1343_vm4, %v4701_v34, %v9142_v19  ;;  %v9154_v34 = vld [vmem:[#allocation58_spill] sm:$0xff] }
 0x4ea   : > { %3118 = vrot.lane.b32.xlu1 %v2324_v52, %s4733_s25  ;;  %4578 = vmatprep.mubr.msk.f32.mxu1 %vm3694_vm1, %v3658_v5  ;;  %v3467_v62 = vsel %vm1409_vm6, %v3435_v43, %v9139_v39  ;;  %v2361_v42 = vld [vmem:[#allocation2 + $0x1a1] sm:$0xff] }
 0x4eb   : > { %v2969_v17 = vpop.permute.xlu0 %2968  ;;  %v3499_v27 = vsel %vm1475_vm8, %v3467_v62, %v9140_v11  ;;  %v9150_v39 = vld [vmem:[#allocation138_spill] sm:$0xff] }
 0x4ec   : > { %v3349_v7 = vpop.permute.xlu1 %3348  ;;  %v3562_v13 = vsel %vm3546_vm13, %v3529_v38, %v2969_v17  ;;  %v2298_v38 = vld [vmem:[#allocation2 + $0x30] sm:$0xff] }
 0x4ed   : > { %v3659_v45 = vsel %vm3645_vm0, %v3626_v37, %v3349_v7  ;;  %2866 = vrot.lane.b32.xlu0 %v2261_v31, %s4730_s20  ;;  %v2265_v7 = vld [vmem:[#allocation2 + $0x1a] sm:$0xff] }
 0x4ee   : > { %3246 = vrot.lane.b32.xlu1 %v2261_v31, %s4734_s26  ;;  %4579 = vmatmul.mubr.msk.f32.gmra.mrb[10].mxu1 %vm3694_vm1, %v3659_v45  ;;  %v9141_v31 = vld [vmem:[#allocation66_spill] sm:$0xff] }
 0x4ef   : > { %v3097_v47 = vpop.permute.xlu0 %3096  ;;  %v3531_v45 = vsel %vm1541_vm10, %v3499_v27, %v9141_v31  ;;  %v2392_v27 = vld [vmem:[#allocation2 + $0x19a] sm:$0xff] }
 0x4f0   : > { %v3095_v9 = vpop.permute.xlu1 %3094  ;;  %v3595_v2 = vsel %vm3579_vm14, %v3562_v13, %v3097_v47  ;;  %v9146_v13 = vld [vmem:[#allocation137_spill] sm:$0xff] }
 0x4f1   : > { %3374 = vrot.lane.b32.xlu0 %v2388_v63, %s4735_s27  ;;  %v3594_v50 = vsel %vm3579_vm14, %v3561_v12, %v3095_v9  ;;  %v9143_v12 = vld [vmem:[#allocation29_spill] sm:$0xff] }
 0x4f2   : > { %3248 = vrot.lane.b32.xlu1 %v2357_v23, %s4734_s26  ;;  %v3468_v61 = vsel %vm1409_vm6, %v3436_v36, %v9143_v12  ;;  %v9153_v31 = vld [vmem:[#allocation13_spill] sm:$0xff]  ;;  %v9155_v36 = vld [vmem:[#allocation163_spill] sm:$0xff] }
 0x4f3   : > { %v3225_v58 = vpop.permute.xlu0 %3224 }
 0x4f4   : > { %v3223_v33 = vpop.permute.xlu1 %3222  ;;  %v3628_v51 = vsel %vm3612_vm15, %v3595_v2, %v3225_v58 }
 0x4f5   : > { %2994 = vrot.lane.b32.xlu0 %v2388_v63, %s4732_s19  ;;  %v3627_v16 = vsel %vm3612_vm15, %v3594_v50, %v3223_v33  ;;  %v2266_v33 = vld [vmem:[#allocation2 + $0x22] sm:$0xff] }
 0x4f6   : > { %2868 = vrot.lane.b32.xlu1 %v2357_v23, %s4730_s20 }
 0x4f7   : > { %v2971_v8 = vpop.permute.xlu0 %2970 }
 0x4f8   : > { %v3351_v29 = vpop.permute.xlu1 %3350  ;;  %v3563_v35 = vsel %vm3546_vm13, %v3530_v1, %v2971_v8  ;;  %v9144_v8 = vld [vmem:[#allocation166_spill] sm:$0xff] }
 0x4f9   : > { %v3660_v10 = vsel %vm3645_vm0, %v3627_v16, %v3351_v29  ;;  %2996 = vrot.lane.b32.xlu0 %v2294_v6, %s4732_s19  ;;  %v3500_v40 = vsel %vm1475_vm8, %v3468_v61, %v9144_v8  ;;  %v9145_v29 = vld [vmem:[#allocation67_spill] sm:$0xff]  ;;  %v9156_v61 = vld [vmem:[#allocation112_spill] sm:$0xff] }
 0x4fa   : > { %3376 = vrot.lane.b32.xlu1 %v2294_v6, %s4735_s27  ;;  %4581 = vmatprep.mubr.msk.f32.mxu1 %vm3694_vm1, %v3660_v10  ;;  %v3532_v6 = vsel %vm1541_vm10, %v3500_v40, %v9145_v29  ;;  %v4702_v10 = vld [vmem:[#allocation2 + $0xe0] sm:$0xff]  ;;  %v9158_v40 = vld [vmem:[#allocation74_spill] sm:$0xff]  ;;  %v9159_v29 = vld [vmem:[#allocation64_spill] sm:$0xff] }
 0x4fb   : > { %v2973_v49 = vpop.permute.xlu0 %2972  ;;  %v3437_v2 = vsel %vm1343_vm4, %v4702_v10, %v9146_v13  ;;  %v9160_v10 = vld [vmem:[#allocation97_spill] sm:$0xff] }
 0x4fc   : > { %v3353_v30 = vpop.permute.xlu1 %3352  ;;  %v3564_v9 = vsel %vm3546_vm13, %v3531_v45, %v2973_v49 }
 0x4fd   : > { %v3661_v18 = vsel %vm3645_vm0, %v3628_v51, %v3353_v30  ;;  %3124 = vrot.lane.b32.xlu0 %v2327_v22, %s4733_s25  ;;  %v2329_v51 = vld [vmem:[#allocation2 + $0x1a0] sm:$0xff]  ;;  %v9147_v30 = vld [vmem:[#allocation120_spill] sm:$0xff] }
 0x4fe   : > { %3122 = vrot.lane.b32.xlu1 %v2326_v0, %s4733_s25  ;;  %4582 = vmatmul.mubr.msk.f32.gmra.mrb[12].mxu1 %vm3694_vm1, %v3661_v18  ;;  %v3469_v22 = vsel %vm1409_vm6, %v3437_v2, %v9147_v30 }
 0x4ff   : > { %v3101_v26 = vpop.permute.xlu0 %3100 }
 0x500   : > { %v3099_v57 = vpop.permute.xlu1 %3098  ;;  %v3597_v63 = vsel %vm3579_vm14, %v3564_v9, %v3101_v26  ;;  %v9148_v26 = vld [vmem:[#allocation143_spill] sm:$0xff] }
 0x501   : > { %2870 = vrot.lane.b32.xlu0 %v2263_v46, %s4730_s20  ;;  %v3596_v5 = vsel %vm3579_vm14, %v3563_v35, %v3099_v57  ;;  %v3501_v57 = vsel %vm1475_vm8, %v3469_v22, %v9148_v26  ;;  %v4703_v35 = vld [vmem:[#allocation2 + $0xf0] sm:$0xff] }
 0x502   : > { %3250 = vrot.lane.b32.xlu1 %v2263_v46, %s4734_s26  ;;  %v3533_v59 = vsel %vm1541_vm10, %v3501_v57, %v9149_v4  ;;  %v3438_v62 = vsel %vm1343_vm4, %v4703_v35, %v9150_v39  ;;  %v9169_v35 = vld [vmem:[#allocation43_spill] sm:$0xff] }
 0x503   : > { %v3229_v15 = vpop.permute.xlu0 %3228  ;;  %v1991_v39 = vadd.f32 %v9156_v61, %v9169_v35 }
 0x504   : > { %v3227_v25 = vpop.permute.xlu1 %3226  ;;  %v3630_v44 = vsel %vm3612_vm15, %v3597_v63, %v3229_v15  ;;  %v2362_v63 = vld [vmem:[#allocation2 + $0x32] sm:$0xff] }
 0x505   : > { %3378 = vrot.lane.b32.xlu0 %v2390_v41, %s4735_s27  ;;  %v3629_v17 = vsel %vm3612_vm15, %v3596_v5, %v3227_v25  ;;  %v2331_v5 = vld [vmem:[#allocation2 + $0x39] sm:$0xff] }
 0x506   : > { %3252 = vrot.lane.b32.xlu1 %v2359_v21, %s4734_s26 }
 0x507   : > { %v2975_v52 = vpop.permute.xlu0 %2974 }
 0x508   : > { %v3355_v37 = vpop.permute.xlu1 %3354  ;;  %v3565_v49 = vsel %vm3546_vm13, %v3532_v6, %v2975_v52  ;;  %v9151_v52 = vld [vmem:[#allocation121_spill] sm:$0xff] }
 0x509   : > { %v3662_v47 = vsel %vm3645_vm0, %v3629_v17, %v3355_v37  ;;  %2938 = vrot.lane.b32.xlu0 %v2265_v7, %s4732_s19  ;;  %v3470_v11 = vsel %vm1409_vm6, %v3438_v62, %v9151_v52  ;;  %v9152_v17 = vld [vmem:[#allocation144_spill] sm:$0xff] }
 0x50a   : > { %2872 = vrot.lane.b32.xlu1 %v2359_v21, %s4730_s20  ;;  %4584 = vmatprep.mubr.msk.f32.mxu1 %vm3694_vm1, %v3662_v47  ;;  %v2330_v21 = vld [vmem:[#allocation2 + $0x31] sm:$0xff]  ;;  %v3502_v37 = vsel %vm1475_vm8, %v3470_v11, %v9152_v17  ;;  %s4736_s20 = smov 120  }
 0x50b   : > { %v2977_v23 = vpop.permute.xlu0 %2976  ;;  %v3534_v45 = vsel %vm1541_vm10, %v3502_v37, %v9153_v31 }
 0x50c   : > { %v3357_v56 = vpop.permute.xlu1 %3356  ;;  %v3566_v15 = vsel %vm3546_vm13, %v3533_v59, %v2977_v23 }
 0x50d   : > { %v3663_v28 = vsel %vm3645_vm0, %v3630_v44, %v3357_v56  ;;  %3380 = vrot.lane.b32.xlu0 %v2391_v54, %s4735_s27  ;;  %v2393_v44 = vld [vmem:[#allocation2 + $0x1a2] sm:$0xff] }
 0x50e   : > { %2998 = vrot.lane.b32.xlu1 %v2390_v41, %s4732_s19  ;;  %4585 = vmatmul.mubr.msk.f32.gmra.mrb[14].mxu1 %vm3694_vm1, %v3663_v28 }
 0x50f   : > { %v3105_v58 = vpop.permute.xlu0 %3104 }
 0x510   : > { %v3103_v55 = vpop.permute.xlu1 %3102  ;;  %v3599_v20 = vsel %vm3579_vm14, %v3566_v15, %v3105_v58 }
 0x511   : > { %3000 = vrot.lane.b32.xlu0 %v2391_v54, %s4732_s19  ;;  %v3598_v18 = vsel %vm3579_vm14, %v3565_v49, %v3103_v55  ;;  %v2363_v55 = vld [vmem:[#allocation2 + $0x3a] sm:$0xff]  ;;  %v9161_v49 = vld [vmem:[#allocation75_spill] sm:$0xff] }
 0x512   : > { %2940 = vrot.lane.b32.xlu1 %v2266_v33, %s4732_s19  ;;  %v4704_v33 = vld [vmem:[#allocation2 + $0xf8] sm:$0xff] }
 0x513   : > { %v3233_v50 = vpop.permute.xlu0 %3232  ;;  %v3439_v19 = vsel %vm1343_vm4, %v4704_v33, %v9154_v34  ;;  %v9175_v33 = vld [vmem:[#allocation107_spill] sm:$0xff] }
 0x514   : > { %v3231_v16 = vpop.permute.xlu1 %3230  ;;  %v3632_v41 = vsel %vm3612_vm15, %v3599_v20, %v3233_v50  ;;  %v9157_v50 = vld [vmem:[#allocation42_spill] sm:$0xff]  ;;  %v9165_v20 = vld [vmem:[#allocation59_spill] sm:$0xff]  ;;  %v1995_v34 = vadd.f32 %v9156_v61, %v9175_v33 }
 0x515   : > { %3126 = vrot.lane.b32.xlu0 %v2328_v48, %s4733_s25  ;;  %v3631_v46 = vsel %vm3612_vm15, %v3598_v18, %v3231_v16  ;;  %v3471_v48 = vsel %vm1409_vm6, %v3439_v19, %v9155_v36  ;;  %v1986_v8 = vadd.f32 %v9157_v50, %v9156_v61  ;;  %v1985_v16 = vadd.f32 %v9156_v61, %v9158_v40  ;;  %v9162_v18 = vld [vmem:[#allocation105_spill] sm:$0xff]  ;;  %v9176_v19 = vld [vmem:[#allocation10_spill] sm:$0xff] }
 0x516   : > { %3066 = vrot.lane.b32.xlu1 %v2298_v38, %s4733_s25  ;;  %v3503_v6 = vsel %vm1475_vm8, %v3471_v48, %v9159_v29 }
 0x517   : > { %v2979_v0 = vpop.permute.xlu0 %2978  ;;  %v3535_v13 = vsel %vm1541_vm10, %v3503_v6, %v9160_v10  ;;  %v9178_v6 = vld [vmem:[#allocation134_spill] sm:$0xff] }
 0x518   : > { %v3359_v14 = vpop.permute.xlu1 %3358  ;;  %v3567_v9 = vsel %vm3546_vm13, %v3534_v45, %v2979_v0  ;;  %v1987_v0 = vadd.f32 %v9156_v61, %v9162_v18  ;;  %v9171_v45 = vld [vmem:[#allocation76_spill] sm:$0xff]  ;;  %v1997_v10 = vadd.f32 %v9156_v61, %v9178_v6 }
 0x519   : > { %v3664_v3 = vsel %vm3645_vm0, %v3631_v46, %v3359_v14  ;;  %3128 = vrot.lane.b32.xlu0 %v2329_v51, %s4733_s25  ;;  %v1988_v51 = vadd.f32 %v9161_v49, %v9156_v61  ;;  %v9163_v14 = vld [vmem:[#allocation40_spill] sm:$0xff]  ;;  %v9179_v49 = vld [vmem:[#allocation46_spill] sm:$0xff] }
 0x51a   : > { %3068 = vrot.lane.b32.xlu1 %v2299_v24, %s4733_s25  ;;  %4587 = vmatprep.mubr.msk.f32.mxu1 %vm3694_vm1, %v3664_v3  ;;  %v1990_v4 = vadd.f32 %v9163_v14, %v9156_v61  ;;  %v9164_v3 = vld [vmem:[#allocation106_spill] sm:$0xff] }
 0x51b   : > { %v2981_v25 = vpop.permute.xlu0 %2980  ;;  %v1989_v24 = vadd.f32 %v9156_v61, %v9164_v3  ;;  %v9182_v14 = vld [vmem:[#allocation142_spill] sm:$0xff] }
 0x51c   : > { %v3361_v53 = vpop.permute.xlu1 %3360  ;;  %v3568_v2 = vsel %vm3546_vm13, %v3535_v13, %v2981_v25 }
 0x51d   : > { %v3665_v1 = vsel %vm3645_vm0, %v3632_v41, %v3361_v53  ;;  %3254 = vrot.lane.b32.xlu0 %v2360_v60, %s4734_s26  ;;  %v4705_v60 = vld [vmem:[#allocation2 + $0x108] sm:$0xff]  ;;  %v9166_v41 = vld [vmem:[#allocation164_spill] sm:$0xff] }
 0x51e   : > { %3194 = vrot.lane.b32.xlu1 %v2330_v21, %s4734_s26  ;;  %4588 = vmatmul.mubr.msk.f32.gmra.mrb[16].mxu1 %vm3694_vm1, %v3665_v1  ;;  %v3440_v25 = vsel %vm1343_vm4, %v4705_v60, %v9165_v20  ;;  %v9167_v1 = vld [vmem:[#allocation41_spill] sm:$0xff]  ;;  %v9185_v20 = vld [vmem:[#allocation78_spill] sm:$0xff] }
 0x51f   : > { %v3109_v32 = vpop.permute.xlu0 %3108  ;;  %v3472_v53 = vsel %vm1409_vm6, %v3440_v25, %v9166_v41  ;;  %v1992_v21 = vadd.f32 %v9167_v1, %v9156_v61  ;;  %v2001_v25 = vadd.f32 %v9156_v61, %v9185_v20 }
 0x520   : > { %v3107_v43 = vpop.permute.xlu1 %3106  ;;  %v3601_v30 = vsel %vm3579_vm14, %v3568_v2, %v3109_v32 }
 0x521   : > { %3256 = vrot.lane.b32.xlu0 %v2361_v42, %s4734_s26  ;;  %v3600_v23 = vsel %vm3579_vm14, %v3567_v9, %v3107_v43  ;;  %v9168_v42 = vld [vmem:[#allocation65_spill] sm:$0xff] }
 0x522   : > { %3196 = vrot.lane.b32.xlu1 %v2331_v5, %s4734_s26  ;;  %v3504_v32 = vsel %vm1475_vm8, %v3472_v53, %v9168_v42  ;;  %v9186_v42 = vld [vmem:[#allocation79_spill] sm:$0xff] }
 0x523   : > { %v2855_v7 = vpop.permute.xlu0 %2854 }
 0x524   : > { %v3235_v47 = vpop.permute.xlu1 %3234  ;;  %v3536_v62 = vsel %vm1541_vm10, %v3504_v32, %v2855_v7  ;;  %v2004_v32 = vadd.f32 %v9186_v42, %v9156_v61  ;;  %v9204_v42 = vld [vmem:[#allocation23_spill] sm:$0xff] }
 0x525   : > { %3382 = vrot.lane.b32.xlu0 %v2392_v27, %s4735_s27  ;;  %v3633_v56 = vsel %vm3612_vm15, %v3600_v23, %v3235_v47  ;;  %v9170_v27 = vld [vmem:[#allocation133_spill] sm:$0xff]  ;;  %v1993_v47 = vadd.f32 %v9156_v61, %v9171_v45  ;;  %v9172_v23 = vld [vmem:[#allocation4_spill] sm:$0xff]  ;;  %v9190_v45 = vld [vmem:[#allocation62_spill] sm:$0xff] }
 0x526   : > { %3322 = vrot.lane.b32.xlu1 %v2362_v63, %s4735_s27  ;;  %v1994_v17 = vadd.f32 %v9170_v27, %v9156_v61  ;;  %v4706_v63 = vld [vmem:[#allocation2 + $0x110] sm:$0xff]  ;;  %v9188_v27 = vld [vmem:[#allocation89_spill] sm:$0xff] }
 0x527   : > { %v3363_v54 = vpop.permute.xlu0 %3362 }
 0x528   : > { %v3666_v28 = vsel %vm3645_vm0, %v3633_v56, %v3363_v54  ;;  %v3237_v58 = vpop.permute.xlu1 %3236  ;;  %v9173_v56 = vld [vmem:[#allocation77_spill] sm:$0xff] }
 0x529   : > { %3384 = vrot.lane.b32.xlu0 %v2393_v44, %s4735_s27  ;;  %4590 = vmatprep.mubr.msk.f32.mxu1 %vm3694_vm1, %v3666_v28  ;;  %v3634_v26 = vsel %vm3612_vm15, %v3601_v30, %v3237_v58  ;;  %v3441_v44 = vsel %vm1343_vm4, %v4706_v63, %v9172_v23  ;;  %v1996_v54 = vadd.f32 %v9173_v56, %v9156_v61  ;;  %v9174_v28 = vld [vmem:[#allocation141_spill] sm:$0xff]  ;;  %v9192_v23 = vld [vmem:[#allocation95_spill] sm:$0xff] }
 0x52a   : > { %3324 = vrot.lane.b32.xlu1 %v2363_v55, %s4735_s27  ;;  %v3473_v58 = vsel %vm1409_vm6, %v3441_v44, %v9174_v28 }
 0x52b   : > { %v2983_v12 = vpop.permute.xlu0 %2982  ;;  %v3505_v36 = vsel %vm1475_vm8, %v3473_v58, %v9176_v19  ;;  %v9193_v58 = vld [vmem:[#allocation49_spill] sm:$0xff]  ;;  %v9194_v19 = vld [vmem:[#allocation80_spill] sm:$0xff] }
 0x52c   : > { %v2857_v38 = vpop.permute.xlu1 %2856  ;;  %v3569_v52 = vsel %vm3546_vm13, %v3536_v62, %v2983_v12  ;;  %v9187_v62 = vld [vmem:[#allocation26_spill] sm:$0xff] }
 0x52d   : > { %4082 = vrot.lane.b32.xlu0 %v1986_v8, %s4736_s20  ;;  %v3537_v12 = vsel %vm1541_vm10, %v3505_v36, %v2857_v38  ;;  %v9177_v8 = vld [vmem:[#allocation108_spill] sm:$0xff]  ;;  %v2007_v36 = vadd.f32 %v9156_v61, %v9194_v19  ;;  %v9211_v19 = vld [vmem:[#allocation155_spill] sm:$0xff] }
 0x52e   : > { %4080 = vrot.lane.b32.xlu1 %v1985_v16, %s4736_s20  ;;  %v1998_v40 = vadd.f32 %v9177_v8, %v9156_v61  ;;  %v9195_v8 = vld [vmem:[#allocation81_spill] sm:$0xff] }
 0x52f   : > { %v2985_v22 = vpop.permute.xlu0 %2984 }
 0x530   : > { %v3365_v57 = vpop.permute.xlu1 %3364  ;;  %v3570_v50 = vsel %vm3546_vm13, %v3537_v12, %v2985_v22  ;;  %v9180_v22 = vld [vmem:[#allocation135_spill] sm:$0xff] }
 0x531   : > { %v3667_v46 = vsel %vm3645_vm0, %v3634_v26, %v3365_v57  ;;  %4086 = vrot.lane.b32.xlu0 %v1988_v51, %s4736_s20  ;;  %v2000_v51 = vadd.f32 %v9179_v49, %v9156_v61  ;;  %v1999_v18 = vadd.f32 %v9156_v61, %v9180_v22  ;;  %v4707_v26 = vld [vmem:[#allocation2 + $0x120] sm:$0xff]  ;;  %v9198_v49 = vld [vmem:[#allocation63_spill] sm:$0xff] }
 0x532   : > { %4084 = vrot.lane.b32.xlu1 %v1987_v0, %s4736_s20  ;;  %4591 = vmatmul.mubr.msk.f32.gmra.mrb[18].mxu1 %vm3694_vm1, %v3667_v46  ;;  %v9181_v57 = vld [vmem:[#allocation5_spill] sm:$0xff] }
 0x533   : > { %v3113_v59 = vpop.permute.xlu0 %3112  ;;  %v3442_v46 = vsel %vm1343_vm4, %v4707_v26, %v9181_v57  ;;  %v9201_v57 = vld [vmem:[#allocation50_spill] sm:$0xff] }
 0x534   : > { %v3111_v15 = vpop.permute.xlu1 %3110  ;;  %v3603_v16 = vsel %vm3579_vm14, %v3570_v50, %v3113_v59  ;;  %v9183_v59 = vld [vmem:[#allocation47_spill] sm:$0xff] }
 0x535   : > { %4090 = vrot.lane.b32.xlu0 %v1990_v4, %s4736_s20  ;;  %v3602_v11 = vsel %vm3579_vm14, %v3569_v52, %v3111_v15  ;;  %v3474_v4 = vsel %vm1409_vm6, %v3442_v46, %v9182_v14  ;;  %v2002_v3 = vadd.f32 %v9183_v59, %v9156_v61  ;;  %v2011_v46 = vadd.f32 %v9156_v61, %v9201_v57 }
 0x536   : > { %4088 = vrot.lane.b32.xlu1 %v1989_v24, %s4736_s20  ;;  %v9184_v24 = vld [vmem:[#allocation11_spill] sm:$0xff] }
 0x537   : > { %v2859_v43 = vpop.permute.xlu0 %2858  ;;  %v3506_v15 = vsel %vm1475_vm8, %v3474_v4, %v9184_v24  ;;  %v9202_v24 = vld [vmem:[#allocation136_spill] sm:$0xff] }
 0x538   : > { %v3239_v5 = vpop.permute.xlu1 %3238  ;;  %v3538_v41 = vsel %vm1541_vm10, %v3506_v15, %v2859_v43  ;;  %v2014_v15 = vadd.f32 %v9202_v24, %v9156_v61 }
 0x539   : > { %4094 = vrot.lane.b32.xlu0 %v1992_v21, %s4736_s20  ;;  %v3635_v37 = vsel %vm3612_vm15, %v3602_v11, %v3239_v5  ;;  %v2003_v5 = vadd.f32 %v9156_v61, %v9187_v62  ;;  %v4708_v11 = vld [vmem:[#allocation2 + $0x128] sm:$0xff]  ;;  %v9206_v62 = vld [vmem:[#allocation8_spill] sm:$0xff] }
 0x53a   : > { %4092 = vrot.lane.b32.xlu1 %v1991_v39, %s4736_s20 }
 0x53b   : > { %v3367_v31 = vpop.permute.xlu0 %3366 }
 0x53c   : > { %v3668_v7 = vsel %vm3645_vm0, %v3635_v37, %v3367_v31  ;;  %v3241_v9 = vpop.permute.xlu1 %3240  ;;  %v9189_v37 = vld [vmem:[#allocation109_spill] sm:$0xff] }
 0x53d   : > { %4098 = vrot.lane.b32.xlu0 %v1994_v17, %s4736_s20  ;;  %4593 = vmatprep.mubr.msk.f32.mxu1 %vm3694_vm1, %v3668_v7  ;;  %v3636_v13 = vsel %vm3612_vm15, %v3603_v16, %v3241_v9  ;;  %v3443_v17 = vsel %vm1343_vm4, %v4708_v11, %v9188_v27  ;;  %v2006_v31 = vadd.f32 %v9189_v37, %v9156_v61  ;;  %v9191_v9 = vld [vmem:[#allocation48_spill] sm:$0xff] }
 0x53e   : > { %4096 = vrot.lane.b32.xlu1 %v1993_v47, %s4736_s20  ;;  %v3475_v47 = vsel %vm1409_vm6, %v3443_v17, %v9190_v45  ;;  %v2005_v63 = vadd.f32 %v9156_v61, %v9191_v9  ;;  %v9208_v27 = vld [vmem:[#allocation32_spill] sm:$0xff] }
 0x53f   : > { %v2987_v55 = vpop.permute.xlu0 %2986  ;;  %v3507_v44 = vsel %vm1475_vm8, %v3475_v47, %v9192_v23 }
 0x540   : > { %v2861_v48 = vpop.permute.xlu1 %2860  ;;  %v3571_v1 = vsel %vm3546_vm13, %v3538_v41, %v2987_v55  ;;  %v2008_v55 = vadd.f32 %v9193_v58, %v9156_v61  ;;  %v9203_v41 = vld [vmem:[#allocation51_spill] sm:$0xff] }
 0x541   : > { %4102 = vrot.lane.b32.xlu0 %v1996_v54, %s4736_s20  ;;  %v3539_v54 = vsel %vm1541_vm10, %v3507_v44, %v2861_v48 }
 0x542   : > { %4100 = vrot.lane.b32.xlu1 %v1995_v34, %s4736_s20 }
 0x543   : > { %v2989_v29 = vpop.permute.xlu0 %2988 }
 0x544   : > { %v3369_v2 = vpop.permute.xlu1 %3368  ;;  %v3572_v28 = vsel %vm3546_vm13, %v3539_v54, %v2989_v29  ;;  %v9196_v29 = vld [vmem:[#allocation110_spill] sm:$0xff]  ;;  %v4711_v54 = vld [vmem:[#allocation2 + $0x150] sm:$0xff] }
 0x545   : > { %v3669_v38 = vsel %vm3645_vm0, %v3636_v13, %v3369_v2  ;;  %4106 = vrot.lane.b32.xlu0 %v1998_v40, %s4736_s20  ;;  %v2010_v40 = vadd.f32 %v9195_v8, %v9156_v61  ;;  %v2009_v6 = vadd.f32 %v9156_v61, %v9196_v29  ;;  %v4709_v13 = vld [vmem:[#allocation2 + $0x138] sm:$0xff]  ;;  %v9197_v2 = vld [vmem:[#allocation118_spill] sm:$0xff] }
 0x546   : > { %4104 = vrot.lane.b32.xlu1 %v1997_v10, %s4736_s20  ;;  %4594 = vmatmul.mubr.msk.f32.gmra.mrb[20].mxu1 %vm3694_vm1, %v3669_v38  ;;  %v3444_v38 = vsel %vm1343_vm4, %v4709_v13, %v9197_v2  ;;  %v4712_v13 = vld [vmem:[#allocation2 + $0x158] sm:$0xff]  ;;  %v9212_v2 = vld [vmem:[#allocation161_spill] sm:$0xff] }
 0x547   : > { %v3117_v30 = vpop.permute.xlu0 %3116 }
 0x548   : > { %v3115_v0 = vpop.permute.xlu1 %3114  ;;  %v3605_v33 = vsel %vm3579_vm14, %v3572_v28, %v3117_v30  ;;  %v9199_v30 = vld [vmem:[#allocation111_spill] sm:$0xff] }
 0x549   : > { %4110 = vrot.lane.b32.xlu0 %v2000_v51, %s4736_s20  ;;  %v3604_v21 = vsel %vm3579_vm14, %v3571_v1, %v3115_v0  ;;  %v3476_v51 = vsel %vm1409_vm6, %v3444_v38, %v9198_v49  ;;  %v2012_v22 = vadd.f32 %v9199_v30, %v9156_v61  ;;  %v3447_v38 = vsel %vm1343_vm4, %v4712_v13, %v9212_v2  ;;  %v9213_v49 = vld [vmem:[#allocation93_spill] sm:$0xff]  ;;  %v9214_v30 = vld [vmem:[#allocation124_spill] sm:$0xff] }
 0x54a   : > { %4108 = vrot.lane.b32.xlu1 %v1999_v18, %s4736_s20  ;;  %v9200_v18 = vld [vmem:[#allocation96_spill] sm:$0xff] }
 0x54b   : > { %v2863_v60 = vpop.permute.xlu0 %2862  ;;  %v3508_v0 = vsel %vm1475_vm8, %v3476_v51, %v9200_v18  ;;  %v3479_v51 = vsel %vm1409_vm6, %v3447_v38, %v9213_v49  ;;  %v9227_v49 = vld [vmem:[#allocation122_spill] sm:$0xff] }
 0x54c   : > { %v3243_v53 = vpop.permute.xlu1 %3242  ;;  %v3540_v14 = vsel %vm1541_vm10, %v3508_v0, %v2863_v60 }
 0x54d   : > { %4114 = vrot.lane.b32.xlu0 %v2002_v3, %s4736_s20  ;;  %v3637_v35 = vsel %vm3612_vm15, %v3604_v21, %v3243_v53  ;;  %v2013_v53 = vadd.f32 %v9156_v61, %v9203_v41  ;;  %v4710_v21 = vld [vmem:[#allocation2 + $0x140] sm:$0xff] }
 0x54e   : > { %4112 = vrot.lane.b32.xlu1 %v2001_v25, %s4736_s20 }
 0x54f   : > { %v3371_v39 = vpop.permute.xlu0 %3370 }
 0x550   : > { %v3670_v43 = vsel %vm3645_vm0, %v3637_v35, %v3371_v39  ;;  %v3245_v52 = vpop.permute.xlu1 %3244  ;;  %v9205_v35 = vld [vmem:[#allocation82_spill] sm:$0xff] }
 0x551   : > { %4118 = vrot.lane.b32.xlu0 %v2004_v32, %s4736_s20  ;;  %4596 = vmatprep.mubr.msk.f32.mxu1 %vm3694_vm1, %v3670_v43  ;;  %v3638_v12 = vsel %vm3612_vm15, %v3605_v33, %v3245_v52  ;;  %v3445_v32 = vsel %vm1343_vm4, %v4710_v21, %v9204_v42  ;;  %v2016_v39 = vadd.f32 %v9205_v35, %v9156_v61  ;;  %v9207_v52 = vld [vmem:[#allocation83_spill] sm:$0xff]  ;;  %v2105_v21 = vld [vmem:[#allocation2] sm:$0xff]  ;;  %v4713_v35 = vld [vmem:[#allocation2 + $0x168] sm:$0xff] }
 0x552   : > { %4116 = vrot.lane.b32.xlu1 %v2003_v5, %s4736_s20  ;;  %v3477_v5 = vsel %vm1409_vm6, %v3445_v32, %v9206_v62  ;;  %v2015_v11 = vadd.f32 %v9156_v61, %v9207_v52 }
 0x553   : > { %v2991_v7 = vpop.permute.xlu0 %2990  ;;  %v3509_v17 = vsel %vm1475_vm8, %v3477_v5, %v9208_v27 }
 0x554   : > { %v2865_v56 = vpop.permute.xlu1 %2864  ;;  %v3573_v59 = vsel %vm3546_vm13, %v3540_v14, %v2991_v7 }
 0x555   : > { %4122 = vrot.lane.b32.xlu0 %v2006_v31, %s4736_s20  ;;  %v3541_v31 = vsel %vm1541_vm10, %v3509_v17, %v2865_v56  ;;  %v9209_v56 = vld [vmem:[#allocation139_spill] sm:$0xff] }
 0x556   : > { %4120 = vrot.lane.b32.xlu1 %v2005_v63, %s4736_s20  ;;  %v3446_v28 = vsel %vm1343_vm4, %v4711_v54, %v9209_v56  ;;  %v4714_v54 = vld [vmem:[#allocation2 + $0x170] sm:$0xff]  ;;  %v9221_v56 = vld [vmem:[#allocation60_spill] sm:$0xff] }
 0x557   : > { %v2993_v34 = vpop.permute.xlu0 %2992 }
 0x558   : > { %v3373_v50 = vpop.permute.xlu1 %3372  ;;  %v3574_v45 = vsel %vm3546_vm13, %v3541_v31, %v2993_v34  ;;  %v9218_v31 = vld [vmem:[#allocation61_spill] sm:$0xff] }
 0x559   : > { %v3671_v48 = vsel %vm3645_vm0, %v3638_v12, %v3373_v50  ;;  %4126 = vrot.lane.b32.xlu0 %v2008_v55, %s4736_s20  ;;  %v9210_v55 = vld [vmem:[#allocation9_spill] sm:$0xff] }
 0x55a   : > { %4124 = vrot.lane.b32.xlu1 %v2007_v36, %s4736_s20  ;;  %4597 = vmatmul.mubr.msk.f32.gmra.mrb[22].mxu1 %vm3694_vm1, %v3671_v48  ;;  %v3478_v33 = vsel %vm1409_vm6, %v3446_v28, %v9210_v55  ;;  %v3449_v28 = vsel %vm1343_vm4, %v4714_v54, %v9221_v56  ;;  %v9222_v55 = vld [vmem:[#allocation168_spill] sm:$0xff] }
 0x55b   : > { %v3121_v16 = vpop.permute.xlu0 %3120  ;;  %v3510_v36 = vsel %vm1475_vm8, %v3478_v33, %v9211_v19 }
 0x55c   : > { %v3119_v10 = vpop.permute.xlu1 %3118  ;;  %v3607_v47 = vsel %vm3579_vm14, %v3574_v45, %v3121_v16 }
 0x55d   : > { %4130 = vrot.lane.b32.xlu0 %v2010_v40, %s4736_s20  ;;  %v3606_v3 = vsel %vm3579_vm14, %v3573_v59, %v3119_v10 }
 0x55e   : > { %4128 = vrot.lane.b32.xlu1 %v2009_v6, %s4736_s20 }
 0x55f   : > { %v2867_v26 = vpop.permute.xlu0 %2866 }
 0x560   : > { %v3247_v4 = vpop.permute.xlu1 %3246  ;;  %v3542_v50 = vsel %vm1541_vm10, %v3510_v36, %v2867_v26  ;;  %v9223_v36 = vld [vmem:[#allocation113_spill] sm:$0xff] }
 0x561   : > { %4134 = vrot.lane.b32.xlu0 %v2012_v22, %s4736_s20  ;;  %v3639_v20 = vsel %vm3612_vm15, %v3606_v3, %v3247_v4  ;;  %v3511_v22 = vsel %vm1475_vm8, %v3479_v51, %v9214_v30 }
 0x562   : > { %4132 = vrot.lane.b32.xlu1 %v2011_v46, %s4736_s20 }
 0x563   : > { %v3375_v25 = vpop.permute.xlu0 %3374 }
 0x564   : > { %v3672_v60 = vsel %vm3645_vm0, %v3639_v20, %v3375_v25  ;;  %v3249_v1 = vpop.permute.xlu1 %3248 }
 0x565   : > { %4138 = vrot.lane.b32.xlu0 %v2014_v15, %s4736_s20  ;;  %4599 = vmatprep.mubr.msk.f32.mxu1 %vm3694_vm1, %v3672_v60  ;;  %v3640_v9 = vsel %vm3612_vm15, %v3607_v47, %v3249_v1  ;;  %v9219_v47 = vld [vmem:[#allocation125_spill] sm:$0xff] }
 0x566   : > { %4136 = vrot.lane.b32.xlu1 %v2013_v53, %s4736_s20 }
 0x567   : > { %v2995_v43 = vpop.permute.xlu0 %2994 }
 0x568   : > { %v2869_v37 = vpop.permute.xlu1 %2868  ;;  %v3575_v8 = vsel %vm3546_vm13, %v3542_v50, %v2995_v43  ;;  %v9216_v43 = vld [vmem:[#allocation52_spill] sm:$0xff] }
 0x569   : > { %4142 = vrot.lane.b32.xlu0 %v2016_v39, %s4736_s20  ;;  %v3543_v0 = vsel %vm1541_vm10, %v3511_v22, %v2869_v37  ;;  %v9215_v39 = vld [vmem:[#allocation140_spill] sm:$0xff]  ;;  %v3418_v52 = vsel %vm1343_vm4, %v2105_v21, %v9216_v43  ;;  %v2106_v37 = vld [vmem:[#allocation2 + $0x8] sm:$0xff] }
 0x56a   : > { %4140 = vrot.lane.b32.xlu1 %v2015_v11, %s4736_s20  ;;  %v3448_v62 = vsel %vm1343_vm4, %v4713_v35, %v9215_v39  ;;  %v9217_v11 = vld [vmem:[#allocation94_spill] sm:$0xff]  ;;  %v3450_v45 = vsel %vm1409_vm6, %v3418_v52, %v9218_v31  ;;  %v3419_v50 = vsel %vm1343_vm4, %v2106_v37, %v9223_v36 }
 0x56b   : > { %v2997_v7 = vpop.permute.xlu0 %2996  ;;  %v3480_v27 = vsel %vm1409_vm6, %v3448_v62, %v9217_v11 }
 0x56c   : > { %v3377_v63 = vpop.permute.xlu1 %3376  ;;  %v3576_v57 = vsel %vm3546_vm13, %v3543_v0, %v2997_v7  ;;  %v3512_v7 = vsel %vm1475_vm8, %v3480_v27, %v9219_v47 }
 0x56d   : > { %v3673_v61 = vsel %vm3645_vm0, %v3640_v9, %v3377_v63  ;;  %v9220_v63 = vld [vmem:[#allocation31_spill] sm:$0xff] }
 0x56e   : > { %4600 = vmatmul.mubr.msk.f32.gmra.mrb[24].mxu1 %vm3694_vm1, %v3673_v61  ;;  %v3482_v61 = vsel %vm1475_vm8, %v3450_v45, %v9220_v63 }
 0x56f   : > { %v3125_v23 = vpop.permute.xlu0 %3124  ;;  %v3514_v33 = vsel %vm1541_vm10, %v3482_v61, %v9222_v55 }
 0x570   : > { %v3123_v44 = vpop.permute.xlu1 %3122  ;;  %v3609_v46 = vsel %vm3579_vm14, %v3576_v57, %v3125_v23  ;;  %v9228_v57 = vld [vmem:[#allocation145_spill] sm:$0xff] }
 0x571   : > { %v8210_v58 = vpop.f32.mrb[0].mxu1  ;;  %v3608_v40 = vsel %vm3579_vm14, %v3575_v8, %v3123_v44 }
 0x572   : > { %v8214_v34 = vpop.f32.mrb[1].mxu1 }
 0x573   : > { %v2871_v12 = vpop.permute.xlu0 %2870 }
 0x574   : > { %v3251_v48 = vpop.permute.xlu1 %3250  ;;  %v3544_v23 = vsel %vm1541_vm10, %v3512_v7, %v2871_v12 }
 0x575   : > { %v3641_v16 = vsel %vm3612_vm15, %v3608_v40, %v3251_v48  ;;  %v9224_v48 = vld [vmem:[#allocation30_spill] sm:$0xff] }
 0x576   : > { %v3481_v8 = vsel %vm1409_vm6, %v3449_v28, %v9224_v48 }
 0x577   : > { %v3379_v29 = vpop.permute.xlu0 %3378 }
 0x578   : > { %v3674_v6 = vsel %vm3645_vm0, %v3641_v16, %v3379_v29  ;;  %v3253_v10 = vpop.permute.xlu1 %3252  ;;  %v9225_v16 = vld [vmem:[#allocation6_spill] sm:$0xff] }
 0x579   : > { %4602 = vmatprep.mubr.msk.f32.mxu1 %vm3694_vm1, %v3674_v6  ;;  %v3642_v14 = vsel %vm3612_vm15, %v3609_v46, %v3253_v10  ;;  %v3451_v29 = vsel %vm1409_vm6, %v3419_v50, %v9225_v16  ;;  %v9226_v6 = vld [vmem:[#allocation167_spill] sm:$0xff] }
 0x57a   : > { %v3513_v10 = vsel %vm1475_vm8, %v3481_v8, %v9226_v6  ;;  %v3483_v51 = vsel %vm1475_vm8, %v3451_v29, %v9227_v49 }
 0x57b   : > { %v2939_v18 = vpop.permute.xlu0 %2938  ;;  %v3515_v46 = vsel %vm1541_vm10, %v3483_v51, %v9228_v57 }
 0x57c   : > { %v2873_v26 = vpop.permute.xlu1 %2872  ;;  %v3547_v40 = vsel %vm3546_vm13, %v3514_v33, %v2939_v18 }
 0x57d   : > { %v3545_v30 = vsel %vm1541_vm10, %v3513_v10, %v2873_v26  ;;  %v8290_v26 = vld [vmem:[%s8420_s4] ss:$0 sm:$0xff] }
 0x57f   : > { %v3381_v4 = vpop.permute.xlu0 %3380 }
 0x580   : > { %v3675_v59 = vsel %vm3645_vm0, %v3642_v14, %v3381_v4  ;;  %v2999_v3 = vpop.permute.xlu1 %2998 }
 0x581   : > { %v8235_v24 = vpop.f32.mrb[2].mxu1  ;;  %4603 = vmatmul.mubr.msk.f32.gmra.mrb[26].mxu1 %vm3694_vm1, %v3675_v59  ;;  %v3577_v19 = vsel %vm3546_vm13, %v3544_v23, %v2999_v3 }
 0x582   : > { %v8238_v15 = vpop.f32.mrb[3].mxu1  ;;  %v3883_v52 = vadd.f32 %v8235_v24, %v8290_v26 }
 0x583   : > { %v3001_v20 = vpop.permute.xlu0 %3000 }
 0x584   : > { %v2941_v25 = vpop.permute.xlu1 %2940  ;;  %v3578_v14 = vsel %vm3546_vm13, %v3545_v30, %v3001_v20  ;;  %v4021_v47 = vmax.f32 %v3883_v52, 0.0 }
 0x585   : > { %v3548_v59 = vsel %vm3546_vm13, %v3515_v46, %v2941_v25 }
 0x587   : > { %v3127_v41 = vpop.permute.xlu0 %3126 }
 0x588   : > { %v3067_v53 = vpop.permute.xlu1 %3066  ;;  %v3610_v12 = vsel %vm3579_vm14, %v3577_v19, %v3127_v41 }
 0x589   : > { %v3580_v13 = vsel %vm3579_vm14, %v3547_v40, %v3067_v53 }
 0x58b   : > { %v3129_v60 = vpop.permute.xlu0 %3128 }
 0x58c   : > { %v3069_v1 = vpop.permute.xlu1 %3068  ;;  %v3611_v3 = vsel %vm3579_vm14, %v3578_v14, %v3129_v60 }
 0x58d   : > { %v3581_v41 = vsel %vm3579_vm14, %v3548_v59, %v3069_v1  ;;  %v3868_v1 = vadd.f32 %v8290_v26, %v8214_v34 }
 0x58f   : > { %v3255_v42 = vpop.permute.xlu0 %3254  ;;  %v4018_v27 = vmax.f32 %v3868_v1, 0.0 }
 0x590   : > { %v3195_v32 = vpop.permute.xlu1 %3194  ;;  %v3643_v2 = vsel %vm3612_vm15, %v3610_v12, %v3255_v42 }
 0x591   : > { %v8242_v5 = vpop.f32.mrb[4].mxu1  ;;  %v3613_v22 = vsel %vm3612_vm15, %v3580_v13, %v3195_v32  ;;  %v3873_v32 = vadd.f32 %v8210_v58, %v8290_v26  ;;  %v3878_v58 = vadd.f32 %v8290_v26, %v8238_v15 }
 0x592   : > { %v8248_v17 = vpop.f32.mrb[5].mxu1  ;;  %v3893_v24 = vadd.f32 %v8242_v5, %v8290_v26 }
 0x593   : > { %v3257_v9 = vpop.permute.xlu0 %3256  ;;  %v4019_v43 = vmax.f32 %v3873_v32, 0.0  ;;  %v3888_v15 = vadd.f32 %v8290_v26, %v8248_v17 }
 0x594   : > { %v3197_v44 = vpop.permute.xlu1 %3196  ;;  %v3644_v53 = vsel %vm3612_vm15, %v3611_v3, %v3257_v9  ;;  %v4020_v9 = vmax.f32 %v3878_v58, 0.0  ;;  %v4023_v56 = vmax.f32 %v3893_v24, 0.0 }
 0x595   : > { %v3614_v21 = vsel %vm3612_vm15, %v3581_v41, %v3197_v44  ;;  %v4022_v55 = vmax.f32 %v3888_v15, 0.0 }
 0x597   : > { %v3383_v38 = vpop.permute.xlu0 %3382 }
 0x598   : > { %v3676_v18 = vsel %vm3645_vm0, %v3643_v2, %v3383_v38  ;;  %v3323_v0 = vpop.permute.xlu1 %3322 }
 0x599   : > { %v3646_v4 = vsel %vm3645_vm0, %v3613_v22, %v3323_v0  ;;  %4605 = vmatprep.mubr.msk.f32.mxu1 %vm3694_vm1, %v3676_v18 }
 0x59a   : > { %4560 = vmatprep.mubr.msk.f32.mxu0 %vm3694_vm1, %v3646_v4 }
 0x59b   : > { %v3385_v20 = vpop.permute.xlu0 %3384 }
 0x59c   : > { %v3677_v42 = vsel %vm3645_vm0, %v3644_v53, %v3385_v20  ;;  %v3325_v25 = vpop.permute.xlu1 %3324 }
 0x59d   : > { %v3647_v60 = vsel %vm3645_vm0, %v3614_v21, %v3325_v25  ;;  %4606 = vmatmul.mubr.msk.f32.gmra.mrb[28].mxu1 %vm3694_vm1, %v3677_v42 }
 0x59e   : > { %4561 = vmatmul.mubr.msk.f32.vlgmr.msra.gmra.mrb[32].mxu0 %vm3694_vm1, %v3647_v60 }
 0x59f   : > { %v8303_v35 = vpop.permute.xlu0 %4082 }
 0x5a0   : > { %v8305_v39 = vpop.permute.xlu1 %4080 }
 0x5a1   : > { %v4574_v62 = vpop.f32.mrb[6].mxu1 }
 0x5a2   : > { %v3897_v11 = vpop.f32.mrb[7].mxu1  ;;  %v3903_v28 = vadd.f32 %v4574_v62, %v8290_v26 }
 0x5a3   : > { %v4087_v37 = vpop.permute.xlu0 %4086  ;;  %v3898_v33 = vadd.f32 %v8290_v26, %v3897_v11 }
 0x5a4   : > { %v4179_v31 = vadd.f32 %v4087_v37, %v4019_v43  ;;  %v4085_v45 = vpop.permute.xlu1 %4084  ;;  %v4025_v8 = vmax.f32 %v3903_v28, 0.0 }
 0x5a5   : > { %v4178_v34 = vadd.f32 %v4085_v45, %v4018_v27  ;;  %v4024_v12 = vmax.f32 %v3898_v33, 0.0 }
 0x5a6   : > { %v4211_v7 = vmax.f32 %v4179_v31, 0.0 }
 0x5a7   : > { %v4210_v63 = vmax.f32 %v4178_v34, 0.0  ;;  %v4091_v61 = vpop.permute.xlu0 %4090 }
 0x5a8   : > { %4243 = vst.msk [vmem:[%s8315_s9 + $0x18] sm:$0xff] %vm1343_vm4, %v4211_v7  ;;  %v4181_v23 = vadd.f32 %v4091_v61, %v4021_v47  ;;  %v4089_v44 = vpop.permute.xlu1 %4088 }
 0x5a9   : > { %4242 = vst.msk [vmem:[%s8315_s9 + $0x10] sm:$0xff] %vm1343_vm4, %v4210_v63  ;;  %v4180_v54 = vadd.f32 %v4089_v44, %v4020_v9 }
 0x5aa   : > { %v4213_v5 = vmax.f32 %v4181_v23, 0.0 }
 0x5ab   : > { %v4212_v17 = vmax.f32 %v4180_v54, 0.0  ;;  %v4095_v19 = vpop.permute.xlu0 %4094 }
 0x5ac   : > { %4245 = vst.msk [vmem:[%s8315_s9 + $0x28] sm:$0xff] %vm1343_vm4, %v4213_v5  ;;  %v4183_v36 = vadd.f32 %v4095_v19, %v4023_v56  ;;  %v4093_v50 = vpop.permute.xlu1 %4092 }
 0x5ad   : > { %4244 = vst.msk [vmem:[%s8315_s9 + $0x20] sm:$0xff] %vm1343_vm4, %v4212_v17  ;;  %v4182_v48 = vadd.f32 %v4093_v50, %v4022_v55 }
 0x5ae   : > { %v4215_v40 = vmax.f32 %v4183_v36, 0.0 }
 0x5af   : > { %v4214_v16 = vmax.f32 %v4182_v48, 0.0  ;;  %v4099_v29 = vpop.permute.xlu0 %4098 }
 0x5b0   : > { %4247 = vst.msk [vmem:[%s8315_s9 + $0x38] sm:$0xff] %vm1343_vm4, %v4215_v40  ;;  %v4185_v6 = vadd.f32 %v4099_v29, %v4025_v8  ;;  %v4097_v10 = vpop.permute.xlu1 %4096 }
 0x5b1   : > { %4246 = vst.msk [vmem:[%s8315_s9 + $0x30] sm:$0xff] %vm1343_vm4, %v4214_v16  ;;  %v4184_v13 = vadd.f32 %v4097_v10, %v4024_v12  ;;  %v4577_v2 = vpop.f32.mrb[8].mxu1 }
 0x5b2   : > { %v4217_v38 = vmax.f32 %v4185_v6, 0.0  ;;  %v3913_v49 = vadd.f32 %v4577_v2, %v8290_v26  ;;  %v3907_v51 = vpop.f32.mrb[9].mxu1 }
 0x5b3   : > { %v4216_v30 = vmax.f32 %v4184_v13, 0.0  ;;  %v3908_v22 = vadd.f32 %v8290_v26, %v3907_v51  ;;  %v4103_v57 = vpop.permute.xlu0 %4102 }
 0x5b4   : > { %4249 = vst.msk [vmem:[%s8315_s9 + $0x48] sm:$0xff] %vm1343_vm4, %v4217_v38  ;;  %v4027_v18 = vmax.f32 %v3913_v49, 0.0  ;;  %v4101_v14 = vpop.permute.xlu1 %4100 }
 0x5b5   : > { %4248 = vst.msk [vmem:[%s8315_s9 + $0x40] sm:$0xff] %vm1343_vm4, %v4216_v30  ;;  %v4026_v0 = vmax.f32 %v3908_v22, 0.0 }
 0x5b6   : > { %v4187_v46 = vadd.f32 %v4103_v57, %v4027_v18 }
 0x5b7   : > { %v4186_v4 = vadd.f32 %v4101_v14, %v4026_v0  ;;  %v4107_v25 = vpop.permute.xlu0 %4106 }
 0x5b8   : > { %v4219_v59 = vmax.f32 %v4187_v46, 0.0  ;;  %v4105_v32 = vpop.permute.xlu1 %4104 }
 0x5b9   : > { %v4218_v3 = vmax.f32 %v4186_v4, 0.0 }
 0x5ba   : > { %4251 = vst.msk [vmem:[%s8315_s9 + $0x58] sm:$0xff] %vm1343_vm4, %v4219_v59 }
 0x5bb   : > { %4250 = vst.msk [vmem:[%s8315_s9 + $0x50] sm:$0xff] %vm1343_vm4, %v4218_v3  ;;  %v4111_v45 = vpop.permute.xlu0 %4110 }
 0x5bc   : > { %v4109_v47 = vpop.permute.xlu1 %4108 }
 0x5bf   : > { %v4115_v56 = vpop.permute.xlu0 %4114 }
 0x5c0   : > { %v4113_v5 = vpop.permute.xlu1 %4112 }
 0x5c1   : > { %v4580_v41 = vpop.f32.mrb[10].mxu1 }
 0x5c2   : > { %v3923_v53 = vadd.f32 %v4580_v41, %v8290_v26  ;;  %v3917_v20 = vpop.f32.mrb[11].mxu1 }
 0x5c3   : > { %v3918_v21 = vadd.f32 %v8290_v26, %v3917_v20  ;;  %v4119_v12 = vpop.permute.xlu0 %4118 }
 0x5c4   : > { %v4029_v42 = vmax.f32 %v3923_v53, 0.0  ;;  %v4117_v29 = vpop.permute.xlu1 %4116 }
 0x5c5   : > { %v4028_v60 = vmax.f32 %v3918_v21, 0.0 }
 0x5c6   : > { %v4189_v1 = vadd.f32 %v4107_v25, %v4029_v42 }
 0x5c7   : > { %v4188_v62 = vadd.f32 %v4105_v32, %v4028_v60  ;;  %v4123_v18 = vpop.permute.xlu0 %4122 }
 0x5c8   : > { %v4221_v43 = vmax.f32 %v4189_v1, 0.0  ;;  %v4121_v57 = vpop.permute.xlu1 %4120 }
 0x5c9   : > { %v4220_v52 = vmax.f32 %v4188_v62, 0.0 }
 0x5ca   : > { %4253 = vst.msk [vmem:[%s8315_s9 + $0x68] sm:$0xff] %vm1343_vm4, %v4221_v43 }
 0x5cb   : > { %4252 = vst.msk [vmem:[%s8315_s9 + $0x60] sm:$0xff] %vm1343_vm4, %v4220_v52  ;;  %v4127_v42 = vpop.permute.xlu0 %4126 }
 0x5cc   : > { %v4125_v60 = vpop.permute.xlu1 %4124 }
 0x5d1   : > { %v4583_v11 = vpop.f32.mrb[12].mxu1 }
 0x5d2   : > { %v3933_v27 = vadd.f32 %v4583_v11, %v8290_v26  ;;  %v3927_v58 = vpop.f32.mrb[13].mxu1 }
 0x5d3   : > { %v3928_v37 = vadd.f32 %v8290_v26, %v3927_v58 }
 0x5d4   : > { %v4031_v31 = vmax.f32 %v3933_v27, 0.0 }
 0x5d5   : > { %v4030_v34 = vmax.f32 %v3928_v37, 0.0 }
 0x5d6   : > { %v4191_v24 = vadd.f32 %v4111_v45, %v4031_v31  ;;  %v4131_v31 = vpop.permute.xlu0 %4130 }
 0x5d7   : > { %v4190_v7 = vadd.f32 %v4109_v47, %v4030_v34  ;;  %v4129_v34 = vpop.permute.xlu1 %4128 }
 0x5d8   : > { %v4223_v9 = vmax.f32 %v4191_v24, 0.0 }
 0x5d9   : > { %v4222_v15 = vmax.f32 %v4190_v7, 0.0 }
 0x5da   : > { %4255 = vst.msk [vmem:[%s8315_s9 + $0x78] sm:$0xff] %vm1343_vm4, %v4223_v9 }
 0x5db   : > { %4254 = vst.msk [vmem:[%s8315_s9 + $0x70] sm:$0xff] %vm1343_vm4, %v4222_v15 }
 0x5e1   : > { %v4586_v63 = vpop.f32.mrb[14].mxu1 }
 0x5e2   : > { %v3943_v61 = vadd.f32 %v4586_v63, %v8290_v26  ;;  %v3937_v23 = vpop.f32.mrb[15].mxu1 }
 0x5e3   : > { %v3938_v44 = vadd.f32 %v8290_v26, %v3937_v23 }
 0x5e4   : > { %v4033_v54 = vmax.f32 %v3943_v61, 0.0 }
 0x5e5   : > { %v4032_v28 = vmax.f32 %v3938_v44, 0.0 }
 0x5e6   : > { %v4193_v55 = vadd.f32 %v4115_v56, %v4033_v54  ;;  %v4135_v54 = vpop.permute.xlu0 %4134 }
 0x5e7   : > { %v4192_v33 = vadd.f32 %v4113_v5, %v4032_v28  ;;  %v4133_v28 = vpop.permute.xlu1 %4132 }
 0x5e8   : > { %v4225_v17 = vmax.f32 %v4193_v55, 0.0 }
 0x5e9   : > { %v4224_v19 = vmax.f32 %v4192_v33, 0.0 }
 0x5ea   : > { %4257 = vst.msk [vmem:[%s8315_s9 + $0x88] sm:$0xff] %vm1343_vm4, %v4225_v17 }
 0x5eb   : > { %4256 = vst.msk [vmem:[%s8315_s9 + $0x80] sm:$0xff] %vm1343_vm4, %v4224_v19 }
 0x5f1   : > { %v4589_v36 = vpop.f32.mrb[16].mxu1 }
 0x5f2   : > { %v3953_v50 = vadd.f32 %v4589_v36, %v8290_v26  ;;  %v3947_v48 = vpop.f32.mrb[17].mxu1 }
 0x5f3   : > { %v3948_v8 = vadd.f32 %v8290_v26, %v3947_v48 }
 0x5f4   : > { %v4035_v40 = vmax.f32 %v3953_v50, 0.0 }
 0x5f5   : > { %v4034_v16 = vmax.f32 %v3948_v8, 0.0 }
 0x5f6   : > { %v4195_v6 = vadd.f32 %v4119_v12, %v4035_v40  ;;  %v4139_v40 = vpop.permute.xlu0 %4138 }
 0x5f7   : > { %v4194_v10 = vadd.f32 %v4117_v29, %v4034_v16  ;;  %v4137_v16 = vpop.permute.xlu1 %4136 }
 0x5f8   : > { %v4227_v13 = vmax.f32 %v4195_v6, 0.0 }
 0x5f9   : > { %v4226_v2 = vmax.f32 %v4194_v10, 0.0 }
 0x5fa   : > { %4259 = vst.msk [vmem:[%s8315_s9 + $0x98] sm:$0xff] %vm1343_vm4, %v4227_v13 }
 0x5fb   : > { %4258 = vst.msk [vmem:[%s8315_s9 + $0x90] sm:$0xff] %vm1343_vm4, %v4226_v2 }
 0x605   : > { %v4592_v38 = vpop.f32.mrb[18].mxu1 }
 0x606   : > { %v3963_v49 = vadd.f32 %v4592_v38, %v8290_v26  ;;  %v3957_v51 = vpop.f32.mrb[19].mxu1 }
 0x607   : > { %v3958_v30 = vadd.f32 %v8290_v26, %v3957_v51 }
 0x608   : > { %v4037_v22 = vmax.f32 %v3963_v49, 0.0 }
 0x609   : > { %v4036_v0 = vmax.f32 %v3958_v30, 0.0 }
 0x60a   : > { %v4197_v46 = vadd.f32 %v4123_v18, %v4037_v22 }
 0x60b   : > { %v4196_v14 = vadd.f32 %v4121_v57, %v4036_v0 }
 0x60c   : > { %v4229_v4 = vmax.f32 %v4197_v46, 0.0  ;;  %v4143_v46 = vpop.permute.xlu0 %4142 }
 0x60d   : > { %v4228_v59 = vmax.f32 %v4196_v14, 0.0 }
 0x60e   : > { %4261 = vst.msk [vmem:[%s8315_s9 + $0xa8] sm:$0xff] %vm1343_vm4, %v4229_v4 }
 0x60f   : > { %4260 = vst.msk [vmem:[%s8315_s9 + $0xa0] sm:$0xff] %vm1343_vm4, %v4228_v59  ;;  %v4141_v59 = vpop.permute.xlu1 %4140 }
 0x619   : > { %v4595_v3 = vpop.f32.mrb[20].mxu1 }
 0x61a   : > { %v3973_v41 = vadd.f32 %v4595_v3, %v8290_v26  ;;  %v3967_v53 = vpop.f32.mrb[21].mxu1 }
 0x61b   : > { %v3968_v20 = vadd.f32 %v8290_v26, %v3967_v53 }
 0x61c   : > { %v4039_v21 = vmax.f32 %v3973_v41, 0.0 }
 0x61d   : > { %v4038_v25 = vmax.f32 %v3968_v20, 0.0 }
 0x61e   : > { %v4199_v32 = vadd.f32 %v4127_v42, %v4039_v21 }
 0x61f   : > { %v4198_v1 = vadd.f32 %v4125_v60, %v4038_v25 }
 0x620   : > { %v4231_v62 = vmax.f32 %v4199_v32, 0.0 }
 0x621   : > { %v4230_v43 = vmax.f32 %v4198_v1, 0.0 }
 0x622   : > { %4263 = vst.msk [vmem:[%s8315_s9 + $0xb8] sm:$0xff] %vm1343_vm4, %v4231_v62 }
 0x623   : > { %4262 = vst.msk [vmem:[%s8315_s9 + $0xb0] sm:$0xff] %vm1343_vm4, %v4230_v43 }
 0x62d   : > { %v4598_v52 = vpop.f32.mrb[22].mxu1 }
 0x62e   : > { %v3983_v11 = vadd.f32 %v4598_v52, %v8290_v26  ;;  %v3977_v27 = vpop.f32.mrb[23].mxu1 }
 0x62f   : > { %v3978_v58 = vadd.f32 %v8290_v26, %v3977_v27 }
 0x630   : > { %v4041_v37 = vmax.f32 %v3983_v11, 0.0 }
 0x631   : > { %v4040_v45 = vmax.f32 %v3978_v58, 0.0 }
 0x632   : > { %v4201_v47 = vadd.f32 %v4131_v31, %v4041_v37 }
 0x633   : > { %v4200_v24 = vadd.f32 %v4129_v34, %v4040_v45 }
 0x634   : > { %v4233_v7 = vmax.f32 %v4201_v47, 0.0 }
 0x635   : > { %v4232_v9 = vmax.f32 %v4200_v24, 0.0 }
 0x636   : > { %4265 = vst.msk [vmem:[%s8315_s9 + $0xc8] sm:$0xff] %vm1343_vm4, %v4233_v7 }
 0x637   : > { %4264 = vst.msk [vmem:[%s8315_s9 + $0xc0] sm:$0xff] %vm1343_vm4, %v4232_v9 }
 0x641   : > { %v4601_v15 = vpop.f32.mrb[24].mxu1 }
 0x642   : > { %v3993_v63 = vadd.f32 %v4601_v15, %v8290_v26  ;;  %v3987_v61 = vpop.f32.mrb[25].mxu1 }
 0x643   : > { %v3988_v23 = vadd.f32 %v8290_v26, %v3987_v61 }
 0x644   : > { %v4043_v44 = vmax.f32 %v3993_v63, 0.0 }
 0x645   : > { %v4042_v56 = vmax.f32 %v3988_v23, 0.0 }
 0x646   : > { %v4203_v5 = vadd.f32 %v4135_v54, %v4043_v44 }
 0x647   : > { %v4202_v55 = vadd.f32 %v4133_v28, %v4042_v56 }
 0x648   : > { %v4235_v33 = vmax.f32 %v4203_v5, 0.0 }
 0x649   : > { %v4234_v17 = vmax.f32 %v4202_v55, 0.0 }
 0x64a   : > { %4267 = vst.msk [vmem:[%s8315_s9 + $0xd8] sm:$0xff] %vm1343_vm4, %v4235_v33 }
 0x64b   : > { %4266 = vst.msk [vmem:[%s8315_s9 + $0xd0] sm:$0xff] %vm1343_vm4, %v4234_v17 }
 0x654   : > { %v4604_v19 = vpop.f32.mrb[26].mxu1 }
 0x655   : > { %v4003_v36 = vadd.f32 %v4604_v19, %v8290_v26  ;;  %v3997_v50 = vpop.f32.mrb[27].mxu1 }
 0x656   : > { %v3998_v48 = vadd.f32 %v8290_v26, %v3997_v50 }
 0x657   : > { %v4045_v8 = vmax.f32 %v4003_v36, 0.0 }
 0x658   : > { %v4044_v12 = vmax.f32 %v3998_v48, 0.0 }
 0x659   : > { %v4205_v29 = vadd.f32 %v4139_v40, %v4045_v8 }
 0x65a   : > { %v4204_v6 = vadd.f32 %v4137_v16, %v4044_v12 }
 0x65b   : > { %v4237_v10 = vmax.f32 %v4205_v29, 0.0 }
 0x65c   : > { %v4236_v13 = vmax.f32 %v4204_v6, 0.0 }
 0x65d   : > { %4269 = vst.msk [vmem:[%s8315_s9 + $0xe8] sm:$0xff] %vm1343_vm4, %v4237_v10 }
 0x65e   : > { %4268 = vst.msk [vmem:[%s8315_s9 + $0xe0] sm:$0xff] %vm1343_vm4, %v4236_v13 }
 0x670   : > { %v4607_v2 = vpop.f32.mrb[28].mxu1 }
 0x671   : > { %v4013_v38 = vadd.f32 %v4607_v2, %v8290_v26  ;;  %v4562_v49 = vpop.f32.mrb[32].mxu0  ;;  %v4007_v51 = vpop.f32.mrb[29].mxu1 }
 0x672   : > { %v3863_v30 = vadd.f32 %v4562_v49, %v8290_v26  ;;  %v4008_v22 = vadd.f32 %v8290_v26, %v4007_v51  ;;  %v3857_v18 = vpop.f32.mrb[33].mxu0 }
 0x673   : > { %v4047_v0 = vmax.f32 %v4013_v38, 0.0  ;;  %v3858_v57 = vadd.f32 %v8290_v26, %v3857_v18 }
 0x674   : > { %v4017_v14 = vmax.f32 %v3863_v30, 0.0  ;;  %v4046_v4 = vmax.f32 %v4008_v22, 0.0 }
 0x675   : > { %v4207_v3 = vadd.f32 %v4143_v46, %v4047_v0  ;;  %v4016_v41 = vmax.f32 %v3858_v57, 0.0 }
 0x676   : > { %v4177_v53 = vadd.f32 %v8303_v35, %v4017_v14  ;;  %v4206_v20 = vadd.f32 %v4141_v59, %v4046_v4 }
 0x677   : > { %v4239_v21 = vmax.f32 %v4207_v3, 0.0  ;;  %v4176_v42 = vadd.f32 %v8305_v39, %v4016_v41 }
 0x678   : > { %v4209_v25 = vmax.f32 %v4177_v53, 0.0  ;;  %v4238_v60 = vmax.f32 %v4206_v20, 0.0 }
 0x679   : > { %4271 = vst.msk [vmem:[%s8315_s9 + $0xf8] sm:$0xff] %vm1343_vm4, %v4239_v21  ;;  %v4208_v32 = vmax.f32 %v4176_v42, 0.0 }
 0x67a   : > { %4241 = vst.msk [vmem:[%s8315_s9 + $0x8] sm:$0xff] %vm1343_vm4, %v4209_v25  ;;  %4270 = vst.msk [vmem:[%s8315_s9 + $0xf0] sm:$0xff] %vm1343_vm4, %v4238_v60 }
 0x67b   : > { %4240 = vst.msk [vmem:[%s8315_s9] sm:$0xff] %vm1343_vm4, %v4208_v32 }
 0x67c PF: > { %s16_s21 = sadd.s32 1, %s4721_s21  }
 0x67d   : > { %p13_p4 = scmp.ge.s32.totalorder %s16_s21, 4  }
 0x67f   :  { %15 = sbr.rel (!%p13_p4) target bundleno = 1 (0x1), region = 76 }

</bundles_post_ra>
